<compile_context>
chip_gen: v6e
topology: v6e:2x2x1
jax: 0.10.0
libtpu: 0.0.40
codegen_flags: <defaults>
</compile_context>

<pallas_src>
import functools

import jax
import jax.numpy as jnp
from jax.experimental import pallas as pl
from jax.experimental.pallas import tpu as pltpu


def _spatial_attention_kernel(H, W, K, x_ref, w_ref, o_ref, pad_ref):
    # x_ref : (1, C, H, W) VMEM block (one batch element)
    # w_ref : (2*K*K,)     SMEM, flattened torch conv1.weight[0] in [ci, ky, kx] order
    # o_ref : (1, 1, H, W) VMEM output block
    # pad_ref: (2, H+K-1, W+K-1) VMEM scratch (zero-padded channel stats)
    x = x_ref[0]                                  # (C, H, W)
    avg = jnp.mean(x, axis=0)                     # (H, W)  channel mean
    mx = jnp.max(x, axis=0)                       # (H, W)  channel max

    pad = K // 2
    pad_ref[...] = jnp.zeros_like(pad_ref)        # zero border ('same' padding)
    pad_ref[0, pad:pad + H, pad:pad + W] = avg
    pad_ref[1, pad:pad + H, pad:pad + W] = mx
    sp = pad_ref[...]                             # (2, H+K-1, W+K-1)

    # 7x7 conv, 2 in channels -> 1 out channel, fully unrolled tap loop.
    acc = jnp.zeros((H, W), jnp.float32)
    for ci in range(2):
        for ky in range(K):
            for kx in range(K):
                wv = w_ref[ci * K * K + ky * K + kx]          # scalar from SMEM
                acc = acc + wv * sp[ci, ky:ky + H, kx:kx + W]

    o_ref[0, 0] = jax.nn.sigmoid(acc)


@functools.partial(jax.jit, static_argnames=("kernel_size",))
def spatial_attention(x, conv_weight, kernel_size=7):
    """x: (B, C, H, W) f32; conv_weight: (1, 2, K, K) f32 (torch Conv2d weight, bias=False).

    Returns sigmoid(conv7x7(cat([mean_c(x), max_c(x)], 1))) of shape (B, 1, H, W).
    """
    B, C, H, W = x.shape
    K = kernel_size
    w_flat = conv_weight.reshape(-1).astype(jnp.float32)      # (2*K*K,)

    return pl.pallas_call(
        functools.partial(_spatial_attention_kernel, H, W, K),
        out_shape=jax.ShapeDtypeStruct((B, 1, H, W), jnp.float32),
        grid=(B,),
        in_specs=[
            pl.BlockSpec((1, C, H, W), lambda b: (b, 0, 0, 0)),
            pl.BlockSpec(memory_space=pltpu.MemorySpace.SMEM),
        ],
        out_specs=pl.BlockSpec((1, 1, H, W), lambda b: (b, 0, 0, 0)),
        scratch_shapes=[pltpu.VMEM((2, H + K - 1, W + K - 1), jnp.float32)],
        compiler_params=pltpu.CompilerParams(
            dimension_semantics=("parallel",)),
    )(x.astype(jnp.float32), w_flat)


if __name__ == "__main__":
    key = jax.random.PRNGKey(0)
    kx, kw = jax.random.split(key)

    B, C, H, W = 2, 4, 16, 16
    x = jax.random.normal(kx, (B, C, H, W), jnp.float32)              # NCHW like PyTorch
    conv_w = 0.1 * jax.random.normal(kw, (1, 2, 7, 7), jnp.float32)   # conv1.weight, bias=False

    out = spatial_attention(x, conv_w)
    jax.block_until_ready(out)
    assert out.shape == (B, 1, H, W), out.shape

    # Pure-JAX reference (same semantics as the PyTorch module).
    avg = jnp.mean(x, axis=1, keepdims=True)
    mxv = jnp.max(x, axis=1, keepdims=True)
    stats = jnp.concatenate([avg, mxv], axis=1)                       # (B, 2, H, W)
    ref = jax.nn.sigmoid(jax.lax.conv(stats, conv_w, (1, 1), "SAME"))
    err = float(jnp.max(jnp.abs(out - ref)))
    assert jnp.allclose(out, ref, atol=2e-5, rtol=2e-5), err

    print("KERNEL_OK")
</pallas_src>

<mosaic_0001>
module attributes {stable_mosaic.version = 11 : i64} {
  func.func @_spatial_attention_kernel(%arg0: i32, %arg1: memref<1x4x16x16xf32, #tpu.memory_space<vmem>>, %arg2: memref<98xf32, #tpu.memory_space<smem>>, %arg3: memref<1x1x16x16xf32, #tpu.memory_space<vmem>>, %arg4: memref<2x22x22xf32, #tpu.memory_space<vmem>>) attributes {dimension_semantics = [#tpu.dimension_semantics<parallel>], iteration_bounds = array<i64: 2>, scalar_prefetch = 0 : i64, scratch_operands = 1 : i64, tpu.core_type = #tpu.core_type<tc>, window_params = [{transform_indices = @transform_0, window_bounds = array<i64: 1, 4, 16, 16>}, {transform_indices = @transform_1, window_bounds = array<i64: 98>}, {transform_indices = @transform_2, window_bounds = array<i64: 1, 1, 16, 16>}]} {
    %c0 = arith.constant 0 : index
    %c0_0 = arith.constant 0 : index
    %c0_1 = arith.constant 0 : index
    %c0_2 = arith.constant 0 : index
    %0 = vector.load %arg1[%c0, %c0_0, %c0_1, %c0_2] : memref<1x4x16x16xf32, #tpu.memory_space<vmem>>, vector<1x4x16x16xf32>
    %1 = vector.shape_cast %0 : vector<1x4x16x16xf32> to vector<4x16x16xf32>
    %cst = arith.constant dense<0.000000e+00> : vector<16x16xf32>
    %2 = vector.multi_reduction <add>, %1, %cst [0] : vector<4x16x16xf32> to vector<16x16xf32>
    %cst_3 = arith.constant 4.000000e+00 : f32
    %3 = vector.broadcast %cst_3 : f32 to vector<16x16xf32>
    %4 = arith.divf %2, %3 : vector<16x16xf32>
    %cst_4 = arith.constant dense<0xFF800000> : vector<16x16xf32>
    %5 = vector.multi_reduction <maximumf>, %1, %cst_4 [0] : vector<4x16x16xf32> to vector<16x16xf32>
    %cst_5 = arith.constant 0.000000e+00 : f32
    %6 = vector.broadcast %cst_5 : f32 to vector<2x22x22xf32>
    %c0_6 = arith.constant 0 : index
    %c0_7 = arith.constant 0 : index
    %c0_8 = arith.constant 0 : index
    %7 = vector.load %arg4[%c0_6, %c0_7, %c0_8] : memref<2x22x22xf32, #tpu.memory_space<vmem>>, vector<2x22x22xf32>
    tpu.vector_store %arg4[%c0_6, %c0_7, %c0_8], %6 {strides = array<i32>} : memref<2x22x22xf32, #tpu.memory_space<vmem>>, vector<2x22x22xf32>,
    %c0_9 = arith.constant 0 : index
    %c3 = arith.constant 3 : index
    %c3_10 = arith.constant 3 : index
    %8 = vector.load %arg4[%c0_9, %c3, %c3_10] : memref<2x22x22xf32, #tpu.memory_space<vmem>>, vector<1x16x16xf32>
    %9 = vector.shape_cast %8 : vector<1x16x16xf32> to vector<16x16xf32>
    %10 = vector.shape_cast %4 : vector<16x16xf32> to vector<1x16x16xf32>
    tpu.vector_store %arg4[%c0_9, %c3, %c3_10], %10 {strides = array<i32>} : memref<2x22x22xf32, #tpu.memory_space<vmem>>, vector<1x16x16xf32>,
    %c1 = arith.constant 1 : index
    %c3_11 = arith.constant 3 : index
    %c3_12 = arith.constant 3 : index
    %11 = vector.load %arg4[%c1, %c3_11, %c3_12] : memref<2x22x22xf32, #tpu.memory_space<vmem>>, vector<1x16x16xf32>
    %12 = vector.shape_cast %11 : vector<1x16x16xf32> to vector<16x16xf32>
    %13 = vector.shape_cast %5 : vector<16x16xf32> to vector<1x16x16xf32>
    tpu.vector_store %arg4[%c1, %c3_11, %c3_12], %13 {strides = array<i32>} : memref<2x22x22xf32, #tpu.memory_space<vmem>>, vector<1x16x16xf32>,
    %c0_13 = arith.constant 0 : index
    %c0_14 = arith.constant 0 : index
    %c0_15 = arith.constant 0 : index
    %14 = vector.load %arg4[%c0_13, %c0_14, %c0_15] : memref<2x22x22xf32, #tpu.memory_space<vmem>>, vector<2x22x22xf32>
    %cst_16 = arith.constant 0.000000e+00 : f32
    %15 = vector.broadcast %cst_16 : f32 to vector<16x16xf32>
    %c0_17 = arith.constant 0 : index
    %16 = memref.load %arg2[%c0_17] : memref<98xf32, #tpu.memory_space<smem>>
    %17 = vector.extract_strided_slice %14 {offsets = [0, 0, 0], sizes = [1, 16, 16], strides = [1, 1, 1]} : vector<2x22x22xf32> to vector<1x16x16xf32>
    %18 = vector.shape_cast %17 : vector<1x16x16xf32> to vector<16x16xf32>
    %19 = vector.broadcast %16 : f32 to vector<16x16xf32>
    %20 = arith.mulf %19, %18 : vector<16x16xf32>
    %21 = arith.addf %15, %20 : vector<16x16xf32>
    %c1_18 = arith.constant 1 : index
    %22 = memref.load %arg2[%c1_18] : memref<98xf32, #tpu.memory_space<smem>>
    %23 = vector.extract_strided_slice %14 {offsets = [0, 0, 1], sizes = [1, 16, 16], strides = [1, 1, 1]} : vector<2x22x22xf32> to vector<1x16x16xf32>
    %24 = vector.shape_cast %23 : vector<1x16x16xf32> to vector<16x16xf32>
    %25 = vector.broadcast %22 : f32 to vector<16x16xf32>
    %26 = arith.mulf %25, %24 : vector<16x16xf32>
    %27 = arith.addf %21, %26 : vector<16x16xf32>
    %c2 = arith.constant 2 : index
    %28 = memref.load %arg2[%c2] : memref<98xf32, #tpu.memory_space<smem>>
    %29 = vector.extract_strided_slice %14 {offsets = [0, 0, 2], sizes = [1, 16, 16], strides = [1, 1, 1]} : vector<2x22x22xf32> to vector<1x16x16xf32>
    %30 = vector.shape_cast %29 : vector<1x16x16xf32> to vector<16x16xf32>
    %31 = vector.broadcast %28 : f32 to vector<16x16xf32>
    %32 = arith.mulf %31, %30 : vector<16x16xf32>
    %33 = arith.addf %27, %32 : vector<16x16xf32>
    %c3_19 = arith.constant 3 : index
    %34 = memref.load %arg2[%c3_19] : memref<98xf32, #tpu.memory_space<smem>>
    %35 = vector.extract_strided_slice %14 {offsets = [0, 0, 3], sizes = [1, 16, 16], strides = [1, 1, 1]} : vector<2x22x22xf32> to vector<1x16x16xf32>
    %36 = vector.shape_cast %35 : vector<1x16x16xf32> to vector<16x16xf32>
    %37 = vector.broadcast %34 : f32 to vector<16x16xf32>
    %38 = arith.mulf %37, %36 : vector<16x16xf32>
    %39 = arith.addf %33, %38 : vector<16x16xf32>
    %c4 = arith.constant 4 : index
    %40 = memref.load %arg2[%c4] : memref<98xf32, #tpu.memory_space<smem>>
    %41 = vector.extract_strided_slice %14 {offsets = [0, 0, 4], sizes = [1, 16, 16], strides = [1, 1, 1]} : vector<2x22x22xf32> to vector<1x16x16xf32>
    %42 = vector.shape_cast %41 : vector<1x16x16xf32> to vector<16x16xf32>
    %43 = vector.broadcast %40 : f32 to vector<16x16xf32>
    %44 = arith.mulf %43, %42 : vector<16x16xf32>
    %45 = arith.addf %39, %44 : vector<16x16xf32>
    %c5 = arith.constant 5 : index
    %46 = memref.load %arg2[%c5] : memref<98xf32, #tpu.memory_space<smem>>
    %47 = vector.extract_strided_slice %14 {offsets = [0, 0, 5], sizes = [1, 16, 16], strides = [1, 1, 1]} : vector<2x22x22xf32> to vector<1x16x16xf32>
    %48 = vector.shape_cast %47 : vector<1x16x16xf32> to vector<16x16xf32>
    %49 = vector.broadcast %46 : f32 to vector<16x16xf32>
    %50 = arith.mulf %49, %48 : vector<16x16xf32>
    %51 = arith.addf %45, %50 : vector<16x16xf32>
    %c6 = arith.constant 6 : index
    %52 = memref.load %arg2[%c6] : memref<98xf32, #tpu.memory_space<smem>>
    %53 = vector.extract_strided_slice %14 {offsets = [0, 0, 6], sizes = [1, 16, 16], strides = [1, 1, 1]} : vector<2x22x22xf32> to vector<1x16x16xf32>
    %54 = vector.shape_cast %53 : vector<1x16x16xf32> to vector<16x16xf32>
    %55 = vector.broadcast %52 : f32 to vector<16x16xf32>
    %56 = arith.mulf %55, %54 : vector<16x16xf32>
    %57 = arith.addf %51, %56 : vector<16x16xf32>
    %c7 = arith.constant 7 : index
    %58 = memref.load %arg2[%c7] : memref<98xf32, #tpu.memory_space<smem>>
    %59 = vector.extract_strided_slice %14 {offsets = [0, 1, 0], sizes = [1, 16, 16], strides = [1, 1, 1]} : vector<2x22x22xf32> to vector<1x16x16xf32>
    %60 = vector.shape_cast %59 : vector<1x16x16xf32> to vector<16x16xf32>
    %61 = vector.broadcast %58 : f32 to vector<16x16xf32>
    %62 = arith.mulf %61, %60 : vector<16x16xf32>
    %63 = arith.addf %57, %62 : vector<16x16xf32>
    %c8 = arith.constant 8 : index
    %64 = memref.load %arg2[%c8] : memref<98xf32, #tpu.memory_space<smem>>
    %65 = vector.extract_strided_slice %14 {offsets = [0, 1, 1], sizes = [1, 16, 16], strides = [1, 1, 1]} : vector<2x22x22xf32> to vector<1x16x16xf32>
    %66 = vector.shape_cast %65 : vector<1x16x16xf32> to vector<16x16xf32>
    %67 = vector.broadcast %64 : f32 to vector<16x16xf32>
    %68 = arith.mulf %67, %66 : vector<16x16xf32>
    %69 = arith.addf %63, %68 : vector<16x16xf32>
    %c9 = arith.constant 9 : index
    %70 = memref.load %arg2[%c9] : memref<98xf32, #tpu.memory_space<smem>>
    %71 = vector.extract_strided_slice %14 {offsets = [0, 1, 2], sizes = [1, 16, 16], strides = [1, 1, 1]} : vector<2x22x22xf32> to vector<1x16x16xf32>
    %72 = vector.shape_cast %71 : vector<1x16x16xf32> to vector<16x16xf32>
    %73 = vector.broadcast %70 : f32 to vector<16x16xf32>
    %74 = arith.mulf %73, %72 : vector<16x16xf32>
    %75 = arith.addf %69, %74 : vector<16x16xf32>
    %c10 = arith.constant 10 : index
    %76 = memref.load %arg2[%c10] : memref<98xf32, #tpu.memory_space<smem>>
    %77 = vector.extract_strided_slice %14 {offsets = [0, 1, 3], sizes = [1, 16, 16], strides = [1, 1, 1]} : vector<2x22x22xf32> to vector<1x16x16xf32>
    %78 = vector.shape_cast %77 : vector<1x16x16xf32> to vector<16x16xf32>
    %79 = vector.broadcast %76 : f32 to vector<16x16xf32>
    %80 = arith.mulf %79, %78 : vector<16x16xf32>
    %81 = arith.addf %75, %80 : vector<16x16xf32>
    %c11 = arith.constant 11 : index
    %82 = memref.load %arg2[%c11] : memref<98xf32, #tpu.memory_space<smem>>
    %83 = vector.extract_strided_slice %14 {offsets = [0, 1, 4], sizes = [1, 16, 16], strides = [1, 1, 1]} : vector<2x22x22xf32> to vector<1x16x16xf32>
    %84 = vector.shape_cast %83 : vector<1x16x16xf32> to vector<16x16xf32>
    %85 = vector.broadcast %82 : f32 to vector<16x16xf32>
    %86 = arith.mulf %85, %84 : vector<16x16xf32>
    %87 = arith.addf %81, %86 : vector<16x16xf32>
    %c12 = arith.constant 12 : index
    %88 = memref.load %arg2[%c12] : memref<98xf32, #tpu.memory_space<smem>>
    %89 = vector.extract_strided_slice %14 {offsets = [0, 1, 5], sizes = [1, 16, 16], strides = [1, 1, 1]} : vector<2x22x22xf32> to vector<1x16x16xf32>
    %90 = vector.shape_cast %89 : vector<1x16x16xf32> to vector<16x16xf32>
    %91 = vector.broadcast %88 : f32 to vector<16x16xf32>
    %92 = arith.mulf %91, %90 : vector<16x16xf32>
    %93 = arith.addf %87, %92 : vector<16x16xf32>
    %c13 = arith.constant 13 : index
    %94 = memref.load %arg2[%c13] : memref<98xf32, #tpu.memory_space<smem>>
    %95 = vector.extract_strided_slice %14 {offsets = [0, 1, 6], sizes = [1, 16, 16], strides = [1, 1, 1]} : vector<2x22x22xf32> to vector<1x16x16xf32>
    %96 = vector.shape_cast %95 : vector<1x16x16xf32> to vector<16x16xf32>
    %97 = vector.broadcast %94 : f32 to vector<16x16xf32>
    %98 = arith.mulf %97, %96 : vector<16x16xf32>
    %99 = arith.addf %93, %98 : vector<16x16xf32>
    %c14 = arith.constant 14 : index
    %100 = memref.load %arg2[%c14] : memref<98xf32, #tpu.memory_space<smem>>
    %101 = vector.extract_strided_slice %14 {offsets = [0, 2, 0], sizes = [1, 16, 16], strides = [1, 1, 1]} : vector<2x22x22xf32> to vector<1x16x16xf32>
    %102 = vector.shape_cast %101 : vector<1x16x16xf32> to vector<16x16xf32>
    %103 = vector.broadcast %100 : f32 to vector<16x16xf32>
    %104 = arith.mulf %103, %102 : vector<16x16xf32>
    %105 = arith.addf %99, %104 : vector<16x16xf32>
    %c15 = arith.constant 15 : index
    %106 = memref.load %arg2[%c15] : memref<98xf32, #tpu.memory_space<smem>>
    %107 = vector.extract_strided_slice %14 {offsets = [0, 2, 1], sizes = [1, 16, 16], strides = [1, 1, 1]} : vector<2x22x22xf32> to vector<1x16x16xf32>
    %108 = vector.shape_cast %107 : vector<1x16x16xf32> to vector<16x16xf32>
    %109 = vector.broadcast %106 : f32 to vector<16x16xf32>
    %110 = arith.mulf %109, %108 : vector<16x16xf32>
    %111 = arith.addf %105, %110 : vector<16x16xf32>
    %c16 = arith.constant 16 : index
    %112 = memref.load %arg2[%c16] : memref<98xf32, #tpu.memory_space<smem>>
    %113 = vector.extract_strided_slice %14 {offsets = [0, 2, 2], sizes = [1, 16, 16], strides = [1, 1, 1]} : vector<2x22x22xf32> to vector<1x16x16xf32>
    %114 = vector.shape_cast %113 : vector<1x16x16xf32> to vector<16x16xf32>
    %115 = vector.broadcast %112 : f32 to vector<16x16xf32>
    %116 = arith.mulf %115, %114 : vector<16x16xf32>
    %117 = arith.addf %111, %116 : vector<16x16xf32>
    %c17 = arith.constant 17 : index
    %118 = memref.load %arg2[%c17] : memref<98xf32, #tpu.memory_space<smem>>
    %119 = vector.extract_strided_slice %14 {offsets = [0, 2, 3], sizes = [1, 16, 16], strides = [1, 1, 1]} : vector<2x22x22xf32> to vector<1x16x16xf32>
    %120 = vector.shape_cast %119 : vector<1x16x16xf32> to vector<16x16xf32>
    %121 = vector.broadcast %118 : f32 to vector<16x16xf32>
    %122 = arith.mulf %121, %120 : vector<16x16xf32>
    %123 = arith.addf %117, %122 : vector<16x16xf32>
    %c18 = arith.constant 18 : index
    %124 = memref.load %arg2[%c18] : memref<98xf32, #tpu.memory_space<smem>>
    %125 = vector.extract_strided_slice %14 {offsets = [0, 2, 4], sizes = [1, 16, 16], strides = [1, 1, 1]} : vector<2x22x22xf32> to vector<1x16x16xf32>
    %126 = vector.shape_cast %125 : vector<1x16x16xf32> to vector<16x16xf32>
    %127 = vector.broadcast %124 : f32 to vector<16x16xf32>
    %128 = arith.mulf %127, %126 : vector<16x16xf32>
    %129 = arith.addf %123, %128 : vector<16x16xf32>
    %c19 = arith.constant 19 : index
    %130 = memref.load %arg2[%c19] : memref<98xf32, #tpu.memory_space<smem>>
    %131 = vector.extract_strided_slice %14 {offsets = [0, 2, 5], sizes = [1, 16, 16], strides = [1, 1, 1]} : vector<2x22x22xf32> to vector<1x16x16xf32>
    %132 = vector.shape_cast %131 : vector<1x16x16xf32> to vector<16x16xf32>
    %133 = vector.broadcast %130 : f32 to vector<16x16xf32>
    %134 = arith.mulf %133, %132 : vector<16x16xf32>
    %135 = arith.addf %129, %134 : vector<16x16xf32>
    %c20 = arith.constant 20 : index
    %136 = memref.load %arg2[%c20] : memref<98xf32, #tpu.memory_space<smem>>
    %137 = vector.extract_strided_slice %14 {offsets = [0, 2, 6], sizes = [1, 16, 16], strides = [1, 1, 1]} : vector<2x22x22xf32> to vector<1x16x16xf32>
    %138 = vector.shape_cast %137 : vector<1x16x16xf32> to vector<16x16xf32>
    %139 = vector.broadcast %136 : f32 to vector<16x16xf32>
    %140 = arith.mulf %139, %138 : vector<16x16xf32>
    %141 = arith.addf %135, %140 : vector<16x16xf32>
    %c21 = arith.constant 21 : index
    %142 = memref.load %arg2[%c21] : memref<98xf32, #tpu.memory_space<smem>>
    %143 = vector.extract_strided_slice %14 {offsets = [0, 3, 0], sizes = [1, 16, 16], strides = [1, 1, 1]} : vector<2x22x22xf32> to vector<1x16x16xf32>
    %144 = vector.shape_cast %143 : vector<1x16x16xf32> to vector<16x16xf32>
    %145 = vector.broadcast %142 : f32 to vector<16x16xf32>
    %146 = arith.mulf %145, %144 : vector<16x16xf32>
    %147 = arith.addf %141, %146 : vector<16x16xf32>
    %c22 = arith.constant 22 : index
    %148 = memref.load %arg2[%c22] : memref<98xf32, #tpu.memory_space<smem>>
    %149 = vector.extract_strided_slice %14 {offsets = [0, 3, 1], sizes = [1, 16, 16], strides = [1, 1, 1]} : vector<2x22x22xf32> to vector<1x16x16xf32>
    %150 = vector.shape_cast %149 : vector<1x16x16xf32> to vector<16x16xf32>
    %151 = vector.broadcast %148 : f32 to vector<16x16xf32>
    %152 = arith.mulf %151, %150 : vector<16x16xf32>
    %153 = arith.addf %147, %152 : vector<16x16xf32>
    %c23 = arith.constant 23 : index
    %154 = memref.load %arg2[%c23] : memref<98xf32, #tpu.memory_space<smem>>
    %155 = vector.extract_strided_slice %14 {offsets = [0, 3, 2], sizes = [1, 16, 16], strides = [1, 1, 1]} : vector<2x22x22xf32> to vector<1x16x16xf32>
    %156 = vector.shape_cast %155 : vector<1x16x16xf32> to vector<16x16xf32>
    %157 = vector.broadcast %154 : f32 to vector<16x16xf32>
    %158 = arith.mulf %157, %156 : vector<16x16xf32>
    %159 = arith.addf %153, %158 : vector<16x16xf32>
    %c24 = arith.constant 24 : index
    %160 = memref.load %arg2[%c24] : memref<98xf32, #tpu.memory_space<smem>>
    %161 = vector.extract_strided_slice %14 {offsets = [0, 3, 3], sizes = [1, 16, 16], strides = [1, 1, 1]} : vector<2x22x22xf32> to vector<1x16x16xf32>
    %162 = vector.shape_cast %161 : vector<1x16x16xf32> to vector<16x16xf32>
    %163 = vector.broadcast %160 : f32 to vector<16x16xf32>
    %164 = arith.mulf %163, %162 : vector<16x16xf32>
    %165 = arith.addf %159, %164 : vector<16x16xf32>
    %c25 = arith.constant 25 : index
    %166 = memref.load %arg2[%c25] : memref<98xf32, #tpu.memory_space<smem>>
    %167 = vector.extract_strided_slice %14 {offsets = [0, 3, 4], sizes = [1, 16, 16], strides = [1, 1, 1]} : vector<2x22x22xf32> to vector<1x16x16xf32>
    %168 = vector.shape_cast %167 : vector<1x16x16xf32> to vector<16x16xf32>
    %169 = vector.broadcast %166 : f32 to vector<16x16xf32>
    %170 = arith.mulf %169, %168 : vector<16x16xf32>
    %171 = arith.addf %165, %170 : vector<16x16xf32>
    %c26 = arith.constant 26 : index
    %172 = memref.load %arg2[%c26] : memref<98xf32, #tpu.memory_space<smem>>
    %173 = vector.extract_strided_slice %14 {offsets = [0, 3, 5], sizes = [1, 16, 16], strides = [1, 1, 1]} : vector<2x22x22xf32> to vector<1x16x16xf32>
    %174 = vector.shape_cast %173 : vector<1x16x16xf32> to vector<16x16xf32>
    %175 = vector.broadcast %172 : f32 to vector<16x16xf32>
    %176 = arith.mulf %175, %174 : vector<16x16xf32>
    %177 = arith.addf %171, %176 : vector<16x16xf32>
    %c27 = arith.constant 27 : index
    %178 = memref.load %arg2[%c27] : memref<98xf32, #tpu.memory_space<smem>>
    %179 = vector.extract_strided_slice %14 {offsets = [0, 3, 6], sizes = [1, 16, 16], strides = [1, 1, 1]} : vector<2x22x22xf32> to vector<1x16x16xf32>
    %180 = vector.shape_cast %179 : vector<1x16x16xf32> to vector<16x16xf32>
    %181 = vector.broadcast %178 : f32 to vector<16x16xf32>
    %182 = arith.mulf %181, %180 : vector<16x16xf32>
    %183 = arith.addf %177, %182 : vector<16x16xf32>
    %c28 = arith.constant 28 : index
    %184 = memref.load %arg2[%c28] : memref<98xf32, #tpu.memory_space<smem>>
    %185 = vector.extract_strided_slice %14 {offsets = [0, 4, 0], sizes = [1, 16, 16], strides = [1, 1, 1]} : vector<2x22x22xf32> to vector<1x16x16xf32>
    %186 = vector.shape_cast %185 : vector<1x16x16xf32> to vector<16x16xf32>
    %187 = vector.broadcast %184 : f32 to vector<16x16xf32>
    %188 = arith.mulf %187, %186 : vector<16x16xf32>
    %189 = arith.addf %183, %188 : vector<16x16xf32>
    %c29 = arith.constant 29 : index
    %190 = memref.load %arg2[%c29] : memref<98xf32, #tpu.memory_space<smem>>
    %191 = vector.extract_strided_slice %14 {offsets = [0, 4, 1], sizes = [1, 16, 16], strides = [1, 1, 1]} : vector<2x22x22xf32> to vector<1x16x16xf32>
    %192 = vector.shape_cast %191 : vector<1x16x16xf32> to vector<16x16xf32>
    %193 = vector.broadcast %190 : f32 to vector<16x16xf32>
    %194 = arith.mulf %193, %192 : vector<16x16xf32>
    %195 = arith.addf %189, %194 : vector<16x16xf32>
    %c30 = arith.constant 30 : index
    %196 = memref.load %arg2[%c30] : memref<98xf32, #tpu.memory_space<smem>>
    %197 = vector.extract_strided_slice %14 {offsets = [0, 4, 2], sizes = [1, 16, 16], strides = [1, 1, 1]} : vector<2x22x22xf32> to vector<1x16x16xf32>
    %198 = vector.shape_cast %197 : vector<1x16x16xf32> to vector<16x16xf32>
    %199 = vector.broadcast %196 : f32 to vector<16x16xf32>
    %200 = arith.mulf %199, %198 : vector<16x16xf32>
    %201 = arith.addf %195, %200 : vector<16x16xf32>
    %c31 = arith.constant 31 : index
    %202 = memref.load %arg2[%c31] : memref<98xf32, #tpu.memory_space<smem>>
    %203 = vector.extract_strided_slice %14 {offsets = [0, 4, 3], sizes = [1, 16, 16], strides = [1, 1, 1]} : vector<2x22x22xf32> to vector<1x16x16xf32>
    %204 = vector.shape_cast %203 : vector<1x16x16xf32> to vector<16x16xf32>
    %205 = vector.broadcast %202 : f32 to vector<16x16xf32>
    %206 = arith.mulf %205, %204 : vector<16x16xf32>
    %207 = arith.addf %201, %206 : vector<16x16xf32>
    %c32 = arith.constant 32 : index
    %208 = memref.load %arg2[%c32] : memref<98xf32, #tpu.memory_space<smem>>
    %209 = vector.extract_strided_slice %14 {offsets = [0, 4, 4], sizes = [1, 16, 16], strides = [1, 1, 1]} : vector<2x22x22xf32> to vector<1x16x16xf32>
    %210 = vector.shape_cast %209 : vector<1x16x16xf32> to vector<16x16xf32>
    %211 = vector.broadcast %208 : f32 to vector<16x16xf32>
    %212 = arith.mulf %211, %210 : vector<16x16xf32>
    %213 = arith.addf %207, %212 : vector<16x16xf32>
    %c33 = arith.constant 33 : index
    %214 = memref.load %arg2[%c33] : memref<98xf32, #tpu.memory_space<smem>>
    %215 = vector.extract_strided_slice %14 {offsets = [0, 4, 5], sizes = [1, 16, 16], strides = [1, 1, 1]} : vector<2x22x22xf32> to vector<1x16x16xf32>
    %216 = vector.shape_cast %215 : vector<1x16x16xf32> to vector<16x16xf32>
    %217 = vector.broadcast %214 : f32 to vector<16x16xf32>
    %218 = arith.mulf %217, %216 : vector<16x16xf32>
    %219 = arith.addf %213, %218 : vector<16x16xf32>
    %c34 = arith.constant 34 : index
    %220 = memref.load %arg2[%c34] : memref<98xf32, #tpu.memory_space<smem>>
    %221 = vector.extract_strided_slice %14 {offsets = [0, 4, 6], sizes = [1, 16, 16], strides = [1, 1, 1]} : vector<2x22x22xf32> to vector<1x16x16xf32>
    %222 = vector.shape_cast %221 : vector<1x16x16xf32> to vector<16x16xf32>
    %223 = vector.broadcast %220 : f32 to vector<16x16xf32>
    %224 = arith.mulf %223, %222 : vector<16x16xf32>
    %225 = arith.addf %219, %224 : vector<16x16xf32>
    %c35 = arith.constant 35 : index
    %226 = memref.load %arg2[%c35] : memref<98xf32, #tpu.memory_space<smem>>
    %227 = vector.extract_strided_slice %14 {offsets = [0, 5, 0], sizes = [1, 16, 16], strides = [1, 1, 1]} : vector<2x22x22xf32> to vector<1x16x16xf32>
    %228 = vector.shape_cast %227 : vector<1x16x16xf32> to vector<16x16xf32>
    %229 = vector.broadcast %226 : f32 to vector<16x16xf32>
    %230 = arith.mulf %229, %228 : vector<16x16xf32>
    %231 = arith.addf %225, %230 : vector<16x16xf32>
    %c36 = arith.constant 36 : index
    %232 = memref.load %arg2[%c36] : memref<98xf32, #tpu.memory_space<smem>>
    %233 = vector.extract_strided_slice %14 {offsets = [0, 5, 1], sizes = [1, 16, 16], strides = [1, 1, 1]} : vector<2x22x22xf32> to vector<1x16x16xf32>
    %234 = vector.shape_cast %233 : vector<1x16x16xf32> to vector<16x16xf32>
    %235 = vector.broadcast %232 : f32 to vector<16x16xf32>
    %236 = arith.mulf %235, %234 : vector<16x16xf32>
    %237 = arith.addf %231, %236 : vector<16x16xf32>
    %c37 = arith.constant 37 : index
    %238 = memref.load %arg2[%c37] : memref<98xf32, #tpu.memory_space<smem>>
    %239 = vector.extract_strided_slice %14 {offsets = [0, 5, 2], sizes = [1, 16, 16], strides = [1, 1, 1]} : vector<2x22x22xf32> to vector<1x16x16xf32>
    %240 = vector.shape_cast %239 : vector<1x16x16xf32> to vector<16x16xf32>
    %241 = vector.broadcast %238 : f32 to vector<16x16xf32>
    %242 = arith.mulf %241, %240 : vector<16x16xf32>
    %243 = arith.addf %237, %242 : vector<16x16xf32>
    %c38 = arith.constant 38 : index
    %244 = memref.load %arg2[%c38] : memref<98xf32, #tpu.memory_space<smem>>
    %245 = vector.extract_strided_slice %14 {offsets = [0, 5, 3], sizes = [1, 16, 16], strides = [1, 1, 1]} : vector<2x22x22xf32> to vector<1x16x16xf32>
    %246 = vector.shape_cast %245 : vector<1x16x16xf32> to vector<16x16xf32>
    %247 = vector.broadcast %244 : f32 to vector<16x16xf32>
    %248 = arith.mulf %247, %246 : vector<16x16xf32>
    %249 = arith.addf %243, %248 : vector<16x16xf32>
    %c39 = arith.constant 39 : index
    %250 = memref.load %arg2[%c39] : memref<98xf32, #tpu.memory_space<smem>>
    %251 = vector.extract_strided_slice %14 {offsets = [0, 5, 4], sizes = [1, 16, 16], strides = [1, 1, 1]} : vector<2x22x22xf32> to vector<1x16x16xf32>
    %252 = vector.shape_cast %251 : vector<1x16x16xf32> to vector<16x16xf32>
    %253 = vector.broadcast %250 : f32 to vector<16x16xf32>
    %254 = arith.mulf %253, %252 : vector<16x16xf32>
    %255 = arith.addf %249, %254 : vector<16x16xf32>
    %c40 = arith.constant 40 : index
    %256 = memref.load %arg2[%c40] : memref<98xf32, #tpu.memory_space<smem>>
    %257 = vector.extract_strided_slice %14 {offsets = [0, 5, 5], sizes = [1, 16, 16], strides = [1, 1, 1]} : vector<2x22x22xf32> to vector<1x16x16xf32>
    %258 = vector.shape_cast %257 : vector<1x16x16xf32> to vector<16x16xf32>
    %259 = vector.broadcast %256 : f32 to vector<16x16xf32>
    %260 = arith.mulf %259, %258 : vector<16x16xf32>
    %261 = arith.addf %255, %260 : vector<16x16xf32>
    %c41 = arith.constant 41 : index
    %262 = memref.load %arg2[%c41] : memref<98xf32, #tpu.memory_space<smem>>
    %263 = vector.extract_strided_slice %14 {offsets = [0, 5, 6], sizes = [1, 16, 16], strides = [1, 1, 1]} : vector<2x22x22xf32> to vector<1x16x16xf32>
    %264 = vector.shape_cast %263 : vector<1x16x16xf32> to vector<16x16xf32>
    %265 = vector.broadcast %262 : f32 to vector<16x16xf32>
    %266 = arith.mulf %265, %264 : vector<16x16xf32>
    %267 = arith.addf %261, %266 : vector<16x16xf32>
    %c42 = arith.constant 42 : index
    %268 = memref.load %arg2[%c42] : memref<98xf32, #tpu.memory_space<smem>>
    %269 = vector.extract_strided_slice %14 {offsets = [0, 6, 0], sizes = [1, 16, 16], strides = [1, 1, 1]} : vector<2x22x22xf32> to vector<1x16x16xf32>
    %270 = vector.shape_cast %269 : vector<1x16x16xf32> to vector<16x16xf32>
    %271 = vector.broadcast %268 : f32 to vector<16x16xf32>
    %272 = arith.mulf %271, %270 : vector<16x16xf32>
    %273 = arith.addf %267, %272 : vector<16x16xf32>
    %c43 = arith.constant 43 : index
    %274 = memref.load %arg2[%c43] : memref<98xf32, #tpu.memory_space<smem>>
    %275 = vector.extract_strided_slice %14 {offsets = [0, 6, 1], sizes = [1, 16, 16], strides = [1, 1, 1]} : vector<2x22x22xf32> to vector<1x16x16xf32>
    %276 = vector.shape_cast %275 : vector<1x16x16xf32> to vector<16x16xf32>
    %277 = vector.broadcast %274 : f32 to vector<16x16xf32>
    %278 = arith.mulf %277, %276 : vector<16x16xf32>
    %279 = arith.addf %273, %278 : vector<16x16xf32>
    %c44 = arith.constant 44 : index
    %280 = memref.load %arg2[%c44] : memref<98xf32, #tpu.memory_space<smem>>
    %281 = vector.extract_strided_slice %14 {offsets = [0, 6, 2], sizes = [1, 16, 16], strides = [1, 1, 1]} : vector<2x22x22xf32> to vector<1x16x16xf32>
    %282 = vector.shape_cast %281 : vector<1x16x16xf32> to vector<16x16xf32>
    %283 = vector.broadcast %280 : f32 to vector<16x16xf32>
    %284 = arith.mulf %283, %282 : vector<16x16xf32>
    %285 = arith.addf %279, %284 : vector<16x16xf32>
    %c45 = arith.constant 45 : index
    %286 = memref.load %arg2[%c45] : memref<98xf32, #tpu.memory_space<smem>>
    %287 = vector.extract_strided_slice %14 {offsets = [0, 6, 3], sizes = [1, 16, 16], strides = [1, 1, 1]} : vector<2x22x22xf32> to vector<1x16x16xf32>
    %288 = vector.shape_cast %287 : vector<1x16x16xf32> to vector<16x16xf32>
    %289 = vector.broadcast %286 : f32 to vector<16x16xf32>
    %290 = arith.mulf %289, %288 : vector<16x16xf32>
    %291 = arith.addf %285, %290 : vector<16x16xf32>
    %c46 = arith.constant 46 : index
    %292 = memref.load %arg2[%c46] : memref<98xf32, #tpu.memory_space<smem>>
    %293 = vector.extract_strided_slice %14 {offsets = [0, 6, 4], sizes = [1, 16, 16], strides = [1, 1, 1]} : vector<2x22x22xf32> to vector<1x16x16xf32>
    %294 = vector.shape_cast %293 : vector<1x16x16xf32> to vector<16x16xf32>
    %295 = vector.broadcast %292 : f32 to vector<16x16xf32>
    %296 = arith.mulf %295, %294 : vector<16x16xf32>
    %297 = arith.addf %291, %296 : vector<16x16xf32>
    %c47 = arith.constant 47 : index
    %298 = memref.load %arg2[%c47] : memref<98xf32, #tpu.memory_space<smem>>
    %299 = vector.extract_strided_slice %14 {offsets = [0, 6, 5], sizes = [1, 16, 16], strides = [1, 1, 1]} : vector<2x22x22xf32> to vector<1x16x16xf32>
    %300 = vector.shape_cast %299 : vector<1x16x16xf32> to vector<16x16xf32>
    %301 = vector.broadcast %298 : f32 to vector<16x16xf32>
    %302 = arith.mulf %301, %300 : vector<16x16xf32>
    %303 = arith.addf %297, %302 : vector<16x16xf32>
    %c48 = arith.constant 48 : index
    %304 = memref.load %arg2[%c48] : memref<98xf32, #tpu.memory_space<smem>>
    %305 = vector.extract_strided_slice %14 {offsets = [0, 6, 6], sizes = [1, 16, 16], strides = [1, 1, 1]} : vector<2x22x22xf32> to vector<1x16x16xf32>
    %306 = vector.shape_cast %305 : vector<1x16x16xf32> to vector<16x16xf32>
    %307 = vector.broadcast %304 : f32 to vector<16x16xf32>
    %308 = arith.mulf %307, %306 : vector<16x16xf32>
    %309 = arith.addf %303, %308 : vector<16x16xf32>
    %c49 = arith.constant 49 : index
    %310 = memref.load %arg2[%c49] : memref<98xf32, #tpu.memory_space<smem>>
    %311 = vector.extract_strided_slice %14 {offsets = [1, 0, 0], sizes = [1, 16, 16], strides = [1, 1, 1]} : vector<2x22x22xf32> to vector<1x16x16xf32>
    %312 = vector.shape_cast %311 : vector<1x16x16xf32> to vector<16x16xf32>
    %313 = vector.broadcast %310 : f32 to vector<16x16xf32>
    %314 = arith.mulf %313, %312 : vector<16x16xf32>
    %315 = arith.addf %309, %314 : vector<16x16xf32>
    %c50 = arith.constant 50 : index
    %316 = memref.load %arg2[%c50] : memref<98xf32, #tpu.memory_space<smem>>
    %317 = vector.extract_strided_slice %14 {offsets = [1, 0, 1], sizes = [1, 16, 16], strides = [1, 1, 1]} : vector<2x22x22xf32> to vector<1x16x16xf32>
    %318 = vector.shape_cast %317 : vector<1x16x16xf32> to vector<16x16xf32>
    %319 = vector.broadcast %316 : f32 to vector<16x16xf32>
    %320 = arith.mulf %319, %318 : vector<16x16xf32>
    %321 = arith.addf %315, %320 : vector<16x16xf32>
    %c51 = arith.constant 51 : index
    %322 = memref.load %arg2[%c51] : memref<98xf32, #tpu.memory_space<smem>>
    %323 = vector.extract_strided_slice %14 {offsets = [1, 0, 2], sizes = [1, 16, 16], strides = [1, 1, 1]} : vector<2x22x22xf32> to vector<1x16x16xf32>
    %324 = vector.shape_cast %323 : vector<1x16x16xf32> to vector<16x16xf32>
    %325 = vector.broadcast %322 : f32 to vector<16x16xf32>
    %326 = arith.mulf %325, %324 : vector<16x16xf32>
    %327 = arith.addf %321, %326 : vector<16x16xf32>
    %c52 = arith.constant 52 : index
    %328 = memref.load %arg2[%c52] : memref<98xf32, #tpu.memory_space<smem>>
    %329 = vector.extract_strided_slice %14 {offsets = [1, 0, 3], sizes = [1, 16, 16], strides = [1, 1, 1]} : vector<2x22x22xf32> to vector<1x16x16xf32>
    %330 = vector.shape_cast %329 : vector<1x16x16xf32> to vector<16x16xf32>
    %331 = vector.broadcast %328 : f32 to vector<16x16xf32>
    %332 = arith.mulf %331, %330 : vector<16x16xf32>
    %333 = arith.addf %327, %332 : vector<16x16xf32>
    %c53 = arith.constant 53 : index
    %334 = memref.load %arg2[%c53] : memref<98xf32, #tpu.memory_space<smem>>
    %335 = vector.extract_strided_slice %14 {offsets = [1, 0, 4], sizes = [1, 16, 16], strides = [1, 1, 1]} : vector<2x22x22xf32> to vector<1x16x16xf32>
    %336 = vector.shape_cast %335 : vector<1x16x16xf32> to vector<16x16xf32>
    %337 = vector.broadcast %334 : f32 to vector<16x16xf32>
    %338 = arith.mulf %337, %336 : vector<16x16xf32>
    %339 = arith.addf %333, %338 : vector<16x16xf32>
    %c54 = arith.constant 54 : index
    %340 = memref.load %arg2[%c54] : memref<98xf32, #tpu.memory_space<smem>>
    %341 = vector.extract_strided_slice %14 {offsets = [1, 0, 5], sizes = [1, 16, 16], strides = [1, 1, 1]} : vector<2x22x22xf32> to vector<1x16x16xf32>
    %342 = vector.shape_cast %341 : vector<1x16x16xf32> to vector<16x16xf32>
    %343 = vector.broadcast %340 : f32 to vector<16x16xf32>
    %344 = arith.mulf %343, %342 : vector<16x16xf32>
    %345 = arith.addf %339, %344 : vector<16x16xf32>
    %c55 = arith.constant 55 : index
    %346 = memref.load %arg2[%c55] : memref<98xf32, #tpu.memory_space<smem>>
    %347 = vector.extract_strided_slice %14 {offsets = [1, 0, 6], sizes = [1, 16, 16], strides = [1, 1, 1]} : vector<2x22x22xf32> to vector<1x16x16xf32>
    %348 = vector.shape_cast %347 : vector<1x16x16xf32> to vector<16x16xf32>
    %349 = vector.broadcast %346 : f32 to vector<16x16xf32>
    %350 = arith.mulf %349, %348 : vector<16x16xf32>
    %351 = arith.addf %345, %350 : vector<16x16xf32>
    %c56 = arith.constant 56 : index
    %352 = memref.load %arg2[%c56] : memref<98xf32, #tpu.memory_space<smem>>
    %353 = vector.extract_strided_slice %14 {offsets = [1, 1, 0], sizes = [1, 16, 16], strides = [1, 1, 1]} : vector<2x22x22xf32> to vector<1x16x16xf32>
    %354 = vector.shape_cast %353 : vector<1x16x16xf32> to vector<16x16xf32>
    %355 = vector.broadcast %352 : f32 to vector<16x16xf32>
    %356 = arith.mulf %355, %354 : vector<16x16xf32>
    %357 = arith.addf %351, %356 : vector<16x16xf32>
    %c57 = arith.constant 57 : index
    %358 = memref.load %arg2[%c57] : memref<98xf32, #tpu.memory_space<smem>>
    %359 = vector.extract_strided_slice %14 {offsets = [1, 1, 1], sizes = [1, 16, 16], strides = [1, 1, 1]} : vector<2x22x22xf32> to vector<1x16x16xf32>
    %360 = vector.shape_cast %359 : vector<1x16x16xf32> to vector<16x16xf32>
    %361 = vector.broadcast %358 : f32 to vector<16x16xf32>
    %362 = arith.mulf %361, %360 : vector<16x16xf32>
    %363 = arith.addf %357, %362 : vector<16x16xf32>
    %c58 = arith.constant 58 : index
    %364 = memref.load %arg2[%c58] : memref<98xf32, #tpu.memory_space<smem>>
    %365 = vector.extract_strided_slice %14 {offsets = [1, 1, 2], sizes = [1, 16, 16], strides = [1, 1, 1]} : vector<2x22x22xf32> to vector<1x16x16xf32>
    %366 = vector.shape_cast %365 : vector<1x16x16xf32> to vector<16x16xf32>
    %367 = vector.broadcast %364 : f32 to vector<16x16xf32>
    %368 = arith.mulf %367, %366 : vector<16x16xf32>
    %369 = arith.addf %363, %368 : vector<16x16xf32>
    %c59 = arith.constant 59 : index
    %370 = memref.load %arg2[%c59] : memref<98xf32, #tpu.memory_space<smem>>
    %371 = vector.extract_strided_slice %14 {offsets = [1, 1, 3], sizes = [1, 16, 16], strides = [1, 1, 1]} : vector<2x22x22xf32> to vector<1x16x16xf32>
    %372 = vector.shape_cast %371 : vector<1x16x16xf32> to vector<16x16xf32>
    %373 = vector.broadcast %370 : f32 to vector<16x16xf32>
    %374 = arith.mulf %373, %372 : vector<16x16xf32>
    %375 = arith.addf %369, %374 : vector<16x16xf32>
    %c60 = arith.constant 60 : index
    %376 = memref.load %arg2[%c60] : memref<98xf32, #tpu.memory_space<smem>>
    %377 = vector.extract_strided_slice %14 {offsets = [1, 1, 4], sizes = [1, 16, 16], strides = [1, 1, 1]} : vector<2x22x22xf32> to vector<1x16x16xf32>
    %378 = vector.shape_cast %377 : vector<1x16x16xf32> to vector<16x16xf32>
    %379 = vector.broadcast %376 : f32 to vector<16x16xf32>
    %380 = arith.mulf %379, %378 : vector<16x16xf32>
    %381 = arith.addf %375, %380 : vector<16x16xf32>
    %c61 = arith.constant 61 : index
    %382 = memref.load %arg2[%c61] : memref<98xf32, #tpu.memory_space<smem>>
    %383 = vector.extract_strided_slice %14 {offsets = [1, 1, 5], sizes = [1, 16, 16], strides = [1, 1, 1]} : vector<2x22x22xf32> to vector<1x16x16xf32>
    %384 = vector.shape_cast %383 : vector<1x16x16xf32> to vector<16x16xf32>
    %385 = vector.broadcast %382 : f32 to vector<16x16xf32>
    %386 = arith.mulf %385, %384 : vector<16x16xf32>
    %387 = arith.addf %381, %386 : vector<16x16xf32>
    %c62 = arith.constant 62 : index
    %388 = memref.load %arg2[%c62] : memref<98xf32, #tpu.memory_space<smem>>
    %389 = vector.extract_strided_slice %14 {offsets = [1, 1, 6], sizes = [1, 16, 16], strides = [1, 1, 1]} : vector<2x22x22xf32> to vector<1x16x16xf32>
    %390 = vector.shape_cast %389 : vector<1x16x16xf32> to vector<16x16xf32>
    %391 = vector.broadcast %388 : f32 to vector<16x16xf32>
    %392 = arith.mulf %391, %390 : vector<16x16xf32>
    %393 = arith.addf %387, %392 : vector<16x16xf32>
    %c63 = arith.constant 63 : index
    %394 = memref.load %arg2[%c63] : memref<98xf32, #tpu.memory_space<smem>>
    %395 = vector.extract_strided_slice %14 {offsets = [1, 2, 0], sizes = [1, 16, 16], strides = [1, 1, 1]} : vector<2x22x22xf32> to vector<1x16x16xf32>
    %396 = vector.shape_cast %395 : vector<1x16x16xf32> to vector<16x16xf32>
    %397 = vector.broadcast %394 : f32 to vector<16x16xf32>
    %398 = arith.mulf %397, %396 : vector<16x16xf32>
    %399 = arith.addf %393, %398 : vector<16x16xf32>
    %c64 = arith.constant 64 : index
    %400 = memref.load %arg2[%c64] : memref<98xf32, #tpu.memory_space<smem>>
    %401 = vector.extract_strided_slice %14 {offsets = [1, 2, 1], sizes = [1, 16, 16], strides = [1, 1, 1]} : vector<2x22x22xf32> to vector<1x16x16xf32>
    %402 = vector.shape_cast %401 : vector<1x16x16xf32> to vector<16x16xf32>
    %403 = vector.broadcast %400 : f32 to vector<16x16xf32>
    %404 = arith.mulf %403, %402 : vector<16x16xf32>
    %405 = arith.addf %399, %404 : vector<16x16xf32>
    %c65 = arith.constant 65 : index
    %406 = memref.load %arg2[%c65] : memref<98xf32, #tpu.memory_space<smem>>
    %407 = vector.extract_strided_slice %14 {offsets = [1, 2, 2], sizes = [1, 16, 16], strides = [1, 1, 1]} : vector<2x22x22xf32> to vector<1x16x16xf32>
    %408 = vector.shape_cast %407 : vector<1x16x16xf32> to vector<16x16xf32>
    %409 = vector.broadcast %406 : f32 to vector<16x16xf32>
    %410 = arith.mulf %409, %408 : vector<16x16xf32>
    %411 = arith.addf %405, %410 : vector<16x16xf32>
    %c66 = arith.constant 66 : index
    %412 = memref.load %arg2[%c66] : memref<98xf32, #tpu.memory_space<smem>>
    %413 = vector.extract_strided_slice %14 {offsets = [1, 2, 3], sizes = [1, 16, 16], strides = [1, 1, 1]} : vector<2x22x22xf32> to vector<1x16x16xf32>
    %414 = vector.shape_cast %413 : vector<1x16x16xf32> to vector<16x16xf32>
    %415 = vector.broadcast %412 : f32 to vector<16x16xf32>
    %416 = arith.mulf %415, %414 : vector<16x16xf32>
    %417 = arith.addf %411, %416 : vector<16x16xf32>
    %c67 = arith.constant 67 : index
    %418 = memref.load %arg2[%c67] : memref<98xf32, #tpu.memory_space<smem>>
    %419 = vector.extract_strided_slice %14 {offsets = [1, 2, 4], sizes = [1, 16, 16], strides = [1, 1, 1]} : vector<2x22x22xf32> to vector<1x16x16xf32>
    %420 = vector.shape_cast %419 : vector<1x16x16xf32> to vector<16x16xf32>
    %421 = vector.broadcast %418 : f32 to vector<16x16xf32>
    %422 = arith.mulf %421, %420 : vector<16x16xf32>
    %423 = arith.addf %417, %422 : vector<16x16xf32>
    %c68 = arith.constant 68 : index
    %424 = memref.load %arg2[%c68] : memref<98xf32, #tpu.memory_space<smem>>
    %425 = vector.extract_strided_slice %14 {offsets = [1, 2, 5], sizes = [1, 16, 16], strides = [1, 1, 1]} : vector<2x22x22xf32> to vector<1x16x16xf32>
    %426 = vector.shape_cast %425 : vector<1x16x16xf32> to vector<16x16xf32>
    %427 = vector.broadcast %424 : f32 to vector<16x16xf32>
    %428 = arith.mulf %427, %426 : vector<16x16xf32>
    %429 = arith.addf %423, %428 : vector<16x16xf32>
    %c69 = arith.constant 69 : index
    %430 = memref.load %arg2[%c69] : memref<98xf32, #tpu.memory_space<smem>>
    %431 = vector.extract_strided_slice %14 {offsets = [1, 2, 6], sizes = [1, 16, 16], strides = [1, 1, 1]} : vector<2x22x22xf32> to vector<1x16x16xf32>
    %432 = vector.shape_cast %431 : vector<1x16x16xf32> to vector<16x16xf32>
    %433 = vector.broadcast %430 : f32 to vector<16x16xf32>
    %434 = arith.mulf %433, %432 : vector<16x16xf32>
    %435 = arith.addf %429, %434 : vector<16x16xf32>
    %c70 = arith.constant 70 : index
    %436 = memref.load %arg2[%c70] : memref<98xf32, #tpu.memory_space<smem>>
    %437 = vector.extract_strided_slice %14 {offsets = [1, 3, 0], sizes = [1, 16, 16], strides = [1, 1, 1]} : vector<2x22x22xf32> to vector<1x16x16xf32>
    %438 = vector.shape_cast %437 : vector<1x16x16xf32> to vector<16x16xf32>
    %439 = vector.broadcast %436 : f32 to vector<16x16xf32>
    %440 = arith.mulf %439, %438 : vector<16x16xf32>
    %441 = arith.addf %435, %440 : vector<16x16xf32>
    %c71 = arith.constant 71 : index
    %442 = memref.load %arg2[%c71] : memref<98xf32, #tpu.memory_space<smem>>
    %443 = vector.extract_strided_slice %14 {offsets = [1, 3, 1], sizes = [1, 16, 16], strides = [1, 1, 1]} : vector<2x22x22xf32> to vector<1x16x16xf32>
    %444 = vector.shape_cast %443 : vector<1x16x16xf32> to vector<16x16xf32>
    %445 = vector.broadcast %442 : f32 to vector<16x16xf32>
    %446 = arith.mulf %445, %444 : vector<16x16xf32>
    %447 = arith.addf %441, %446 : vector<16x16xf32>
    %c72 = arith.constant 72 : index
    %448 = memref.load %arg2[%c72] : memref<98xf32, #tpu.memory_space<smem>>
    %449 = vector.extract_strided_slice %14 {offsets = [1, 3, 2], sizes = [1, 16, 16], strides = [1, 1, 1]} : vector<2x22x22xf32> to vector<1x16x16xf32>
    %450 = vector.shape_cast %449 : vector<1x16x16xf32> to vector<16x16xf32>
    %451 = vector.broadcast %448 : f32 to vector<16x16xf32>
    %452 = arith.mulf %451, %450 : vector<16x16xf32>
    %453 = arith.addf %447, %452 : vector<16x16xf32>
    %c73 = arith.constant 73 : index
    %454 = memref.load %arg2[%c73] : memref<98xf32, #tpu.memory_space<smem>>
    %455 = vector.extract_strided_slice %14 {offsets = [1, 3, 3], sizes = [1, 16, 16], strides = [1, 1, 1]} : vector<2x22x22xf32> to vector<1x16x16xf32>
    %456 = vector.shape_cast %455 : vector<1x16x16xf32> to vector<16x16xf32>
    %457 = vector.broadcast %454 : f32 to vector<16x16xf32>
    %458 = arith.mulf %457, %456 : vector<16x16xf32>
    %459 = arith.addf %453, %458 : vector<16x16xf32>
    %c74 = arith.constant 74 : index
    %460 = memref.load %arg2[%c74] : memref<98xf32, #tpu.memory_space<smem>>
    %461 = vector.extract_strided_slice %14 {offsets = [1, 3, 4], sizes = [1, 16, 16], strides = [1, 1, 1]} : vector<2x22x22xf32> to vector<1x16x16xf32>
    %462 = vector.shape_cast %461 : vector<1x16x16xf32> to vector<16x16xf32>
    %463 = vector.broadcast %460 : f32 to vector<16x16xf32>
    %464 = arith.mulf %463, %462 : vector<16x16xf32>
    %465 = arith.addf %459, %464 : vector<16x16xf32>
    %c75 = arith.constant 75 : index
    %466 = memref.load %arg2[%c75] : memref<98xf32, #tpu.memory_space<smem>>
    %467 = vector.extract_strided_slice %14 {offsets = [1, 3, 5], sizes = [1, 16, 16], strides = [1, 1, 1]} : vector<2x22x22xf32> to vector<1x16x16xf32>
    %468 = vector.shape_cast %467 : vector<1x16x16xf32> to vector<16x16xf32>
    %469 = vector.broadcast %466 : f32 to vector<16x16xf32>
    %470 = arith.mulf %469, %468 : vector<16x16xf32>
    %471 = arith.addf %465, %470 : vector<16x16xf32>
    %c76 = arith.constant 76 : index
    %472 = memref.load %arg2[%c76] : memref<98xf32, #tpu.memory_space<smem>>
    %473 = vector.extract_strided_slice %14 {offsets = [1, 3, 6], sizes = [1, 16, 16], strides = [1, 1, 1]} : vector<2x22x22xf32> to vector<1x16x16xf32>
    %474 = vector.shape_cast %473 : vector<1x16x16xf32> to vector<16x16xf32>
    %475 = vector.broadcast %472 : f32 to vector<16x16xf32>
    %476 = arith.mulf %475, %474 : vector<16x16xf32>
    %477 = arith.addf %471, %476 : vector<16x16xf32>
    %c77 = arith.constant 77 : index
    %478 = memref.load %arg2[%c77] : memref<98xf32, #tpu.memory_space<smem>>
    %479 = vector.extract_strided_slice %14 {offsets = [1, 4, 0], sizes = [1, 16, 16], strides = [1, 1, 1]} : vector<2x22x22xf32> to vector<1x16x16xf32>
    %480 = vector.shape_cast %479 : vector<1x16x16xf32> to vector<16x16xf32>
    %481 = vector.broadcast %478 : f32 to vector<16x16xf32>
    %482 = arith.mulf %481, %480 : vector<16x16xf32>
    %483 = arith.addf %477, %482 : vector<16x16xf32>
    %c78 = arith.constant 78 : index
    %484 = memref.load %arg2[%c78] : memref<98xf32, #tpu.memory_space<smem>>
    %485 = vector.extract_strided_slice %14 {offsets = [1, 4, 1], sizes = [1, 16, 16], strides = [1, 1, 1]} : vector<2x22x22xf32> to vector<1x16x16xf32>
    %486 = vector.shape_cast %485 : vector<1x16x16xf32> to vector<16x16xf32>
    %487 = vector.broadcast %484 : f32 to vector<16x16xf32>
    %488 = arith.mulf %487, %486 : vector<16x16xf32>
    %489 = arith.addf %483, %488 : vector<16x16xf32>
    %c79 = arith.constant 79 : index
    %490 = memref.load %arg2[%c79] : memref<98xf32, #tpu.memory_space<smem>>
    %491 = vector.extract_strided_slice %14 {offsets = [1, 4, 2], sizes = [1, 16, 16], strides = [1, 1, 1]} : vector<2x22x22xf32> to vector<1x16x16xf32>
    %492 = vector.shape_cast %491 : vector<1x16x16xf32> to vector<16x16xf32>
    %493 = vector.broadcast %490 : f32 to vector<16x16xf32>
    %494 = arith.mulf %493, %492 : vector<16x16xf32>
    %495 = arith.addf %489, %494 : vector<16x16xf32>
    %c80 = arith.constant 80 : index
    %496 = memref.load %arg2[%c80] : memref<98xf32, #tpu.memory_space<smem>>
    %497 = vector.extract_strided_slice %14 {offsets = [1, 4, 3], sizes = [1, 16, 16], strides = [1, 1, 1]} : vector<2x22x22xf32> to vector<1x16x16xf32>
    %498 = vector.shape_cast %497 : vector<1x16x16xf32> to vector<16x16xf32>
    %499 = vector.broadcast %496 : f32 to vector<16x16xf32>
    %500 = arith.mulf %499, %498 : vector<16x16xf32>
    %501 = arith.addf %495, %500 : vector<16x16xf32>
    %c81 = arith.constant 81 : index
    %502 = memref.load %arg2[%c81] : memref<98xf32, #tpu.memory_space<smem>>
    %503 = vector.extract_strided_slice %14 {offsets = [1, 4, 4], sizes = [1, 16, 16], strides = [1, 1, 1]} : vector<2x22x22xf32> to vector<1x16x16xf32>
    %504 = vector.shape_cast %503 : vector<1x16x16xf32> to vector<16x16xf32>
    %505 = vector.broadcast %502 : f32 to vector<16x16xf32>
    %506 = arith.mulf %505, %504 : vector<16x16xf32>
    %507 = arith.addf %501, %506 : vector<16x16xf32>
    %c82 = arith.constant 82 : index
    %508 = memref.load %arg2[%c82] : memref<98xf32, #tpu.memory_space<smem>>
    %509 = vector.extract_strided_slice %14 {offsets = [1, 4, 5], sizes = [1, 16, 16], strides = [1, 1, 1]} : vector<2x22x22xf32> to vector<1x16x16xf32>
    %510 = vector.shape_cast %509 : vector<1x16x16xf32> to vector<16x16xf32>
    %511 = vector.broadcast %508 : f32 to vector<16x16xf32>
    %512 = arith.mulf %511, %510 : vector<16x16xf32>
    %513 = arith.addf %507, %512 : vector<16x16xf32>
    %c83 = arith.constant 83 : index
    %514 = memref.load %arg2[%c83] : memref<98xf32, #tpu.memory_space<smem>>
    %515 = vector.extract_strided_slice %14 {offsets = [1, 4, 6], sizes = [1, 16, 16], strides = [1, 1, 1]} : vector<2x22x22xf32> to vector<1x16x16xf32>
    %516 = vector.shape_cast %515 : vector<1x16x16xf32> to vector<16x16xf32>
    %517 = vector.broadcast %514 : f32 to vector<16x16xf32>
    %518 = arith.mulf %517, %516 : vector<16x16xf32>
    %519 = arith.addf %513, %518 : vector<16x16xf32>
    %c84 = arith.constant 84 : index
    %520 = memref.load %arg2[%c84] : memref<98xf32, #tpu.memory_space<smem>>
    %521 = vector.extract_strided_slice %14 {offsets = [1, 5, 0], sizes = [1, 16, 16], strides = [1, 1, 1]} : vector<2x22x22xf32> to vector<1x16x16xf32>
    %522 = vector.shape_cast %521 : vector<1x16x16xf32> to vector<16x16xf32>
    %523 = vector.broadcast %520 : f32 to vector<16x16xf32>
    %524 = arith.mulf %523, %522 : vector<16x16xf32>
    %525 = arith.addf %519, %524 : vector<16x16xf32>
    %c85 = arith.constant 85 : index
    %526 = memref.load %arg2[%c85] : memref<98xf32, #tpu.memory_space<smem>>
    %527 = vector.extract_strided_slice %14 {offsets = [1, 5, 1], sizes = [1, 16, 16], strides = [1, 1, 1]} : vector<2x22x22xf32> to vector<1x16x16xf32>
    %528 = vector.shape_cast %527 : vector<1x16x16xf32> to vector<16x16xf32>
    %529 = vector.broadcast %526 : f32 to vector<16x16xf32>
    %530 = arith.mulf %529, %528 : vector<16x16xf32>
    %531 = arith.addf %525, %530 : vector<16x16xf32>
    %c86 = arith.constant 86 : index
    %532 = memref.load %arg2[%c86] : memref<98xf32, #tpu.memory_space<smem>>
    %533 = vector.extract_strided_slice %14 {offsets = [1, 5, 2], sizes = [1, 16, 16], strides = [1, 1, 1]} : vector<2x22x22xf32> to vector<1x16x16xf32>
    %534 = vector.shape_cast %533 : vector<1x16x16xf32> to vector<16x16xf32>
    %535 = vector.broadcast %532 : f32 to vector<16x16xf32>
    %536 = arith.mulf %535, %534 : vector<16x16xf32>
    %537 = arith.addf %531, %536 : vector<16x16xf32>
    %c87 = arith.constant 87 : index
    %538 = memref.load %arg2[%c87] : memref<98xf32, #tpu.memory_space<smem>>
    %539 = vector.extract_strided_slice %14 {offsets = [1, 5, 3], sizes = [1, 16, 16], strides = [1, 1, 1]} : vector<2x22x22xf32> to vector<1x16x16xf32>
    %540 = vector.shape_cast %539 : vector<1x16x16xf32> to vector<16x16xf32>
    %541 = vector.broadcast %538 : f32 to vector<16x16xf32>
    %542 = arith.mulf %541, %540 : vector<16x16xf32>
    %543 = arith.addf %537, %542 : vector<16x16xf32>
    %c88 = arith.constant 88 : index
    %544 = memref.load %arg2[%c88] : memref<98xf32, #tpu.memory_space<smem>>
    %545 = vector.extract_strided_slice %14 {offsets = [1, 5, 4], sizes = [1, 16, 16], strides = [1, 1, 1]} : vector<2x22x22xf32> to vector<1x16x16xf32>
    %546 = vector.shape_cast %545 : vector<1x16x16xf32> to vector<16x16xf32>
    %547 = vector.broadcast %544 : f32 to vector<16x16xf32>
    %548 = arith.mulf %547, %546 : vector<16x16xf32>
    %549 = arith.addf %543, %548 : vector<16x16xf32>
    %c89 = arith.constant 89 : index
    %550 = memref.load %arg2[%c89] : memref<98xf32, #tpu.memory_space<smem>>
    %551 = vector.extract_strided_slice %14 {offsets = [1, 5, 5], sizes = [1, 16, 16], strides = [1, 1, 1]} : vector<2x22x22xf32> to vector<1x16x16xf32>
    %552 = vector.shape_cast %551 : vector<1x16x16xf32> to vector<16x16xf32>
    %553 = vector.broadcast %550 : f32 to vector<16x16xf32>
    %554 = arith.mulf %553, %552 : vector<16x16xf32>
    %555 = arith.addf %549, %554 : vector<16x16xf32>
    %c90 = arith.constant 90 : index
    %556 = memref.load %arg2[%c90] : memref<98xf32, #tpu.memory_space<smem>>
    %557 = vector.extract_strided_slice %14 {offsets = [1, 5, 6], sizes = [1, 16, 16], strides = [1, 1, 1]} : vector<2x22x22xf32> to vector<1x16x16xf32>
    %558 = vector.shape_cast %557 : vector<1x16x16xf32> to vector<16x16xf32>
    %559 = vector.broadcast %556 : f32 to vector<16x16xf32>
    %560 = arith.mulf %559, %558 : vector<16x16xf32>
    %561 = arith.addf %555, %560 : vector<16x16xf32>
    %c91 = arith.constant 91 : index
    %562 = memref.load %arg2[%c91] : memref<98xf32, #tpu.memory_space<smem>>
    %563 = vector.extract_strided_slice %14 {offsets = [1, 6, 0], sizes = [1, 16, 16], strides = [1, 1, 1]} : vector<2x22x22xf32> to vector<1x16x16xf32>
    %564 = vector.shape_cast %563 : vector<1x16x16xf32> to vector<16x16xf32>
    %565 = vector.broadcast %562 : f32 to vector<16x16xf32>
    %566 = arith.mulf %565, %564 : vector<16x16xf32>
    %567 = arith.addf %561, %566 : vector<16x16xf32>
    %c92 = arith.constant 92 : index
    %568 = memref.load %arg2[%c92] : memref<98xf32, #tpu.memory_space<smem>>
    %569 = vector.extract_strided_slice %14 {offsets = [1, 6, 1], sizes = [1, 16, 16], strides = [1, 1, 1]} : vector<2x22x22xf32> to vector<1x16x16xf32>
    %570 = vector.shape_cast %569 : vector<1x16x16xf32> to vector<16x16xf32>
    %571 = vector.broadcast %568 : f32 to vector<16x16xf32>
    %572 = arith.mulf %571, %570 : vector<16x16xf32>
    %573 = arith.addf %567, %572 : vector<16x16xf32>
    %c93 = arith.constant 93 : index
    %574 = memref.load %arg2[%c93] : memref<98xf32, #tpu.memory_space<smem>>
    %575 = vector.extract_strided_slice %14 {offsets = [1, 6, 2], sizes = [1, 16, 16], strides = [1, 1, 1]} : vector<2x22x22xf32> to vector<1x16x16xf32>
    %576 = vector.shape_cast %575 : vector<1x16x16xf32> to vector<16x16xf32>
    %577 = vector.broadcast %574 : f32 to vector<16x16xf32>
    %578 = arith.mulf %577, %576 : vector<16x16xf32>
    %579 = arith.addf %573, %578 : vector<16x16xf32>
    %c94 = arith.constant 94 : index
    %580 = memref.load %arg2[%c94] : memref<98xf32, #tpu.memory_space<smem>>
    %581 = vector.extract_strided_slice %14 {offsets = [1, 6, 3], sizes = [1, 16, 16], strides = [1, 1, 1]} : vector<2x22x22xf32> to vector<1x16x16xf32>
    %582 = vector.shape_cast %581 : vector<1x16x16xf32> to vector<16x16xf32>
    %583 = vector.broadcast %580 : f32 to vector<16x16xf32>
    %584 = arith.mulf %583, %582 : vector<16x16xf32>
    %585 = arith.addf %579, %584 : vector<16x16xf32>
    %c95 = arith.constant 95 : index
    %586 = memref.load %arg2[%c95] : memref<98xf32, #tpu.memory_space<smem>>
    %587 = vector.extract_strided_slice %14 {offsets = [1, 6, 4], sizes = [1, 16, 16], strides = [1, 1, 1]} : vector<2x22x22xf32> to vector<1x16x16xf32>
    %588 = vector.shape_cast %587 : vector<1x16x16xf32> to vector<16x16xf32>
    %589 = vector.broadcast %586 : f32 to vector<16x16xf32>
    %590 = arith.mulf %589, %588 : vector<16x16xf32>
    %591 = arith.addf %585, %590 : vector<16x16xf32>
    %c96 = arith.constant 96 : index
    %592 = memref.load %arg2[%c96] : memref<98xf32, #tpu.memory_space<smem>>
    %593 = vector.extract_strided_slice %14 {offsets = [1, 6, 5], sizes = [1, 16, 16], strides = [1, 1, 1]} : vector<2x22x22xf32> to vector<1x16x16xf32>
    %594 = vector.shape_cast %593 : vector<1x16x16xf32> to vector<16x16xf32>
    %595 = vector.broadcast %592 : f32 to vector<16x16xf32>
    %596 = arith.mulf %595, %594 : vector<16x16xf32>
    %597 = arith.addf %591, %596 : vector<16x16xf32>
    %c97 = arith.constant 97 : index
    %598 = memref.load %arg2[%c97] : memref<98xf32, #tpu.memory_space<smem>>
    %599 = vector.extract_strided_slice %14 {offsets = [1, 6, 6], sizes = [1, 16, 16], strides = [1, 1, 1]} : vector<2x22x22xf32> to vector<1x16x16xf32>
    %600 = vector.shape_cast %599 : vector<1x16x16xf32> to vector<16x16xf32>
    %601 = vector.broadcast %598 : f32 to vector<16x16xf32>
    %602 = arith.mulf %601, %600 : vector<16x16xf32>
    %603 = arith.addf %597, %602 : vector<16x16xf32>
    %604 = arith.negf %603 : vector<16x16xf32>
    %605 = math.exp %604 : vector<16x16xf32>
    %cst_20 = arith.constant 1.000000e+00 : f32
    %606 = vector.broadcast %cst_20 : f32 to vector<16x16xf32>
    %607 = arith.addf %606, %605 : vector<16x16xf32>
    %608 = arith.divf %606, %607 : vector<16x16xf32>
    %c0_21 = arith.constant 0 : index
    %c0_22 = arith.constant 0 : index
    %c0_23 = arith.constant 0 : index
    %c0_24 = arith.constant 0 : index
    %609 = vector.load %arg3[%c0_21, %c0_22, %c0_23, %c0_24] : memref<1x1x16x16xf32, #tpu.memory_space<vmem>>, vector<1x1x16x16xf32>
    %610 = vector.shape_cast %609 : vector<1x1x16x16xf32> to vector<16x16xf32>
    %611 = vector.shape_cast %608 : vector<16x16xf32> to vector<1x1x16x16xf32>
    tpu.vector_store %arg3[%c0_21, %c0_22, %c0_23, %c0_24], %611 {strides = array<i32>} : memref<1x1x16x16xf32, #tpu.memory_space<vmem>>, vector<1x1x16x16xf32>,
    return
  }
  func.func @transform_0(%arg0: i32) -> (i32, i32, i32, i32) {
    %c0_i32 = arith.constant 0 : i32
    %c0_i32_0 = arith.constant 0 : i32
    %c0_i32_1 = arith.constant 0 : i32
    %c0_i32_2 = arith.constant 0 : i32
    return %arg0, %c0_i32, %c0_i32_0, %c0_i32_1 : i32, i32, i32, i32
  }
  func.func @transform_1(%arg0: i32) -> i32 {
    %c0_i32 = arith.constant 0 : i32
    %c0_i32_0 = arith.constant 0 : i32
    return %c0_i32 : i32
  }
  func.func @transform_2(%arg0: i32) -> (i32, i32, i32, i32) {
    %c0_i32 = arith.constant 0 : i32
    %c0_i32_0 = arith.constant 0 : i32
    %c0_i32_1 = arith.constant 0 : i32
    %c0_i32_2 = arith.constant 0 : i32
    return %arg0, %c0_i32, %c0_i32_0, %c0_i32_1 : i32, i32, i32, i32
  }
}

</mosaic_0001>

<bundles_post_ra>
// kernel: spatial_attention.1
= control target key start
LH: loop header
LB: loop body
LE: loop exit
PB: predicated region body
PF: predicated region fallthrough
CT: control target
= control target key end

     0   :  { %7 = vsyncpa [#allocation4], 0  ;;  %s3802_s0 = inlined_call_operand.hbm [shape: f32[2,4,16,16], index: 0, kind: input, shape index: {}]   ;;  %s3803_s1 = inlined_call_operand.vmem [shape: f32[98], index: 1, kind: input, shape index: {}]   ;;  %s3804_s2 = inlined_call_operand.hbm [shape: f32[2,1,16,16], index: 2, kind: output, shape index: {}]  }
   0x1   :  { %9 = vsyncpa [#allocation4 + $0x1], 0 }
   0x2   :  { %10 = vsyncpa [#allocation6], 0 }
   0x3   :  { %11 = vsyncpa [#allocation5], 0 }
   0x4   :  { %13 = vsyncpa [#allocation5 + $0x1], 0  ;;  %s2610_s9 = smov 0   ;;  %s2612_s10 = smov 0  }
   0x5   :  { %s2614_s11 = smov 0   ;;  %s2616_s12 = smov 0  }
   0x6 LB: > { %s2631_s13 = sadd.s32 4294967295, %s2578_s12   ;;  %s2267_s14 = sadd.s32 4294967294, %s2578_s12   ;;  %s2578_s12 = sphi %s2616_s12, %s3826_s12   ;;  %s2574_s11 = sphi %s2614_s11, %s3825_s11   ;;  %s2570_s10 = sphi %s2612_s10, %s3824_s10   ;;  %s2566_s9 = sphi %s2610_s9, %s3823_s9  }
   0x7   : > { %s2635_s15 = sadd.s32 1, %s2578_s12   ;;  %s26_s16 = sadd.s32 1, %s2574_s11 }
   0x8   : > { %s23_s17 = ssub.s32 %s2578_s12, %s2635_s15  ;;  %p33_p0 = scmp.ne.s32.totalorder %s2574_s11, %s2570_s10 }
   0x9   : > { %p24_p1 = scmp.eq.s32.totalorder %s23_s17, 0  ;;  %p34_p2 = scmp.eq.s32.totalorder %s2578_s12, 0 }
   0xa   : > { %p39_p3 = scmp.ne.s32.totalorder %s2570_s10, %s2566_s9  ;;  %p3806_p4 = scmp.eq.s32.totalorder %s2631_s13, 0 }
   0xb   : > { %s2647_s18 = scalar_select %p24_p1, %s2574_s11, %s26_s16  }
   0xc   : > { %p2649_p5 = por %p34_p2, %p33_p0  ;;  %p2655_p6 = por %p3806_p4, %p39_p3 }
   0xd   : > { %p84_p7 = scmp.eq.s32.totalorder %s2631_s13, 1  ;;  %p90_p8 = scmp.eq.s32.totalorder %s2267_s14, 1 }
   0xe   : > { %s3810_s20 = scalar_select %p2655_p6, 1, 0 }
   0xf   : > { %p2268_p9 = scmp.ge.s32.totalorder %s2578_s12, 1  ;;  %p97_p10 = scmp.lt.s32.totalorder %s2578_s12, 3 }
  0x10   : > { %p2662_p11 = por %p84_p7, %p33_p0  ;;  %p2666_p12 = por %p90_p8, %p39_p3 }
  0x11   : > { %p2670_p13 = pnand %p2268_p9, %p97_p10  ;;  %s110_s26 = sshll.u32 %s3803_s1, 4  ;;  %s111_s26 = int_to_ptr.vmem [resolvable:$true] %s110_s26 }
  0x12   : > { %s3811_s21 = scalar_select %p2662_p11, 1, 0 }
  0x13   : > { %s3812_s22 = scalar_select %p2666_p12, 1, 0 }
  0x14   : > { %s3813_s23 = scalar_select %p2670_p13, 1, 0 }
  0x15   : > { %p2392_p1 = pneg %p2670_p13  ;;  %p2405_p2 = scmp.lt.s32.totalorder %s2578_s12, 2 }
  0x16   : > { %s121_s28 = sand.u32 1, %s2574_s11   ;;  %s2467_s3 = scalar_lea.vmem %s111_s26, 16 }
  0x17   : > { %p2683_p7 = pnand %p2392_p1, %p3806_p4  ;;  %p2690_p3 = pnand %p2405_p2, %p2649_p5 }
  0x18   : > { %s2271_s30 = sshll.u32 %s121_s28, 6  ;;  %p2468_p8 = scmp.ne.s32.totalorder %s111_s26, %s2467_s3 }
  0x19   : > { %p2469_p9 = pneg %p2683_p7  ;;  %p2475_p12 = scmp.lt.s32.totalorder %s111_s26, %s111_s26 }
  0x1a   : > { %p2476_p11 = scmp.lt.s32.totalorder %s2467_s3, %s2467_s3 }
  0x1b   : > { %p2470_p10 = pnand %p2469_p9, %p2468_p8 }
  0x1c   : > { %p2477_p1 = por %p2476_p11, %p2475_p12 }
  0x1d   : > { %p2471_p0 = pneg %p2470_p10 }
  0x1f   : > { %p2478_p4 = pnand %p2477_p1, %p2471_p0 }
  0x21   : > { %2481 = shalt.err (!%p2478_p4)
}
  0x22   : > { %s2580_s4 = smov [#allocation7]   ;;  %s2382_s5 = sshll.u32 %s2578_s12, 10 }
  0x23   : > { %2395 = dma.vmem_to_smem (!%p2683_p7), %s111_s26, 16, %s2580_s4, [#allocation6]  }
  0x24   : > { %s125_s6 = scalar_lea.vmem [#allocation3], %s2271_s30  ;;  %s2702_s16 = scalar_lea.hbm %s3802_s0, %s2382_s5 }
  0x25   : > { %s132_s7 = sshll.u32 %s125_s6, 4  ;;  %s2706_s17 = scalar_lea.sflag [#allocation4], %s121_s28  ;;  %s2704_s7 = int_to_ptr.vmem [resolvable:$true] %s132_s7 }
  0x26   : > { %s2482_s19 = scalar_lea.hbm %s2702_s16, 1024  ;;  %p2484_p5 = pneg %p2690_p3 }
  0x27   : > { %p2483_p4 = scmp.ne.s32.totalorder %s2702_s16, %s2482_s19  ;;  %s2487_s26 = scalar_lea.hbm %s3802_s0, 2048 }
  0x28   : > { %p2488_p0 = scmp.lt.s32.totalorder %s2702_s16, %s3802_s0  ;;  %p2489_p2 = scmp.lt.s32.totalorder %s2487_s26, %s2482_s19 }
  0x29   : > { %p2485_p11 = pnand %p2484_p5, %p2483_p4 }
  0x2a   : > { %p2490_p7 = por %p2489_p2, %p2488_p0 }
  0x2b   : > { %p2486_p12 = pneg %p2485_p11 }
  0x2d   : > { %p2491_p8 = pnand %p2490_p7, %p2486_p12 }
  0x2f   : > { %2494 = shalt.err (!%p2491_p8)
}
  0x30   : > { %s2495_s28 = scalar_lea.vmem %s2704_s7, 1024  ;;  %s2581_s3 = smov [#allocation3]  }
  0x31   : > { %p2496_p9 = scmp.ne.s32.totalorder %s2704_s7, %s2495_s28  ;;  %s2500_s4 = sshll.u32 %s2581_s3, 4  ;;  %s2501_s4 = int_to_ptr.vmem [resolvable:$false] %s2500_s4 }
  0x32   : > { %s2502_s5 = scalar_lea.vmem %s2501_s4, 2048  ;;  %p2503_p4 = scmp.lt.s32.totalorder %s2704_s7, %s2501_s4 }
  0x33   : > { %p2498_p10 = pnand %p2496_p9, %p2484_p5  ;;  %p2504_p11 = scmp.lt.s32.totalorder %s2502_s5, %s2495_s28 }
  0x35   : > { %p2499_p1 = pneg %p2498_p10  ;;  %p2505_p6 = por %p2504_p11, %p2503_p4 }
  0x37   : > { %p2506_p13 = pnand %p2505_p6, %p2499_p1 }
  0x39   : > { %2509 = shalt.err (!%p2506_p13)
}
  0x3a   : > { %s2582_s6 = smov 128   ;;  %s2583_s8 = smov 8  }
  0x3b   : > { %2399 = dma.hbm_to_vmem [thread:$0]  (!%p2690_p3), %s2702_s16, 1024, %s2704_s7, %s2706_s17, %s2582_s6, %s2582_s6, %s2583_s8  }
  0x3c   : > { %p3816_p5 = scmp.ne.s32.totalorder %s3813_s23, 0 }
  0x3d   : > { %s2730_s14 = sand.u32 (!%p3816_p5), 1, %s2570_s10   ;;  %p3817_p6 = scmp.ne.s32.totalorder (!%p3816_p5), %s3810_s20, 0 }
  0x3e   : > { %144 = sbr.rel (%p3816_p5) target bundleno = 708 (0x2c4), region = 28  ;;  %s2275_s19 = sshll.u32 (!%p3816_p5), %s2730_s14, 6 }
  0x3f   : > { %s147_s24 = scalar_lea.sflag (!%p3816_p5), [#allocation4], %s2730_s14  ;;  %s150_s25 = scalar_lea.vmem (!%p3816_p5), [#allocation3], %s2275_s19 }
  0x43   : > { %2553 = dma.done.wait (%p3817_p6), %s147_s24, 1024  }
  0x44   : > { %2555 = vsyncadd (%p3817_p6), %s147_s24, 4294966272  ;;  %p3818_p13 = scmp.eq.s32.totalorder %s2631_s13, 0 }
  0x46   : > { %2557 = dma.done.wait (%p3818_p13), [#allocation6], 16   ;;  %p3819_p3 = pmov %p3818_p13 }
  0x48   : > { %2559 = vsyncadd (%p3819_p3), [#allocation6], 4294967280 }
  0x49   : > { %159 = sfence }
  0x4a   : > { %v176_v0 = vld [vmem:[%s150_s25] sm:$0xff]  ;;  %v178_v1 = vld [vmem:[%s150_s25 + $0x10] sm:$0xff]  ;;  %vm184_vm0 = vcmask 130048   ;;  %vm216_vm1 = vcmask 179200   ;;  %v177_v7 = vld [vmem:[%s150_s25 + $0x8] sm:$0xff]  ;;  %v2584_v19 = vmov 0.0  }
  0x4b   : > { %v180_v2 = vld [vmem:[%s150_s25 + $0x20] sm:$0xff]  ;;  %v182_v3 = vld [vmem:[%s150_s25 + $0x30] sm:$0xff]  ;;  %v185_v4 = vsel %vm184_vm0, %v176_v0, 0.0  ;;  %v186_v5 = vsel %vm184_vm0, %v178_v1, 0.0  ;;  %v179_v8 = vld [vmem:[%s150_s25 + $0x18] sm:$0xff]  ;;  %v192_v12 = vsel %vm184_vm0, %v177_v7, 0.0 }
  0x4c   : > { %v188_v6 = vsel %vm184_vm0, %v180_v2, 0.0  ;;  %v187_v9 = vadd.f32 %v186_v5, %v185_v4  ;;  %v181_v10 = vld [vmem:[%s150_s25 + $0x28] sm:$0xff]  ;;  %v183_v11 = vld [vmem:[%s150_s25 + $0x38] sm:$0xff]  ;;  %v193_v13 = vsel %vm184_vm0, %v179_v8, 0.0  ;;  %v190_v14 = vsel %vm184_vm0, %v182_v3, 0.0  ;;  %217 = vst.msk [vmem:[#allocation2] sm:$0xff] %vm216_vm1, %v2584_v19 }
  0x4d   : > { %v194_v15 = vadd.f32 %v193_v13, %v192_v12  ;;  %v195_v16 = vsel %vm184_vm0, %v181_v10, 0.0  ;;  %v197_v18 = vsel %vm184_vm0, %v183_v11, 0.0  ;;  %218 = vst.msk [vmem:[#allocation2 + $0x8] sm:$0xff] %vm216_vm1, %v2584_v19  ;;  %221 = vst.msk [vmem:[#allocation2 + $0x18] sm:$0xff] %vm216_vm1, %v2584_v19  ;;  %v202_v20 = vsel %vm184_vm0, %v176_v0, -inf  ;;  %s2585_s20 = smov 3  }
  0x4e   : > { %v189_v17 = vadd.f32 %v188_v6, %v187_v9  ;;  %222 = vst.msk [vmem:[#allocation2 + $0x20] sm:$0xff] %vm216_vm1, %v2584_v19  ;;  %v203_v21 = vsel %vm184_vm0, %v178_v1, -inf  ;;  %v204_v23 = vsel %vm184_vm0, %v180_v2, -inf  ;;  %v206_v24 = vsel %vm184_vm0, %v182_v3, -inf  ;;  %s2278_s23 = sld [smem:[#allocation7 + $0x1]]  ;;  %s2586_s17 = smov 127  }
  0x4f   : > { %v196_v22 = vadd.f32 %v195_v16, %v194_v15  ;;  %vm219_vm2 = vcmask 177152   ;;  %v205_v26 = vmax.f32 %v202_v20, %v204_v23  ;;  %v207_v27 = vmax.f32 %v203_v21, %v206_v24  ;;  %s2279_s29 = sld [smem:[#allocation7 + $0x2]]  ;;  %s2587_s27 = smov 126  }
  0x50   : > { %v191_v25 = vadd.f32 %v190_v14, %v189_v17  ;;  %220 = vst.msk [vmem:[#allocation2 + $0x10] sm:$0x3f] %vm219_vm2, %v2584_v19  ;;  %223 = vst.msk [vmem:[#allocation2 + $0x28] sm:$0x3f] %vm219_vm2, %v2584_v19  ;;  %v209_v28 = vsel %vm184_vm0, %v177_v7, -inf  ;;  %v210_v30 = vsel %vm184_vm0, %v179_v8, -inf }
  0x51   : > { %v198_v29 = vadd.f32 %v197_v18, %v196_v22  ;;  %v211_v31 = vsel %vm184_vm0, %v181_v10, -inf  ;;  %v213_v32 = vsel %vm184_vm0, %v183_v11, -inf  ;;  %v208_v34 = vmax.f32 %v205_v26, %v207_v27  ;;  %s2280_s7 = sld [smem:[#allocation7 + $0x3]]  ;;  %s2588_s3 = smov 125  }
  0x52   : > { %v200_v33 = vmul.f32 0.25, %v191_v25  ;;  %v212_v35 = vmax.f32 %v209_v28, %v211_v31  ;;  %v214_v36 = vmax.f32 %v210_v30, %v213_v32  ;;  %vm232_vm3 = vcmask 154648   ;;  %s2281_s16 = sld [smem:[#allocation7 + $0x4]]  ;;  %s2589_s5 = smov 124  }
  0x53   : > { %v201_v37 = vmul.f32 0.25, %v198_v29  ;;  %237 = vrot.lane.b32.xlu1 %v208_v34, %s2585_s20  ;;  %s2770_s26 = sld [smem:[#allocation7 + $0x5]]  ;;  %s2590_s8 = smov 123   ;;  %vm350_vm4 = vcmask 1046528   ;;  %vm494_vm5 = vcmask 1045504   ;;  %vm638_vm6 = vcmask 1044480  }
  0x54   : > { %226 = vrot.lane.b32.xlu0 %v200_v33, %s2585_s20  ;;  %v215_v38 = vmax.f32 %v212_v35, %v214_v36  ;;  %v259_v43 = vstv %s2278_s23  ;;  %s2285_s30 = sld [smem:[#allocation7 + $0x8]]  ;;  %s2591_s24 = smov 122   ;;  %vm782_vm7 = vcmask 1043456   ;;  %vm926_vm8 = vcmask 1042432  }
  0x55   : > { %v273_v46 = vstv %s2279_s29  ;;  %s2776_s28 = sld [smem:[#allocation7 + $0x6]]  ;;  %vm1070_vm9 = vcmask 1041408   ;;  %p3820_p0 = scmp.ne.s32.totalorder %s3811_s21, 0 }
  0x56   : > { %s2286_s4 = sld [smem:[#allocation7 + $0x9]] }
  0x57   : > { %239 = vrot.lane.b32.xlu1 %v215_v38, %s2585_s20  ;;  %v287_v50 = vstv %s2280_s7  ;;  %s2287_s6 = sld [smem:[#allocation7 + $0xa]] }
  0x58   : > { %228 = vrot.lane.b32.xlu0 %v201_v37, %s2585_s20  ;;  %v301_v53 = vstv %s2281_s16  ;;  %s2288_s19 = sld [smem:[#allocation7 + $0xb]] }
  0x59   : > { %v315_v56 = vstv %s2770_s26  ;;  %s2289_s25 = sld [smem:[#allocation7 + $0xc]] }
  0x5a   : > { %v361_v59 = vstv %s2285_s30  ;;  %s2290_s20 = sld [smem:[#allocation7 + $0xd]] }
  0x5b   : > { %v329_v60 = vstv %s2776_s28  ;;  %s2292_s23 = sld [smem:[#allocation7 + $0xf]] }
  0x5c   : > { %v382_v2 = vstv %s2286_s4  ;;  %s2293_s29 = sld [smem:[#allocation7 + $0x10]] }
  0x5d   : > { %v403_v8 = vstv %s2287_s6  ;;  %s2294_s7 = sld [smem:[#allocation7 + $0x11]] }
  0x5e   : > { %v424_v17 = vstv %s2288_s19  ;;  %s2295_s16 = sld [smem:[#allocation7 + $0x12]] }
  0x5f   : > { %v445_v26 = vstv %s2289_s25  ;;  %s2296_s26 = sld [smem:[#allocation7 + $0x13]] }
  0x60   : > { %v466_v37 = vstv %s2290_s20  ;;  %s2297_s30 = sld [smem:[#allocation7 + $0x14]] }
  0x61   : > { %s2299_s28 = sld [smem:[#allocation7 + $0x16]] }
  0x62   : > { %s2300_s4 = sld [smem:[#allocation7 + $0x17]] }
  0x63   : > { %s2301_s6 = sld [smem:[#allocation7 + $0x18]] }
  0x64   : > { %s2302_s19 = sld [smem:[#allocation7 + $0x19]] }
  0x65   : > { %s2303_s25 = sld [smem:[#allocation7 + $0x1a]] }
  0x66   : > { %s2304_s20 = sld [smem:[#allocation7 + $0x1b]] }
  0xc5   : > { %v238_v40 = vpop.permute.xlu1 %237 }
  0xc6   : > { %v227_v39 = vpop.permute.xlu0 %226  ;;  %244 = vst.msk [vmem:[#allocation2 + $0x1b] sm:$0xff] %vm232_vm3, %v238_v40 }
  0xc7   : > { %233 = vst.msk [vmem:[#allocation2 + $0x3] sm:$0xff] %vm232_vm3, %v227_v39 }
  0xc9   : > { %v240_v42 = vpop.permute.xlu1 %239 }
  0xca   : > { %v229_v41 = vpop.permute.xlu0 %228  ;;  %245 = vst.msk [vmem:[#allocation2 + $0x23] sm:$0xff] %vm232_vm3, %v240_v42 }
  0xcb   : > { %234 = vst.msk [vmem:[#allocation2 + $0xb] sm:$0xff] %vm232_vm3, %v229_v41 }
  0xce   : > { %v2762_v44 = vld [vmem:[#allocation2] sm:$0xff] }
  0xcf   : > { %v260_v45 = vmul.f32 %v259_v43, %v2762_v44  ;;  %v274_v48 = vmul.f32 %v273_v46, %v2762_v44  ;;  %v288_v51 = vmul.f32 %v287_v50, %v2762_v44  ;;  %v302_v54 = vmul.f32 %v301_v53, %v2762_v44 }
  0xd0   : > { %v316_v57 = vmul.f32 %v315_v56, %v2762_v44  ;;  %v362_v63 = vmul.f32 %v361_v59, %v2762_v44  ;;  %v330_v0 = vmul.f32 %v329_v60, %v2762_v44  ;;  %v383_v7 = vmul.f32 %v382_v2, %v2762_v44 }
  0xd1   : > { %264 = vrot.lane.b32.xlu0 %v260_v45, %s2586_s17  ;;  %v404_v16 = vmul.f32 %v403_v8, %v2762_v44  ;;  %v425_v24 = vmul.f32 %v424_v17, %v2762_v44  ;;  %v446_v34 = vmul.f32 %v445_v26, %v2762_v44  ;;  %v505_v45 = vstv %s2292_s23  ;;  %s2306_s23 = sld [smem:[#allocation7 + $0x1d]] }
  0xd2   : > { %v2766_v47 = vld [vmem:[#allocation2 + $0x8] sm:$0xff]  ;;  %v2789_v62 = vld [vmem:[#allocation2 + $0x10] sm:$0x3f]  ;;  %v368_v6 = vrot.slane %v362_v63, 1  ;;  %v389_v15 = vrot.slane %v383_v7, 1 }
  0xd3   : > { %v261_v49 = vmul.f32 %v259_v43, %v2766_v47  ;;  %v275_v52 = vmul.f32 %v273_v46, %v2766_v47  ;;  %v289_v55 = vmul.f32 %v287_v50, %v2766_v47  ;;  %v303_v58 = vmul.f32 %v301_v53, %v2766_v47 }
  0xd4   : > { %v363_v61 = vmul.f32 %v361_v59, %v2766_v47  ;;  %v317_v1 = vmul.f32 %v315_v56, %v2766_v47  ;;  %v384_v4 = vmul.f32 %v382_v2, %v2766_v47  ;;  %v364_v5 = vmul.f32 %v361_v59, %v2789_v62 }
  0xd5   : > { %278 = vrot.lane.b32.xlu0 %v274_v48, %s2587_s27  ;;  %266 = vrot.lane.b32.xlu1 %v261_v49, %s2586_s17  ;;  %v331_v9 = vmul.f32 %v329_v60, %v2766_v47  ;;  %v405_v10 = vmul.f32 %v403_v8, %v2766_v47  ;;  %v385_v14 = vmul.f32 %v382_v2, %v2789_v62  ;;  %v410_v25 = vrot.slane %v404_v16, 1 }
  0xd6   : > { %v369_v3 = vrot.slane %v363_v61, 1  ;;  %v390_v12 = vrot.slane %v384_v4, 1  ;;  %v371_v13 = vrot.slane %v364_v5, 1  ;;  %v426_v19 = vmul.f32 %v424_v17, %v2766_v47 }
  0xd7   : > { %v411_v18 = vrot.slane %v405_v10, 1  ;;  %v392_v22 = vrot.slane %v385_v14, 1  ;;  %v406_v23 = vmul.f32 %v403_v8, %v2789_v62  ;;  %v447_v28 = vmul.f32 %v445_v26, %v2766_v47 }
  0xd8   : > { %v370_v11 = vsel %vm350_vm4, %v368_v6, %v369_v3  ;;  %v391_v20 = vsel %vm350_vm4, %v389_v15, %v390_v12  ;;  %v372_v21 = vsel %vm350_vm4, %v369_v3, %v371_v13  ;;  %v432_v27 = vrot.slane %v426_v19, 1 }
  0xd9   : > { %292 = vrot.lane.b32.xlu0 %v288_v51, %s2588_s3  ;;  %280 = vrot.lane.b32.xlu1 %v275_v52, %s2587_s27  ;;  %v412_v29 = vsel %vm350_vm4, %v410_v25, %v411_v18  ;;  %v393_v30 = vsel %vm350_vm4, %v390_v12, %v392_v22  ;;  %v413_v31 = vrot.slane %v406_v23, 1  ;;  %v427_v32 = vmul.f32 %v424_v17, %v2789_v62 }
  0xda   : > { %v431_v33 = vrot.slane %v425_v24, 1  ;;  %v453_v36 = vrot.slane %v447_v28, 1  ;;  %v468_v40 = vmul.f32 %v466_v37, %v2766_v47  ;;  %v448_v41 = vmul.f32 %v445_v26, %v2789_v62 }
  0xdb   : > { %v414_v38 = vsel %vm350_vm4, %v411_v18, %v413_v31  ;;  %v434_v39 = vrot.slane %v427_v32, 1  ;;  %v452_v42 = vrot.slane %v446_v34, 1  ;;  %v467_v43 = vmul.f32 %v466_v37, %v2762_v44 }
  0xdc   : > { %v433_v35 = vsel %vm350_vm4, %v431_v33, %v432_v27  ;;  %v507_v48 = vmul.f32 %v505_v45, %v2766_v47  ;;  %v474_v50 = vrot.slane %v468_v40, 1  ;;  %v455_v51 = vrot.slane %v448_v41, 1 }
  0xdd   : > { %306 = vrot.lane.b32.xlu0 %v302_v54, %s2589_s5  ;;  %294 = vrot.lane.b32.xlu1 %v289_v55, %s2588_s3  ;;  %v454_v46 = vsel %vm350_vm4, %v452_v42, %v453_v36  ;;  %v435_v49 = vsel %vm350_vm4, %v432_v27, %v434_v39  ;;  %v469_v52 = vmul.f32 %v466_v37, %v2789_v62  ;;  %v473_v53 = vrot.slane %v467_v43, 1 }
  0xde   : > { %v506_v54 = vmul.f32 %v505_v45, %v2762_v44  ;;  %v526_v55 = vstv %s2293_s29  ;;  %v456_v59 = vsel %vm350_vm4, %v453_v36, %v455_v51  ;;  %v513_v60 = vrot.slane %v507_v48, 2  ;;  %s2307_s29 = sld [smem:[#allocation7 + $0x1e]] }
  0xdf   : > { %v528_v56 = vmul.f32 %v526_v55, %v2766_v47  ;;  %v476_v61 = vrot.slane %v469_v52, 1  ;;  %v527_v63 = vmul.f32 %v526_v55, %v2762_v44  ;;  %v547_v3 = vstv %s2294_s7  ;;  %s2308_s7 = sld [smem:[#allocation7 + $0x1f]] }
  0xe0   : > { %v549_v6 = vmul.f32 %v547_v3, %v2766_v47  ;;  %v529_v7 = vmul.f32 %v526_v55, %v2789_v62  ;;  %v568_v12 = vstv %s2295_s16  ;;  %v550_v16 = vmul.f32 %v547_v3, %v2789_v62  ;;  %s2309_s16 = sld [smem:[#allocation7 + $0x20]] }
  0xe1   : > { %320 = vrot.lane.b32.xlu0 %v316_v57, %s2590_s8  ;;  %308 = vrot.lane.b32.xlu1 %v303_v58, %s2589_s5  ;;  %v508_v57 = vmul.f32 %v505_v45, %v2789_v62  ;;  %v475_v58 = vsel %vm350_vm4, %v473_v53, %v474_v50  ;;  %v477_v5 = vsel %vm350_vm4, %v474_v50, %v476_v61  ;;  %v533_v8 = vrot.slane %v527_v63, 2 }
  0xe2   : > { %v555_v13 = vrot.slane %v549_v6, 2  ;;  %v536_v14 = vrot.slane %v529_v7, 2  ;;  %v570_v15 = vmul.f32 %v568_v12, %v2766_v47  ;;  %v569_v18 = vmul.f32 %v568_v12, %v2762_v44 }
  0xe3   : > { %v515_v2 = vrot.slane %v508_v57, 2  ;;  %v589_v19 = vstv %s2296_s26  ;;  %v557_v25 = vrot.slane %v550_v16, 2  ;;  %v649_v39 = vstv %s2299_s28  ;;  %s2310_s26 = sld [smem:[#allocation7 + $0x21]] }
  0xe4   : > { %v576_v24 = vrot.slane %v570_v15, 2  ;;  %v590_v26 = vmul.f32 %v589_v19, %v2762_v44  ;;  %v575_v27 = vrot.slane %v569_v18, 2  ;;  %v592_v34 = vmul.f32 %v589_v19, %v2789_v62  ;;  %s2313_s28 = sld [smem:[#allocation7 + $0x24]] }
  0xe5   : > { %334 = vrot.lane.b32.xlu0 %v330_v0, %s2591_s24  ;;  %322 = vrot.lane.b32.xlu1 %v317_v1, %s2590_s8  ;;  %v512_v0 = vrot.slane %v506_v54, 2  ;;  %v534_v1 = vrot.slane %v528_v56, 2  ;;  %v558_v32 = vsel %vm494_vm5, %v555_v13, %v557_v25  ;;  %v651_v42 = vmul.f32 %v649_v39, %v2766_v47 }
  0xe6   : > { %v577_v31 = vsel %vm494_vm5, %v575_v27, %v576_v24  ;;  %v599_v41 = vrot.slane %v592_v34, 2  ;;  %v670_v48 = vstv %s2300_s4  ;;  %v652_v50 = vmul.f32 %v649_v39, %v2789_v62  ;;  %s2314_s4 = sld [smem:[#allocation7 + $0x25]] }
  0xe7   : > { %v514_v4 = vsel %vm494_vm5, %v512_v0, %v513_v60  ;;  %v535_v10 = vsel %vm494_vm5, %v533_v8, %v534_v1  ;;  %v537_v23 = vsel %vm494_vm5, %v534_v1, %v536_v14  ;;  %v657_v53 = vrot.slane %v651_v42, 3 }
  0xe8   : > { %v671_v55 = vmul.f32 %v670_v48, %v2762_v44  ;;  %v673_v0 = vmul.f32 %v670_v48, %v2789_v62 }
  0xe9   : > { %373 = vrot.lane.b32.xlu0 %v370_v11, %s2586_s17  ;;  %336 = vrot.lane.b32.xlu1 %v331_v9, %s2591_s24  ;;  %v548_v9 = vmul.f32 %v547_v3, %v2762_v44  ;;  %v516_v11 = vsel %vm494_vm5, %v513_v60, %v515_v2 }
  0xea   : > { %v677_v1 = vrot.slane %v671_v55, 3  ;;  %v680_v7 = vrot.slane %v673_v0, 3 }
  0xeb   : > { %v554_v17 = vrot.slane %v548_v9, 2 }
  0xed   : > { %394 = vrot.lane.b32.xlu0 %v391_v20, %s2587_s27  ;;  %375 = vrot.lane.b32.xlu1 %v372_v21, %s2586_s17  ;;  %v591_v20 = vmul.f32 %v589_v19, %v2766_v47  ;;  %v571_v21 = vmul.f32 %v568_v12, %v2789_v62  ;;  %v556_v22 = vsel %vm494_vm5, %v554_v17, %v555_v13  ;;  %v733_v12 = vstv %s2303_s25  ;;  %s2317_s25 = sld [smem:[#allocation7 + $0x28]] }
  0xee   : > { %v735_v13 = vmul.f32 %v733_v12, %v2766_v47  ;;  %v734_v19 = vmul.f32 %v733_v12, %v2762_v44  ;;  %v736_v27 = vmul.f32 %v733_v12, %v2789_v62 }
  0xef   : > { %v597_v28 = vrot.slane %v591_v20, 2 }
  0xf0   : > { %v743_v34 = vrot.slane %v736_v27, 3 }
  0xf1   : > { %415 = vrot.lane.b32.xlu0 %v412_v29, %s2588_s3  ;;  %396 = vrot.lane.b32.xlu1 %v393_v30, %s2587_s27  ;;  %v578_v29 = vrot.slane %v571_v21, 2  ;;  %v610_v30 = vstv %s2297_s30  ;;  %v600_v52 = vsel %vm494_vm5, %v597_v28, %v599_v41  ;;  %v741_v21 = vrot.slane %v735_v13, 3  ;;  %s2311_s30 = sld [smem:[#allocation7 + $0x22]] }
  0xf2   : > { %v612_v33 = vmul.f32 %v610_v30, %v2766_v47  ;;  %v611_v36 = vmul.f32 %v610_v30, %v2762_v44  ;;  %v613_v43 = vmul.f32 %v610_v30, %v2789_v62 }
  0xf4   : > { %v618_v40 = vrot.slane %v612_v33, 2  ;;  %v617_v45 = vrot.slane %v611_v36, 2  ;;  %v620_v54 = vrot.slane %v613_v43, 2  ;;  %v744_v43 = vsel %vm638_vm6, %v741_v21, %v743_v34 }
  0xf5   : > { %436 = vrot.lane.b32.xlu0 %v433_v35, %s2589_s5  ;;  %417 = vrot.lane.b32.xlu1 %v414_v38, %s2588_s3  ;;  %v596_v35 = vrot.slane %v590_v26, 2  ;;  %v579_v38 = vsel %vm494_vm5, %v576_v24, %v578_v29 }
  0xf6   : > { %v619_v51 = vsel %vm494_vm5, %v617_v45, %v618_v40  ;;  %v621_v61 = vsel %vm494_vm5, %v618_v40, %v620_v54 }
  0xf7   : > { %v598_v37 = vsel %vm494_vm5, %v596_v35, %v597_v28  ;;  %v740_v28 = vrot.slane %v734_v19, 3 }
  0xf9   : > { %457 = vrot.lane.b32.xlu0 %v454_v46, %s2590_s8  ;;  %438 = vrot.lane.b32.xlu1 %v435_v49, %s2589_s5  ;;  %v650_v46 = vmul.f32 %v649_v39, %v2762_v44  ;;  %v672_v49 = vmul.f32 %v670_v48, %v2766_v47  ;;  %v742_v30 = vsel %vm638_vm6, %v740_v28, %v741_v21  ;;  %v814_v39 = vstv %s2307_s29  ;;  %s2321_s29 = sld [smem:[#allocation7 + $0x2c]] }
  0xfa   : > { %v816_v40 = vmul.f32 %v814_v39, %v2766_v47  ;;  %v815_v48 = vmul.f32 %v814_v39, %v2762_v44 }
  0xfb   : > { %v656_v56 = vrot.slane %v650_v46, 3  ;;  %v678_v57 = vrot.slane %v672_v49, 3 }
  0xfd   : > { %478 = vrot.lane.b32.xlu0 %v475_v58, %s2591_s24  ;;  %459 = vrot.lane.b32.xlu1 %v456_v59, %s2590_s8  ;;  %v659_v58 = vrot.slane %v652_v50, 3  ;;  %v691_v59 = vstv %s2301_s6  ;;  %v658_v60 = vsel %vm638_vm6, %v656_v56, %v657_v53  ;;  %v679_v3 = vsel %vm638_vm6, %v677_v1, %v678_v57  ;;  %s2315_s6 = sld [smem:[#allocation7 + $0x26]] }
  0xfe   : > { %v693_v63 = vmul.f32 %v691_v59, %v2766_v47  ;;  %v692_v2 = vmul.f32 %v691_v59, %v2762_v44  ;;  %v694_v9 = vmul.f32 %v691_v59, %v2789_v62  ;;  %v681_v16 = vsel %vm638_vm6, %v678_v57, %v680_v7 }
  0xff   : > { %v822_v50 = vrot.slane %v816_v40, 4  ;;  %v817_v56 = vmul.f32 %v814_v39, %v2789_v62  ;;  %v821_v57 = vrot.slane %v815_v48, 4 }
 0x100   : > { %v699_v6 = vrot.slane %v693_v63, 3  ;;  %v701_v18 = vrot.slane %v694_v9, 3 }
 0x101   : > { %517 = vrot.lane.b32.xlu0 %v514_v4, %s2586_s17  ;;  %480 = vrot.lane.b32.xlu1 %v477_v5, %s2591_s24  ;;  %v660_v4 = vsel %vm638_vm6, %v657_v53, %v659_v58  ;;  %v712_v5 = vstv %s2302_s19  ;;  %v823_v59 = vsel %vm782_vm7, %v821_v57, %v822_v50  ;;  %v824_v0 = vrot.slane %v817_v56, 4  ;;  %s2316_s19 = sld [smem:[#allocation7 + $0x27]] }
 0x102   : > { %v714_v8 = vmul.f32 %v712_v5, %v2766_v47  ;;  %v715_v14 = vmul.f32 %v712_v5, %v2789_v62  ;;  %v702_v25 = vsel %vm638_vm6, %v699_v6, %v701_v18 }
 0x103   : > { %v825_v9 = vsel %vm782_vm7, %v822_v50, %v824_v0 }
 0x104   : > { %v720_v17 = vrot.slane %v714_v8, 3 }
 0x105   : > { %538 = vrot.lane.b32.xlu0 %v535_v10, %s2587_s27  ;;  %519 = vrot.lane.b32.xlu1 %v516_v11, %s2586_s17  ;;  %v698_v10 = vrot.slane %v692_v2, 3  ;;  %v713_v11 = vmul.f32 %v712_v5, %v2762_v44  ;;  %v877_v5 = vstv %s2310_s26  ;;  %s2324_s26 = sld [smem:[#allocation7 + $0x2f]] }
 0x106   : > { %v878_v12 = vmul.f32 %v877_v5, %v2762_v44 }
 0x107   : > { %v700_v15 = vsel %vm638_vm6, %v698_v10, %v699_v6  ;;  %v719_v20 = vrot.slane %v713_v11, 3  ;;  %v879_v6 = vmul.f32 %v877_v5, %v2766_v47 }
 0x108   : > { %v884_v21 = vrot.slane %v878_v12, 4 }
 0x109   : > { %559 = vrot.lane.b32.xlu0 %v556_v22, %s2588_s3  ;;  %540 = vrot.lane.b32.xlu1 %v537_v23, %s2587_s27  ;;  %v722_v22 = vrot.slane %v715_v14, 3  ;;  %v754_v23 = vstv %s2304_s20  ;;  %v721_v24 = vsel %vm638_vm6, %v719_v20, %v720_v17  ;;  %v885_v14 = vrot.slane %v879_v6, 4  ;;  %s2318_s20 = sld [smem:[#allocation7 + $0x29]] }
 0x10a   : > { %v756_v26 = vmul.f32 %v754_v23, %v2766_v47  ;;  %v755_v29 = vmul.f32 %v754_v23, %v2762_v44  ;;  %v757_v36 = vmul.f32 %v754_v23, %v2789_v62  ;;  %v880_v20 = vmul.f32 %v877_v5, %v2789_v62 }
 0x10b   : > { %v886_v23 = vsel %vm782_vm7, %v884_v21, %v885_v14 }
 0x10c   : > { %v762_v33 = vrot.slane %v756_v26, 3  ;;  %v764_v46 = vrot.slane %v757_v36, 3  ;;  %v887_v27 = vrot.slane %v880_v20, 4 }
 0x10d   : > { %580 = vrot.lane.b32.xlu0 %v577_v31, %s2589_s5  ;;  %561 = vrot.lane.b32.xlu1 %v558_v32, %s2588_s3  ;;  %v723_v31 = vsel %vm638_vm6, %v720_v17, %v722_v22  ;;  %v793_v32 = vstv %s2306_s23  ;;  %s2320_s23 = sld [smem:[#allocation7 + $0x2b]] }
 0x10e   : > { %v795_v35 = vmul.f32 %v793_v32, %v2766_v47  ;;  %v796_v41 = vmul.f32 %v793_v32, %v2789_v62  ;;  %v765_v54 = vsel %vm638_vm6, %v762_v33, %v764_v46 }
 0x110   : > { %v801_v45 = vrot.slane %v795_v35, 4 }
 0x111   : > { %601 = vrot.lane.b32.xlu0 %v598_v37, %s2590_s8  ;;  %582 = vrot.lane.b32.xlu1 %v579_v38, %s2589_s5  ;;  %v761_v37 = vrot.slane %v755_v29, 3  ;;  %v794_v38 = vmul.f32 %v793_v32, %v2762_v44  ;;  %v958_v32 = vstv %s2314_s4  ;;  %s3062_s4 = sld [smem:[#allocation7 + $0x7]] }
 0x112   : > { %v960_v34 = vmul.f32 %v958_v32, %v2766_v47 }
 0x113   : > { %v763_v42 = vsel %vm638_vm6, %v761_v37, %v762_v33  ;;  %v800_v49 = vrot.slane %v794_v38, 4  ;;  %v888_v37 = vsel %vm782_vm7, %v885_v14, %v887_v27  ;;  %v1042_v14 = vstv %s2318_s20  ;;  %s2291_s20 = sld [smem:[#allocation7 + $0xe]] }
 0x114   : > { %v966_v46 = vrot.slane %v960_v34, 5  ;;  %v1045_v34 = vmul.f32 %v1042_v14, %v2789_v62 }
 0x115   : > { %622 = vrot.lane.b32.xlu0 %v619_v51, %s2591_s24  ;;  %603 = vrot.lane.b32.xlu1 %v600_v52, %s2590_s8  ;;  %v803_v51 = vrot.slane %v796_v41, 4  ;;  %v835_v52 = vstv %s2308_s7  ;;  %v802_v53 = vsel %vm782_vm7, %v800_v49, %v801_v45  ;;  %v959_v41 = vmul.f32 %v958_v32, %v2762_v44  ;;  %s2322_s7 = sld [smem:[#allocation7 + $0x2d]] }
 0x116   : > { %v837_v55 = vmul.f32 %v835_v52, %v2766_v47  ;;  %v836_v58 = vmul.f32 %v835_v52, %v2762_v44  ;;  %v838_v2 = vmul.f32 %v835_v52, %v2789_v62  ;;  %v961_v52 = vmul.f32 %v958_v32, %v2789_v62 }
 0x118   : > { %v843_v63 = vrot.slane %v837_v55, 4  ;;  %v845_v11 = vrot.slane %v838_v2, 4  ;;  %v1000_v55 = vstv %s2316_s19  ;;  %s3102_s19 = sld [smem:[#allocation7 + $0x33]] }
 0x119   : > { %661 = vrot.lane.b32.xlu0 %v658_v60, %s2586_s17  ;;  %624 = vrot.lane.b32.xlu1 %v621_v61, %s2591_s24  ;;  %v804_v60 = vsel %vm782_vm7, %v801_v45, %v803_v51  ;;  %v856_v61 = vstv %s2309_s16  ;;  %v1001_v2 = vmul.f32 %v1000_v55, %v2762_v44  ;;  %s2323_s16 = sld [smem:[#allocation7 + $0x2e]] }
 0x11a   : > { %v858_v1 = vmul.f32 %v856_v61, %v2766_v47  ;;  %v859_v7 = vmul.f32 %v856_v61, %v2789_v62  ;;  %v846_v18 = vsel %vm782_vm7, %v843_v63, %v845_v11  ;;  %v1003_v11 = vmul.f32 %v1000_v55, %v2789_v62 }
 0x11b   : > { %v1007_v12 = vrot.slane %v1001_v2, 5 }
 0x11c   : > { %v864_v10 = vrot.slane %v858_v1, 4  ;;  %v1010_v21 = vrot.slane %v1003_v11, 5 }
 0x11d   : > { %682 = vrot.lane.b32.xlu0 %v679_v3, %s2587_s27  ;;  %663 = vrot.lane.b32.xlu1 %v660_v4, %s2586_s17  ;;  %v842_v3 = vrot.slane %v836_v58, 4  ;;  %v857_v4 = vmul.f32 %v856_v61, %v2762_v44 }
 0x11f   : > { %v844_v8 = vsel %vm782_vm7, %v842_v3, %v843_v63  ;;  %v863_v13 = vrot.slane %v857_v4, 4  ;;  %v968_v63 = vrot.slane %v961_v52, 5  ;;  %v1123_v52 = vstv %s2322_s7  ;;  %s2334_s7 = sld [smem:[#allocation7 + $0x39]] }
 0x121   : > { %703 = vrot.lane.b32.xlu0 %v700_v15, %s2588_s3  ;;  %684 = vrot.lane.b32.xlu1 %v681_v16, %s2587_s27  ;;  %v866_v15 = vrot.slane %v859_v7, 4  ;;  %v898_v16 = vstv %s2311_s30  ;;  %v865_v17 = vsel %vm782_vm7, %v863_v13, %v864_v10  ;;  %v1021_v7 = vstv %s2317_s25  ;;  %s3037_s30 = sld [smem:[#allocation7]] }
 0x122   : > { %v900_v19 = vmul.f32 %v898_v16, %v2766_v47  ;;  %v899_v22 = vmul.f32 %v898_v16, %v2762_v44  ;;  %v901_v29 = vmul.f32 %v898_v16, %v2789_v62  ;;  %v1022_v13 = vmul.f32 %v1021_v7, %v2762_v44  ;;  %s3121_s25 = sld [smem:[#allocation7 + $0x34]] }
 0x124   : > { %v906_v26 = vrot.slane %v900_v19, 4  ;;  %v908_v39 = vrot.slane %v901_v29, 4 }
 0x125   : > { %724 = vrot.lane.b32.xlu0 %v721_v24, %s2589_s5  ;;  %705 = vrot.lane.b32.xlu1 %v702_v25, %s2588_s3  ;;  %v867_v24 = vsel %vm782_vm7, %v864_v10, %v866_v15  ;;  %v937_v25 = vstv %s2313_s28  ;;  %v1023_v10 = vmul.f32 %v1021_v7, %v2766_v47  ;;  %s2325_s28 = sld [smem:[#allocation7 + $0x30]] }
 0x126   : > { %v939_v28 = vmul.f32 %v937_v25, %v2766_v47  ;;  %v940_v35 = vmul.f32 %v937_v25, %v2789_v62  ;;  %v909_v50 = vsel %vm782_vm7, %v906_v26, %v908_v39 }
 0x127   : > { %v1029_v20 = vrot.slane %v1023_v10, 5 }
 0x128   : > { %v945_v38 = vrot.slane %v939_v28, 5  ;;  %v947_v51 = vrot.slane %v940_v35, 5 }
 0x129   : > { %745 = vrot.lane.b32.xlu0 %v742_v30, %s2590_s8  ;;  %726 = vrot.lane.b32.xlu1 %v723_v31, %s2589_s5  ;;  %v905_v30 = vrot.slane %v899_v22, 4  ;;  %v938_v31 = vmul.f32 %v937_v25, %v2762_v44  ;;  %v1024_v22 = vmul.f32 %v1021_v7, %v2789_v62  ;;  %v1081_v25 = vstv %s2320_s23  ;;  %s3138_s23 = sld [smem:[#allocation7 + $0x35]] }
 0x12a   : > { %v948_v61 = vsel %vm926_vm8, %v945_v38, %v947_v51  ;;  %v1083_v29 = vmul.f32 %v1081_v25, %v2766_v47 }
 0x12b   : > { %v907_v36 = vsel %vm782_vm7, %v905_v30, %v906_v26  ;;  %v944_v40 = vrot.slane %v938_v31, 5  ;;  %v1031_v32 = vrot.slane %v1024_v22, 5 }
 0x12d   : > { %766 = vrot.lane.b32.xlu0 %v763_v42, %s2591_s24  ;;  %747 = vrot.lane.b32.xlu1 %v744_v43, %s2590_s8  ;;  %v979_v42 = vstv %s2315_s6  ;;  %v946_v49 = vsel %vm926_vm8, %v944_v40, %v945_v38  ;;  %v1089_v40 = vrot.slane %v1083_v29, 6  ;;  %s3081_s6 = sld [smem:[#allocation7 + $0x32]] }
 0x12e   : > { %v981_v48 = vmul.f32 %v979_v42, %v2766_v47  ;;  %v982_v0 = vmul.f32 %v979_v42, %v2789_v62 }
 0x130   : > { %v987_v58 = vrot.slane %v981_v48, 5 }
 0x131   : > { %805 = vrot.lane.b32.xlu0 %v802_v53, %s2586_s17  ;;  %768 = vrot.lane.b32.xlu1 %v765_v54, %s2591_s24  ;;  %v980_v53 = vmul.f32 %v979_v42, %v2762_v44  ;;  %v965_v54 = vrot.slane %v959_v41, 5  ;;  %v1102_v41 = vstv %s2321_s29  ;;  %v1032_v42 = vsel %vm926_vm8, %v1029_v20, %v1031_v32  ;;  %s3150_s29 = sld [smem:[#allocation7 + $0x36]] }
 0x132   : > { %v1104_v48 = vmul.f32 %v1102_v41, %v2766_v47  ;;  %v1103_v51 = vmul.f32 %v1102_v41, %v2762_v44  ;;  %v1186_v32 = vstv %s2325_s28  ;;  %s3211_s28 = sld [smem:[#allocation7 + $0x3c]] }
 0x133   : > { %v986_v1 = vrot.slane %v980_v53, 5 }
 0x135   : > { %826 = vrot.lane.b32.xlu0 %v823_v59, %s2587_s27  ;;  %807 = vrot.lane.b32.xlu1 %v804_v60, %s2586_s17  ;;  %v1002_v59 = vmul.f32 %v1000_v55, %v2766_v47  ;;  %v967_v60 = vsel %vm926_vm8, %v965_v54, %v966_v46  ;;  %v988_v5 = vsel %vm926_vm8, %v986_v1, %v987_v58 }
 0x136   : > { %v1125_v55 = vmul.f32 %v1123_v52, %v2766_v47  ;;  %v1124_v1 = vmul.f32 %v1123_v52, %v2762_v44 }
 0x137   : > { %v1008_v6 = vrot.slane %v1002_v59, 5 }
 0x139   : > { %847 = vrot.lane.b32.xlu0 %v844_v8, %s2588_s3  ;;  %828 = vrot.lane.b32.xlu1 %v825_v9, %s2587_s27  ;;  %v969_v8 = vsel %vm926_vm8, %v966_v46, %v968_v63  ;;  %v989_v9 = vrot.slane %v982_v0, 5  ;;  %v1011_v31 = vsel %vm926_vm8, %v1008_v6, %v1010_v21  ;;  %v1052_v46 = vrot.slane %v1045_v34, 5 }
 0x13a   : > { %v1109_v0 = vrot.slane %v1103_v51, 6 }
 0x13b   : > { %v990_v19 = vsel %vm926_vm8, %v987_v58, %v989_v9  ;;  %v1105_v58 = vmul.f32 %v1102_v41, %v2789_v62 }
 0x13d   : > { %868 = vrot.lane.b32.xlu0 %v865_v17, %s2589_s5  ;;  %849 = vrot.lane.b32.xlu1 %v846_v18, %s2588_s3  ;;  %v1009_v17 = vsel %vm926_vm8, %v1007_v12, %v1008_v6  ;;  %v1044_v18 = vmul.f32 %v1042_v14, %v2766_v47  ;;  %v1131_v6 = vrot.slane %v1125_v55, 6  ;;  %v1112_v7 = vrot.slane %v1105_v58, 6 }
 0x13e   : > { %v1126_v12 = vmul.f32 %v1123_v52, %v2789_v62  ;;  %v343_v55 = vstv %s3062_s4  ;;  %s3214_s4 = sld [smem:[#allocation7 + $0x15]] }
 0x13f   : > { %v1050_v28 = vrot.slane %v1044_v18, 5  ;;  %v253_v18 = vstv %s3037_s30  ;;  %s3188_s30 = sld [smem:[#allocation7 + $0x3b]] }
 0x140   : > { %v255_v51 = vmul.f32 %v253_v18, %v2766_v47 }
 0x141   : > { %889 = vrot.lane.b32.xlu0 %v886_v23, %s2590_s8  ;;  %870 = vrot.lane.b32.xlu1 %v867_v24, %s2589_s5  ;;  %v1043_v23 = vmul.f32 %v1042_v14, %v2762_v44  ;;  %v1028_v24 = vrot.slane %v1022_v13, 5  ;;  %v1130_v13 = vrot.slane %v1124_v1, 6 }
 0x143   : > { %v2962_v33 = vpop.permute.xlu0 %264  ;;  %v1030_v30 = vsel %vm926_vm8, %v1028_v24, %v1029_v20  ;;  %v1049_v35 = vrot.slane %v1043_v23, 5  ;;  %v1132_v23 = vsel %vm1070_vm9, %v1130_v13, %v1131_v6  ;;  %v3116_v13 = vld [vmem:[#allocation2 + $0x18] sm:$0xff] }
 0x145   : > { %910 = vrot.lane.b32.xlu0 %v907_v36, %s2591_s24  ;;  %891 = vrot.lane.b32.xlu1 %v888_v37, %s2590_s8  ;;  %v1082_v36 = vmul.f32 %v1081_v25, %v2762_v44  ;;  %v1051_v39 = vsel %vm926_vm8, %v1049_v35, %v1050_v28 }
 0x147   : > { %v2971_v43 = vpop.permute.xlu1 %266  ;;  %v2973_v45 = vpop.permute.xlu0 %278 }
 0x149   : > { %949 = vrot.lane.b32.xlu0 %v946_v49, %s2586_s17  ;;  %912 = vrot.lane.b32.xlu1 %v909_v50, %s2591_s24  ;;  %v1084_v49 = vmul.f32 %v1081_v25, %v2789_v62  ;;  %v1088_v50 = vrot.slane %v1082_v36, 6 }
 0x14b   : > { %v2982_v56 = vpop.permute.xlu1 %280  ;;  %v2984_v57 = vpop.permute.xlu0 %292  ;;  %v1090_v59 = vsel %vm1070_vm9, %v1088_v50, %v1089_v40  ;;  %v1091_v63 = vrot.slane %v1084_v49, 6  ;;  %v1187_v50 = vmul.f32 %v1186_v32, %v2762_v44 }
 0x14d   : > { %970 = vrot.lane.b32.xlu0 %v967_v60, %s2587_s27  ;;  %951 = vrot.lane.b32.xlu1 %v948_v61, %s2586_s17  ;;  %v1053_v60 = vsel %vm926_vm8, %v1050_v28, %v1052_v46  ;;  %v1110_v61 = vrot.slane %v1104_v48, 6  ;;  %v1092_v10 = vsel %vm1070_vm9, %v1089_v40, %v1091_v63  ;;  %v1133_v28 = vrot.slane %v1126_v12, 6 }
 0x14e   : > { %v1188_v40 = vmul.f32 %v1186_v32, %v2766_v47  ;;  %v271_v63 = vadd.f32 %v2971_v43, %v255_v51  ;;  %v344_v43 = vmul.f32 %v343_v55, %v2762_v44  ;;  %v1213_v12 = vstv %s3081_s6  ;;  %s3230_s6 = sld [smem:[#allocation7 + $0x3d]] }
 0x14f   : > { %v2993_v3 = vpop.permute.xlu1 %294  ;;  %v2995_v4 = vpop.permute.xlu0 %306  ;;  %v1111_v9 = vsel %vm1070_vm9, %v1109_v0, %v1110_v61  ;;  %v1113_v24 = vsel %vm1070_vm9, %v1110_v61, %v1112_v7  ;;  %v1134_v46 = vsel %vm1070_vm9, %v1131_v6, %v1133_v28  ;;  %v1189_v6 = vmul.f32 %v1186_v32, %v2789_v62 }
 0x150   : > { %v1194_v61 = vrot.slane %v1188_v40, 6  ;;  %v1193_v7 = vrot.slane %v1187_v50, 6  ;;  %v1227_v28 = vstv %s3102_s19  ;;  %s3249_s19 = sld [smem:[#allocation7 + $0x3e]] }
 0x151   : > { %991 = vrot.lane.b32.xlu0 %v988_v5, %s2588_s3  ;;  %972 = vrot.lane.b32.xlu1 %v969_v8, %s2587_s27  ;;  %v1144_v8 = vstv %s2323_s16  ;;  %s3163_s16 = sld [smem:[#allocation7 + $0x37]] }
 0x152   : > { %v1146_v11 = vmul.f32 %v1144_v8, %v2766_v47  ;;  %v1145_v14 = vmul.f32 %v1144_v8, %v2762_v44  ;;  %v1147_v22 = vmul.f32 %v1144_v8, %v2789_v62  ;;  %v285_v8 = vadd.f32 %v2982_v56, %v271_v63 }
 0x153   : > { %v3004_v15 = vpop.permute.xlu1 %308  ;;  %v3006_v16 = vpop.permute.xlu0 %320  ;;  %v1196_v56 = vrot.slane %v1189_v6, 6 }
 0x154   : > { %v1152_v25 = vrot.slane %v1146_v11, 6  ;;  %v1195_v11 = vsel %vm1070_vm9, %v1193_v7, %v1194_v61 }
 0x155   : > { %1012 = vrot.lane.b32.xlu0 %v1009_v17, %s2589_s5  ;;  %993 = vrot.lane.b32.xlu1 %v990_v19, %s2588_s3  ;;  %v1165_v17 = vstv %s2324_s26  ;;  %s3167_s26 = sld [smem:[#allocation7 + $0x3a]] }
 0x156   : > { %v1167_v21 = vmul.f32 %v1165_v17, %v2766_v47  ;;  %v1166_v29 = vmul.f32 %v1165_v17, %v2762_v44  ;;  %v1168_v48 = vmul.f32 %v1165_v17, %v2789_v62 }
 0x157   : > { %v3015_v26 = vpop.permute.xlu1 %322  ;;  %v3017_v27 = vpop.permute.xlu0 %334 }
 0x158   : > { %v1173_v36 = vrot.slane %v1167_v21, 6  ;;  %v1172_v49 = vrot.slane %v1166_v29, 6  ;;  %v1175_v1 = vrot.slane %v1168_v48, 6 }
 0x159   : > { %1033 = vrot.lane.b32.xlu0 %v1030_v30, %s2590_s8  ;;  %1014 = vrot.lane.b32.xlu1 %v1011_v31, %s2589_s5  ;;  %v254_v30 = vmul.f32 %v253_v18, %v2762_v44  ;;  %v1151_v31 = vrot.slane %v1145_v14, 6 }
 0x15a   : > { %v1176_v17 = vsel %vm1070_vm9, %v1173_v36, %v1175_v1 }
 0x15b   : > { %v3026_v37 = vpop.permute.xlu1 %336  ;;  %v3028_v38 = vpop.permute.xlu0 %373  ;;  %v270_v41 = vadd.f32 %v2962_v33, %v254_v30 }
 0x15d   : > { %1054 = vrot.lane.b32.xlu0 %v1051_v39, %s2591_s24  ;;  %1035 = vrot.lane.b32.xlu1 %v1032_v42, %s2590_s8  ;;  %v1154_v39 = vrot.slane %v1147_v22, 6  ;;  %v1153_v42 = vsel %vm1070_vm9, %v1151_v31, %v1152_v25  ;;  %v284_v52 = vadd.f32 %v2973_v45, %v270_v41  ;;  %v345_v45 = vmul.f32 %v343_v55, %v2766_v47 }
 0x15e   : > { %v299_v47 = vadd.f32 %v2993_v3, %v285_v8  ;;  %v351_v3 = vrot.slane %v344_v43, 1 }
 0x15f   : > { %v3039_v53 = vpop.permute.xlu1 %375  ;;  %v3041_v54 = vpop.permute.xlu0 %394  ;;  %v298_v0 = vadd.f32 %v2984_v57, %v284_v52  ;;  %v352_v44 = vrot.slane %v345_v45, 1  ;;  %v1255_v52 = vstv %s3138_s23  ;;  %v1269_v45 = vstv %s3150_s29  ;;  %s3292_s23 = sld [smem:[#allocation7 + $0x1c]] }
 0x160   : > { %v313_v18 = vadd.f32 %v3004_v15, %v299_v47  ;;  %v1256_v1 = vmul.f32 %v1255_v52, %v3116_v13  ;;  %v3198_v47 = vld [vmem:[#allocation2 + $0x28] sm:$0x3f]  ;;  %s3300_s29 = sld [smem:[#allocation7 + $0x42]] }
 0x161   : > { %1093 = vrot.lane.b32.xlu0 %v1090_v59, %s2586_s17  ;;  %1056 = vrot.lane.b32.xlu1 %v1053_v60, %s2591_s24  ;;  %v1174_v59 = vsel %vm1070_vm9, %v1172_v49, %v1173_v36  ;;  %v1155_v60 = vsel %vm1070_vm9, %v1152_v25, %v1154_v39  ;;  %v1197_v25 = vsel %vm1070_vm9, %v1194_v61, %v1196_v56  ;;  %v1241_v39 = vstv %s3121_s25  ;;  %v3176_v61 = vld [vmem:[#allocation2] sm:$0xff]  ;;  %s3264_s25 = sld [smem:[#allocation7 + $0x40]] }
 0x162   : > { %v353_v15 = vsel %vm350_vm4, %v351_v3, %v352_v44  ;;  %v1242_v49 = vmul.f32 %v1241_v39, %v3116_v13 }
 0x163   : > { %v3050_v2 = vpop.permute.xlu1 %396  ;;  %v3052_v5 = vpop.permute.xlu0 %415 }
 0x165   : > { %1114 = vrot.lane.b32.xlu0 %v1111_v9, %s2587_s27  ;;  %1095 = vrot.lane.b32.xlu1 %v1092_v10, %s2586_s17  ;;  %v312_v9 = vadd.f32 %v2995_v4, %v298_v0  ;;  %v346_v4 = vmul.f32 %v343_v55, %v2789_v62  ;;  %v327_v62 = vadd.f32 %v3015_v26, %v313_v18  ;;  %v3169_v55 = vld [vmem:[#allocation2 + $0x8] sm:$0xff] }
 0x166   : > { %v1228_v26 = vmul.f32 %v1227_v28, %v3116_v13 }
 0x167   : > { %v3064_v19 = vpop.permute.xlu1 %417  ;;  %v3066_v20 = vpop.permute.xlu0 %436  ;;  %v326_v14 = vadd.f32 %v3006_v16, %v312_v9  ;;  %v341_v30 = vadd.f32 %v3026_v37, %v327_v62  ;;  %v3190_v9 = vld [vmem:[#allocation2 + $0x10] sm:$0x3f] }
 0x169   : > { %1135 = vrot.lane.b32.xlu0 %v1132_v23, %s2588_s3  ;;  %1116 = vrot.lane.b32.xlu1 %v1113_v24, %s2587_s27  ;;  %v340_v21 = vadd.f32 %v3017_v27, %v326_v14  ;;  %v1214_v23 = vmul.f32 %v1213_v12, %v3116_v13  ;;  %v3133_v24 = vld [vmem:[#allocation2 + $0x20] sm:$0xff]  ;;  %v354_v27 = vrot.slane %v346_v4, 1 }
 0x16a   : > { %v1215_v36 = vmul.f32 %v1213_v12, %v3133_v24  ;;  %v1229_v50 = vmul.f32 %v1227_v28, %v3133_v24  ;;  %v1243_v6 = vmul.f32 %v1241_v39, %v3133_v24  ;;  %v1257_v56 = vmul.f32 %v1255_v52, %v3133_v24 }
 0x16b   : > { %v3076_v34 = vpop.permute.xlu1 %438  ;;  %v3078_v35 = vpop.permute.xlu0 %457  ;;  %v358_v29 = vadd.f32 %v353_v15, %v340_v21  ;;  %v355_v40 = vsel %vm350_vm4, %v352_v44, %v354_v27  ;;  %v1283_v44 = vstv %s3163_s16  ;;  %v1335_v21 = vstv %s3167_s26  ;;  %s3338_s16 = sld [smem:[#allocation7 + $0x44]] }
 0x16c   : > { %v359_v37 = vadd.f32 %v355_v40, %v341_v30  ;;  %v1336_v30 = vmul.f32 %v1335_v21, %v3116_v13  ;;  %s3360_s26 = sld [smem:[#allocation7 + $0x45]] }
 0x16d   : > { %1156 = vrot.lane.b32.xlu0 %v1153_v42, %s2589_s5  ;;  %1137 = vrot.lane.b32.xlu1 %v1134_v46, %s2588_s3  ;;  %v379_v41 = vadd.f32 %v3028_v38, %v358_v29  ;;  %v487_v42 = vstv %s2291_s20  ;;  %s3287_s20 = sld [smem:[#allocation7 + $0x41]] }
 0x16e   : > { %v489_v38 = vmul.f32 %v3169_v55, %v487_v42  ;;  %v488_v63 = vmul.f32 %v3176_v61, %v487_v42  ;;  %v490_v43 = vmul.f32 %v3190_v9, %v487_v42  ;;  %v1338_v42 = vmul.f32 %v1335_v21, %v3198_v47 }
 0x16f   : > { %v3093_v58 = vpop.permute.xlu1 %459  ;;  %v3095_v33 = vpop.permute.xlu0 %478  ;;  %v400_v51 = vadd.f32 %v3041_v54, %v379_v41 }
 0x170   : > { %v495_v12 = vrot.slane %v488_v63, 2 }
 0x171   : > { %1177 = vrot.lane.b32.xlu0 %v1174_v59, %s2590_s8  ;;  %1158 = vrot.lane.b32.xlu1 %v1155_v60, %s2589_s5  ;;  %v380_v59 = vadd.f32 %v3039_v53, %v359_v37  ;;  %v421_v60 = vadd.f32 %v3052_v5, %v400_v51  ;;  %v1314_v53 = vstv %s2334_s7  ;;  %v496_v5 = vrot.slane %v489_v38, 2  ;;  %s3317_s7 = sld [smem:[#allocation7 + $0x43]] }
 0x172   : > { %v1315_v4 = vmul.f32 %v1314_v53, %v3116_v13  ;;  %v1316_v18 = vmul.f32 %v1314_v53, %v3133_v24  ;;  %v1285_v37 = vmul.f32 %v1283_v44, %v3133_v24  ;;  %v1342_v51 = vrot.slane %v1336_v30, 1 }
 0x173   : > { %v3110_v10 = vpop.permute.xlu1 %480  ;;  %v3112_v57 = vpop.permute.xlu0 %517  ;;  %v401_v7 = vadd.f32 %v3050_v2, %v380_v59  ;;  %v442_v8 = vadd.f32 %v3066_v20, %v421_v60  ;;  %v1270_v20 = vmul.f32 %v1269_v45, %v3116_v13  ;;  %v497_v3 = vsel %vm494_vm5, %v495_v12, %v496_v5 }
 0x174   : > { %v1321_v27 = vrot.slane %v1315_v4, 1  ;;  %v1322_v29 = vrot.slane %v1316_v18, 1 }
 0x175   : > { %1198 = vrot.lane.b32.xlu0 %v1195_v11, %s2591_s24  ;;  %1179 = vrot.lane.b32.xlu1 %v1176_v17, %s2590_s8  ;;  %v422_v11 = vadd.f32 %v3064_v19, %v401_v7  ;;  %v463_v2 = vadd.f32 %v3078_v35, %v442_v8  ;;  %v1345_v8 = vrot.slane %v1338_v42, 1 }
 0x177   : > { %v3128_v16 = vpop.permute.xlu1 %519  ;;  %v3130_v22 = vpop.permute.xlu0 %538  ;;  %v443_v19 = vadd.f32 %v3076_v34, %v422_v11  ;;  %v484_v35 = vadd.f32 %v3095_v33, %v463_v2  ;;  %v1271_v34 = vmul.f32 %v1269_v45, %v3133_v24  ;;  %v1317_v33 = vmul.f32 %v1314_v53, %v3198_v47 }
 0x179   : > { %1218 = vrot.lane.b32.xlu0 %v1214_v23, %s2586_s17  ;;  %1200 = vrot.lane.b32.xlu1 %v1197_v25, %s2591_s24  ;;  %v498_v23 = vrot.slane %v490_v43, 2  ;;  %v464_v62 = vadd.f32 %v3093_v58, %v443_v19  ;;  %v1284_v25 = vmul.f32 %v1283_v44, %v3116_v13  ;;  %v1356_v58 = vstv %s3188_s30  ;;  %s3380_s30 = sld [smem:[#allocation7 + $0x47]] }
 0x17a   : > { %v1324_v41 = vrot.slane %v1317_v33, 1  ;;  %v1357_v38 = vmul.f32 %v1356_v58, %v3116_v13  ;;  %v1358_v63 = vmul.f32 %v1356_v58, %v3133_v24  ;;  %v1359_v53 = vmul.f32 %v1356_v58, %v3198_v47 }
 0x17b   : > { %v3144_v31 = vpop.permute.xlu1 %540  ;;  %v3146_v32 = vpop.permute.xlu0 %559  ;;  %v485_v39 = vadd.f32 %v3110_v10, %v464_v62  ;;  %v499_v40 = vsel %vm494_vm5, %v496_v5, %v498_v23  ;;  %v1323_v10 = vsel %vm350_vm4, %v1321_v27, %v1322_v29  ;;  %v1398_v44 = vstv %s3230_s6  ;;  %s3406_s6 = sld [smem:[#allocation7 + $0x49]] }
 0x17c   : > { %v1325_v7 = vsel %vm350_vm4, %v1322_v29, %v1324_v41  ;;  %v1363_v11 = vrot.slane %v1357_v38, 1  ;;  %v1457_v38 = vstv %s3264_s25  ;;  %s3434_s25 = sld [smem:[#allocation7 + $0x4b]] }
 0x17d   : > { %1232 = vrot.lane.b32.xlu0 %v1228_v26, %s2587_s27  ;;  %1220 = vrot.lane.b32.xlu1 %v1215_v36, %s2586_s17  ;;  %v1337_v26 = vmul.f32 %v1335_v21, %v3133_v24  ;;  %v502_v36 = vadd.f32 %v497_v3, %v484_v35  ;;  %v503_v59 = vadd.f32 %v499_v40, %v485_v39  ;;  %v1366_v21 = vrot.slane %v1359_v53, 1 }
 0x17e   : > { %v1459_v53 = vmul.f32 %v1457_v38, %v3133_v24 }
 0x17f   : > { %v3157_v46 = vpop.permute.xlu1 %561  ;;  %v3159_v48 = vpop.permute.xlu0 %580  ;;  %v1343_v52 = vrot.slane %v1337_v26, 1  ;;  %v523_v60 = vadd.f32 %v3112_v57, %v502_v36  ;;  %v1419_v36 = vstv %s3249_s19  ;;  %s3426_s19 = sld [smem:[#allocation7 + $0x4a]] }
 0x181   : > { %1246 = vrot.lane.b32.xlu0 %v1242_v49, %s2588_s3  ;;  %1234 = vrot.lane.b32.xlu1 %v1229_v50, %s2587_s27  ;;  %v544_v45 = vadd.f32 %v3130_v22, %v523_v60  ;;  %v1344_v43 = vsel %vm350_vm4, %v1342_v51, %v1343_v52  ;;  %v1401_v51 = vmul.f32 %v1398_v44, %v3198_v47 }
 0x183   : > { %v3179_v54 = vpop.permute.xlu1 %582  ;;  %v3181_v0 = vpop.permute.xlu0 %601  ;;  %v565_v22 = vadd.f32 %v3146_v32, %v544_v45 }
 0x185   : > { %1260 = vrot.lane.b32.xlu0 %v1256_v1, %s2589_s5  ;;  %1248 = vrot.lane.b32.xlu1 %v1243_v6, %s2588_s3  ;;  %v1377_v1 = vstv %s3211_s28  ;;  %v631_v6 = vstv %s3214_s4  ;;  %v586_v35 = vadd.f32 %v3159_v48, %v565_v22  ;;  %v1346_v48 = vsel %vm350_vm4, %v1343_v52, %v1345_v8  ;;  %s3387_s28 = sld [smem:[#allocation7 + $0x23]] }
 0x186   : > { %v1378_v2 = vmul.f32 %v1377_v1, %v3116_v13  ;;  %v1379_v12 = vmul.f32 %v1377_v1, %v3133_v24  ;;  %v632_v4 = vmul.f32 %v3176_v61, %v631_v6  ;;  %v633_v18 = vmul.f32 %v3169_v55, %v631_v6  ;;  %s3399_s4 = sld [smem:[#allocation7 + $0x48]] }
 0x187   : > { %v3200_v14 = vpop.permute.xlu1 %603  ;;  %v3202_v17 = vpop.permute.xlu0 %622  ;;  %v634_v26 = vmul.f32 %v3190_v9, %v631_v6  ;;  %v1421_v52 = vmul.f32 %v1419_v36, %v3133_v24  ;;  %v1458_v8 = vmul.f32 %v1457_v38, %v3116_v13  ;;  %v1478_v22 = vstv %s3287_s20  ;;  %s3439_s20 = sld [smem:[#allocation7 + $0x2a]] }
 0x188   : > { %v1384_v23 = vrot.slane %v1378_v2, 1  ;;  %v1385_v62 = vrot.slane %v1379_v12, 1  ;;  %v639_v29 = vrot.slane %v632_v4, 3  ;;  %v640_v30 = vrot.slane %v633_v18, 3 }
 0x189   : > { %1274 = vrot.lane.b32.xlu0 %v1270_v20, %s2590_s8  ;;  %1262 = vrot.lane.b32.xlu1 %v1257_v56, %s2589_s5  ;;  %v524_v20 = vadd.f32 %v3128_v16, %v503_v59  ;;  %v1364_v56 = vrot.slane %v1358_v63, 1  ;;  %v1380_v16 = vmul.f32 %v1377_v1, %v3198_v47  ;;  %v642_v60 = vrot.slane %v634_v26, 3 }
 0x18a   : > { %v1386_v41 = vsel %vm350_vm4, %v1384_v23, %v1385_v62  ;;  %v641_v59 = vsel %vm638_vm6, %v639_v29, %v640_v30  ;;  %v1422_v63 = vmul.f32 %v1419_v36, %v3198_v47  ;;  %v1427_v12 = vrot.slane %v1421_v52, 1 }
 0x18b   : > { %v3222_v28 = vpop.permute.xlu1 %624  ;;  %v3224_v15 = vpop.permute.xlu0 %661  ;;  %v545_v19 = vadd.f32 %v3144_v31, %v524_v20  ;;  %v607_v31 = vadd.f32 %v3181_v0, %v586_v35  ;;  %v1365_v27 = vsel %vm350_vm4, %v1363_v11, %v1364_v56  ;;  %v1367_v39 = vsel %vm350_vm4, %v1364_v56, %v1366_v21 }
 0x18c   : > { %v1387_v58 = vrot.slane %v1380_v16, 1  ;;  %v1429_v20 = vrot.slane %v1422_v63, 1  ;;  %v775_v4 = vstv %s3292_s23  ;;  %v1460_v18 = vmul.f32 %v1457_v38, %v3198_v47  ;;  %s3446_s23 = sld [smem:[#allocation7 + $0x4c]] }
 0x18d   : > { %1288 = vrot.lane.b32.xlu0 %v1284_v25, %s2591_s24  ;;  %1276 = vrot.lane.b32.xlu1 %v1271_v34, %s2590_s8  ;;  %v1399_v25 = vmul.f32 %v1398_v44, %v3116_v13  ;;  %v1400_v34 = vmul.f32 %v1398_v44, %v3133_v24  ;;  %v566_v33 = vadd.f32 %v3157_v46, %v545_v19  ;;  %v1464_v16 = vrot.slane %v1458_v8, 2 }
 0x18e   : > { %v628_v0 = vadd.f32 %v3202_v17, %v607_v31  ;;  %v1420_v17 = vmul.f32 %v1419_v36, %v3116_v13  ;;  %v1465_v23 = vrot.slane %v1459_v53, 2  ;;  %v776_v31 = vmul.f32 %v3176_v61, %v775_v4 }
 0x18f   : > { %v3237_v49 = vpop.permute.xlu1 %663  ;;  %v3239_v50 = vpop.permute.xlu0 %682  ;;  %v587_v46 = vadd.f32 %v3179_v54, %v566_v33  ;;  %v1405_v42 = vrot.slane %v1399_v25, 1  ;;  %v1479_v33 = vmul.f32 %v1478_v22, %v3116_v13  ;;  %v1481_v26 = vmul.f32 %v1478_v22, %v3198_v47 }
 0x190   : > { %v646_v1 = vadd.f32 %v641_v59, %v628_v0  ;;  %v1426_v2 = vrot.slane %v1420_v17, 1  ;;  %v1466_v0 = vsel %vm494_vm5, %v1464_v16, %v1465_v23  ;;  %v778_v17 = vmul.f32 %v3190_v9, %v775_v4 }
 0x191   : > { %1326 = vrot.lane.b32.xlu0 %v1323_v10, %s2586_s17  ;;  %1290 = vrot.lane.b32.xlu1 %v1285_v37, %s2591_s24  ;;  %v1406_v10 = vrot.slane %v1400_v34, 1  ;;  %v608_v54 = vadd.f32 %v3200_v14, %v587_v46 }
 0x192   : > { %v667_v44 = vadd.f32 %v3224_v15, %v646_v1  ;;  %v1428_v34 = vsel %vm350_vm4, %v1426_v2, %v1427_v12  ;;  %v1480_v15 = vmul.f32 %v1478_v22, %v3133_v24  ;;  %v786_v2 = vrot.slane %v778_v17, 4 }
 0x193   : > { %v3254_v5 = vpop.permute.xlu1 %684  ;;  %v3256_v57 = vpop.permute.xlu0 %703  ;;  %v629_v6 = vadd.f32 %v3222_v28, %v608_v54  ;;  %v1407_v11 = vsel %vm350_vm4, %v1405_v42, %v1406_v10  ;;  %v643_v28 = vsel %vm638_vm6, %v640_v30, %v642_v60  ;;  %v1467_v30 = vrot.slane %v1460_v18, 2 }
 0x194   : > { %v688_v25 = vadd.f32 %v3239_v50, %v667_v44  ;;  %v1430_v50 = vsel %vm350_vm4, %v1427_v12, %v1429_v20 }
 0x195   : > { %1328 = vrot.lane.b32.xlu1 %v1325_v7, %s2586_s17  ;;  %1347 = vrot.lane.b32.xlu0 %v1344_v43, %s2587_s27  ;;  %v1408_v7 = vrot.slane %v1401_v51, 1  ;;  %v1388_v43 = vsel %vm350_vm4, %v1385_v62, %v1387_v58  ;;  %v647_v56 = vadd.f32 %v643_v28, %v629_v6  ;;  %v1499_v62 = vstv %s3300_s29  ;;  %s3458_s29 = sld [smem:[#allocation7 + $0x4e]] }
 0x196   : > { %v709_v29 = vadd.f32 %v3256_v57, %v688_v25  ;;  %v1501_v58 = vmul.f32 %v1499_v62, %v3133_v24  ;;  %v1486_v57 = vrot.slane %v1480_v15, 2  ;;  %v783_v51 = vrot.slane %v776_v31, 4 }
 0x197   : > { %v3273_v32 = vpop.permute.xlu1 %705  ;;  %v3275_v3 = vpop.permute.xlu0 %724  ;;  %v1409_v21 = vsel %vm350_vm4, %v1406_v10, %v1408_v7  ;;  %v1485_v10 = vrot.slane %v1479_v33, 2  ;;  %v1502_v52 = vmul.f32 %v1499_v62, %v3198_v47  ;;  %v1468_v1 = vsel %vm494_vm5, %v1465_v23, %v1467_v30 }
 0x198   : > { %v1488_v6 = vrot.slane %v1481_v26, 2  ;;  %v1507_v8 = vrot.slane %v1501_v58, 2  ;;  %v1562_v23 = vstv %s3360_s26  ;;  %s3493_s26 = sld [smem:[#allocation7 + $0x51]] }
 0x199   : > { %1349 = vrot.lane.b32.xlu1 %v1346_v48, %s2587_s27  ;;  %1368 = vrot.lane.b32.xlu0 %v1365_v27, %s2588_s3  ;;  %v3342_v48 = vmul.f32 %v3169_v55, %v775_v4  ;;  %v668_v27 = vadd.f32 %v3237_v49, %v647_v56  ;;  %v730_v49 = vadd.f32 %v3275_v3, %v709_v29  ;;  %v1509_v28 = vrot.slane %v1502_v52, 2 }
 0x19a   : > { %v1489_v56 = vsel %vm494_vm5, %v1486_v57, %v1488_v6 }
 0x19b   : > { %v3294_v40 = vpop.permute.xlu1 %726  ;;  %v3296_v37 = vpop.permute.xlu0 %745  ;;  %v689_v42 = vadd.f32 %v3254_v5, %v668_v27  ;;  %v784_v54 = vrot.slane %v3342_v48, 4  ;;  %v1564_v27 = vmul.f32 %v1562_v23, %v3133_v24 }
 0x19c   : > { %v751_v3 = vadd.f32 %v3296_v37, %v730_v49  ;;  %v1541_v37 = vstv %s3338_s16  ;;  %s3482_s16 = sld [smem:[#allocation7 + $0x50]] }
 0x19d   : > { %1370 = vrot.lane.b32.xlu1 %v1367_v39, %s2588_s3  ;;  %1389 = vrot.lane.b32.xlu0 %v1386_v41, %s2589_s5  ;;  %v1500_v39 = vmul.f32 %v1499_v62, %v3116_v13  ;;  %v1520_v41 = vstv %s3317_s7  ;;  %v710_v5 = vadd.f32 %v3273_v32, %v689_v42  ;;  %v1487_v32 = vsel %vm494_vm5, %v1485_v10, %v1486_v57  ;;  %s3470_s7 = sld [smem:[#allocation7 + $0x4f]] }
 0x19e   : > { %v1521_v38 = vmul.f32 %v1520_v41, %v3116_v13  ;;  %v3371_v59 = vmul.f32 %v1520_v41, %v3133_v24  ;;  %v1523_v4 = vmul.f32 %v1520_v41, %v3198_v47  ;;  %v1542_v18 = vmul.f32 %v1541_v37, %v3116_v13 }
 0x19f   : > { %v3311_v45 = vpop.permute.xlu1 %747  ;;  %v3313_v14 = vpop.permute.xlu0 %766  ;;  %v1506_v7 = vrot.slane %v1500_v39, 2  ;;  %v731_v53 = vadd.f32 %v3294_v40, %v710_v5  ;;  %v1544_v62 = vmul.f32 %v1541_v37, %v3198_v47  ;;  %v787_v25 = vsel %vm782_vm7, %v784_v54, %v786_v2 }
 0x1a0   : > { %v1527_v20 = vrot.slane %v1521_v38, 2  ;;  %v1528_v40 = vrot.slane %v3371_v59, 2  ;;  %v1530_v31 = vrot.slane %v1523_v4, 2  ;;  %v1548_v48 = vrot.slane %v1542_v18, 2 }
 0x1a1   : > { %1391 = vrot.lane.b32.xlu1 %v1388_v43, %s2589_s5  ;;  %1410 = vrot.lane.b32.xlu0 %v1407_v11, %s2590_s8  ;;  %v772_v43 = vadd.f32 %v3313_v14, %v751_v3  ;;  %v785_v11 = vsel %vm782_vm7, %v783_v51, %v784_v54  ;;  %v752_v12 = vadd.f32 %v3311_v45, %v731_v53  ;;  %v1551_v39 = vrot.slane %v1544_v62, 2 }
 0x1a2   : > { %v1508_v44 = vsel %vm494_vm5, %v1506_v7, %v1507_v8  ;;  %v1543_v45 = vmul.f32 %v1541_v37, %v3133_v24  ;;  %v1529_v33 = vsel %vm494_vm5, %v1527_v20, %v1528_v40  ;;  %v919_v41 = vstv %s3387_s28  ;;  %s3515_s28 = sld [smem:[#allocation7 + $0x53]] }
 0x1a3   : > { %v3328_v19 = vpop.permute.xlu1 %768  ;;  %v3330_v35 = vpop.permute.xlu0 %805  ;;  %v1565_v42 = vmul.f32 %v1562_v23, %v3198_v47  ;;  %v1570_v51 = vrot.slane %v1564_v27, 2  ;;  %v1531_v5 = vsel %vm494_vm5, %v1528_v40, %v1530_v31  ;;  %v921_v38 = vmul.f32 %v3169_v55, %v919_v41 }
 0x1a4   : > { %v773_v16 = vadd.f32 %v3328_v19, %v752_v12  ;;  %v1549_v26 = vrot.slane %v1543_v45, 2  ;;  %v922_v40 = vmul.f32 %v3190_v9, %v919_v41  ;;  %v1663_v31 = vstv %s3426_s19  ;;  %s3537_s19 = sld [smem:[#allocation7 + $0x56]] }
 0x1a5   : > { %1412 = vrot.lane.b32.xlu1 %v1409_v21, %s2590_s8  ;;  %1431 = vrot.lane.b32.xlu0 %v1428_v34, %s2591_s24  ;;  %v790_v21 = vadd.f32 %v785_v11, %v772_v43  ;;  %v1510_v34 = vsel %vm494_vm5, %v1507_v8, %v1509_v28  ;;  %v1572_v6 = vrot.slane %v1565_v42, 2  ;;  %v1642_v11 = vstv %s3406_s6  ;;  %s3527_s6 = sld [smem:[#allocation7 + $0x55]] }
 0x1a6   : > { %v791_v29 = vadd.f32 %v787_v25, %v773_v16  ;;  %v1550_v3 = vsel %vm494_vm5, %v1548_v48, %v1549_v26  ;;  %v1552_v59 = vsel %vm494_vm5, %v1549_v26, %v1551_v39  ;;  %v1643_v45 = vmul.f32 %v1642_v11, %v3116_v13 }
 0x1a7   : > { %v3350_v36 = vpop.permute.xlu1 %807  ;;  %v3352_v46 = vpop.permute.xlu0 %826  ;;  %v811_v30 = vadd.f32 %v3330_v35, %v790_v21  ;;  %v1645_v27 = vmul.f32 %v1642_v11, %v3198_v47  ;;  %v1664_v42 = vmul.f32 %v1663_v31, %v3116_v13 }
 0x1a8   : > { %v812_v17 = vadd.f32 %v3350_v36, %v791_v29  ;;  %v1649_v39 = vrot.slane %v1643_v45, 3 }
 0x1a9   : > { %1433 = vrot.lane.b32.xlu1 %v1430_v50, %s2591_s24  ;;  %1469 = vrot.lane.b32.xlu0 %v1466_v0, %s2586_s17  ;;  %v1563_v50 = vmul.f32 %v1562_v23, %v3116_v13  ;;  %v1600_v0 = vstv %s3380_s30  ;;  %v832_v58 = vadd.f32 %v3352_v46, %v811_v30  ;;  %v920_v46 = vmul.f32 %v3176_v61, %v919_v41  ;;  %s3504_s30 = sld [smem:[#allocation7 + $0x52]] }
 0x1aa   : > { %v1601_v54 = vmul.f32 %v1600_v0, %v3116_v13  ;;  %v1602_v35 = vmul.f32 %v1600_v0, %v3133_v24  ;;  %v1603_v7 = vmul.f32 %v1600_v0, %v3198_v47  ;;  %v1644_v23 = vmul.f32 %v1642_v11, %v3133_v24 }
 0x1ab   : > { %v3373_v60 = vpop.permute.xlu1 %828  ;;  %v848_v63 = vpop.permute.xlu0 %847  ;;  %v1569_v57 = vrot.slane %v1563_v50, 2 }
 0x1ac   : > { %v853_v52 = vadd.f32 %v848_v63, %v832_v58  ;;  %v833_v36 = vadd.f32 %v3373_v60, %v812_v17  ;;  %v1608_v37 = vrot.slane %v1602_v35, 3  ;;  %v928_v60 = vrot.slane %v921_v38, 5 }
 0x1ad   : > { %1471 = vrot.lane.b32.xlu1 %v1468_v1, %s2586_s17  ;;  %1490 = vrot.lane.b32.xlu0 %v1487_v32, %s2587_s27  ;;  %v1621_v1 = vstv %s3399_s4  ;;  %v1571_v43 = vsel %vm494_vm5, %v1569_v57, %v1570_v51  ;;  %v1607_v32 = vrot.slane %v1601_v54, 3  ;;  %v1610_v21 = vrot.slane %v1603_v7, 3  ;;  %s3521_s4 = sld [smem:[#allocation7 + $0x31]] }
 0x1ae   : > { %v1622_v28 = vmul.f32 %v1621_v1, %v3116_v13  ;;  %v1623_v20 = vmul.f32 %v1621_v1, %v3133_v24  ;;  %v1624_v16 = vmul.f32 %v1621_v1, %v3198_v47  ;;  %v1650_v58 = vrot.slane %v1644_v23, 3 }
 0x1af   : > { %v850_v14 = vpop.permute.xlu1 %849  ;;  %v869_v22 = vpop.permute.xlu0 %868  ;;  %v1609_v25 = vsel %vm638_vm6, %v1607_v32, %v1608_v37  ;;  %v1611_v26 = vsel %vm638_vm6, %v1608_v37, %v1610_v21  ;;  %v1652_v17 = vrot.slane %v1645_v27, 3  ;;  %v1705_v7 = vstv %s3446_s23  ;;  %s3574_s23 = sld [smem:[#allocation7 + $0x59]] }
 0x1b0   : > { %v874_v63 = vadd.f32 %v869_v22, %v853_v52  ;;  %v854_v2 = vadd.f32 %v850_v14, %v833_v36  ;;  %v1573_v14 = vsel %vm494_vm5, %v1570_v51, %v1572_v6  ;;  %v1631_v0 = vrot.slane %v1624_v16, 3 }
 0x1b1   : > { %1492 = vrot.lane.b32.xlu1 %v1489_v56, %s2587_s27  ;;  %1511 = vrot.lane.b32.xlu0 %v1508_v44, %s2588_s3  ;;  %v927_v56 = vrot.slane %v920_v46, 5  ;;  %v1063_v51 = vstv %s3439_s20  ;;  %v1666_v52 = vmul.f32 %v1663_v31, %v3198_v47  ;;  %v1651_v38 = vsel %vm638_vm6, %v1649_v39, %v1650_v58  ;;  %s3559_s20 = sld [smem:[#allocation7 + $0x58]] }
 0x1b2   : > { %v1653_v11 = vsel %vm638_vm6, %v1650_v58, %v1652_v17 }
 0x1b3   : > { %v871_v19 = vpop.permute.xlu1 %870  ;;  %v890_v15 = vpop.permute.xlu0 %889 }
 0x1b4   : > { %v895_v12 = vadd.f32 %v890_v15, %v874_v63  ;;  %v875_v22 = vadd.f32 %v871_v19, %v854_v2  ;;  %v929_v19 = vsel %vm926_vm8, %v927_v56, %v928_v60  ;;  %v930_v15 = vrot.slane %v922_v40, 5 }
 0x1b5   : > { %1513 = vrot.lane.b32.xlu1 %v1510_v34, %s2588_s3  ;;  %1532 = vrot.lane.b32.xlu0 %v1529_v33, %s2589_s5  ;;  %v1628_v34 = vrot.slane %v1622_v28, 3  ;;  %v1629_v33 = vrot.slane %v1623_v20, 3  ;;  %v1670_v63 = vrot.slane %v1664_v42, 3  ;;  %v1673_v2 = vrot.slane %v1666_v52, 3 }
 0x1b6   : > { %v931_v57 = vsel %vm926_vm8, %v928_v60, %v930_v15  ;;  %v1706_v40 = vmul.f32 %v1705_v7, %v3116_v13 }
 0x1b7   : > { %v892_v49 = vpop.permute.xlu1 %891  ;;  %v911_v10 = vpop.permute.xlu0 %910  ;;  %v1630_v41 = vsel %vm638_vm6, %v1628_v34, %v1629_v33  ;;  %v1632_v46 = vsel %vm638_vm6, %v1629_v33, %v1631_v0 }
 0x1b8   : > { %v916_v44 = vadd.f32 %v911_v10, %v895_v12  ;;  %v896_v62 = vadd.f32 %v892_v49, %v875_v22  ;;  %v1665_v49 = vmul.f32 %v1663_v31, %v3133_v24  ;;  %v1684_v10 = vstv %s3434_s25  ;;  %s3546_s25 = sld [smem:[#allocation7 + $0x57]] }
 0x1b9   : > { %1534 = vrot.lane.b32.xlu1 %v1531_v5, %s2589_s5  ;;  %1553 = vrot.lane.b32.xlu0 %v1550_v3, %s2590_s8  ;;  %v1686_v1 = vmul.f32 %v1684_v10, %v3133_v24  ;;  %v1707_v22 = vmul.f32 %v1705_v7, %v3133_v24 }
 0x1ba   : > { %v934_v48 = vadd.f32 %v929_v19, %v916_v44  ;;  %v1671_v6 = vrot.slane %v1665_v49, 3  ;;  %v1712_v19 = vrot.slane %v1706_v40, 3 }
 0x1bb   : > { %v913_v8 = vpop.permute.xlu1 %912  ;;  %v950_v53 = vpop.permute.xlu0 %949  ;;  %v1692_v60 = vrot.slane %v1686_v1, 3  ;;  %v1713_v15 = vrot.slane %v1707_v22, 3 }
 0x1bc   : > { %v917_v50 = vadd.f32 %v913_v8, %v896_v62  ;;  %v955_v35 = vadd.f32 %v950_v53, %v934_v48  ;;  %v1064_v8 = vmul.f32 %v3176_v61, %v1063_v51  ;;  %v1065_v53 = vmul.f32 %v3169_v55, %v1063_v51 }
 0x1bd   : > { %1555 = vrot.lane.b32.xlu1 %v1552_v59, %s2590_s8  ;;  %1574 = vrot.lane.b32.xlu0 %v1571_v43, %s2591_s24  ;;  %v1685_v59 = vmul.f32 %v1684_v10, %v3116_v13  ;;  %v1687_v43 = vmul.f32 %v1684_v10, %v3198_v47  ;;  %v1672_v44 = vsel %vm638_vm6, %v1670_v63, %v1671_v6  ;;  %v1743_v55 = vstv %s3458_s29  ;;  %s3586_s29 = sld [smem:[#allocation7 + $0x5a]] }
 0x1be   : > { %v935_v54 = vadd.f32 %v931_v57, %v917_v50  ;;  %v1674_v23 = vsel %vm638_vm6, %v1671_v6, %v1673_v2  ;;  %v1708_v62 = vmul.f32 %v1705_v7, %v3198_v47  ;;  %v1744_v31 = vmul.f32 %v1743_v55, %v3116_v13 }
 0x1bf   : > { %v952_v4 = vpop.permute.xlu1 %951  ;;  %v971_v18 = vpop.permute.xlu0 %970  ;;  %v1691_v20 = vrot.slane %v1685_v59, 3  ;;  %v1694_v21 = vrot.slane %v1687_v43, 3  ;;  %v1745_v27 = vmul.f32 %v1743_v55, %v3133_v24  ;;  %v1714_v10 = vsel %vm638_vm6, %v1712_v19, %v1713_v15 }
 0x1c0   : > { %v976_v36 = vadd.f32 %v971_v18, %v955_v35  ;;  %v956_v32 = vadd.f32 %v952_v4, %v935_v54  ;;  %v1072_v4 = vrot.slane %v1065_v53, 6  ;;  %v1066_v18 = vmul.f32 %v3190_v9, %v1063_v51 }
 0x1c1   : > { %1576 = vrot.lane.b32.xlu1 %v1573_v14, %s2591_s24  ;;  %1612 = vrot.lane.b32.xlu0 %v1609_v25, %s2586_s17  ;;  %v1071_v14 = vrot.slane %v1064_v8, 6  ;;  %v1693_v33 = vsel %vm638_vm6, %v1691_v20, %v1692_v60  ;;  %v1764_v9 = vstv %s3470_s7  ;;  %v1715_v58 = vrot.slane %v1708_v62, 3  ;;  %s3594_s7 = sld [smem:[#allocation7 + $0x5c]] }
 0x1c2   : > { %v1750_v57 = vrot.slane %v1744_v31, 4  ;;  %v1765_v51 = vmul.f32 %v1764_v9, %v3116_v13  ;;  %v1766_v54 = vmul.f32 %v1764_v9, %v3133_v24  ;;  %v1751_v52 = vrot.slane %v1745_v27, 4 }
 0x1c3   : > { %v973_v29 = vpop.permute.xlu1 %972  ;;  %v992_v30 = vpop.permute.xlu0 %991  ;;  %v1767_v1 = vmul.f32 %v1764_v9, %v3198_v47  ;;  %v1207_v27 = vstv %s3521_s4  ;;  %s2374_s4 = sld [smem:[#allocation7 + $0x61]] }
 0x1c4   : > { %v997_v37 = vadd.f32 %v992_v30, %v976_v36  ;;  %v977_v56 = vadd.f32 %v973_v29, %v956_v32  ;;  %v1073_v29 = vsel %vm1070_vm9, %v1071_v14, %v1072_v4  ;;  %v1074_v30 = vrot.slane %v1066_v18, 6 }
 0x1c5   : > { %1614 = vrot.lane.b32.xlu1 %v1611_v26, %s2586_s17  ;;  %1633 = vrot.lane.b32.xlu0 %v1630_v41, %s2587_s27  ;;  %v1695_v26 = vsel %vm638_vm6, %v1692_v60, %v1694_v21  ;;  %v1746_v41 = vmul.f32 %v1743_v55, %v3198_v47  ;;  %v1771_v6 = vrot.slane %v1765_v51, 4  ;;  %v1772_v7 = vrot.slane %v1766_v54, 4  ;;  %v3552_v51 = vld [vmem:[#allocation2 + $0x18] sm:$0xff] }
 0x1c6   : > { %v1208_v54 = vmul.f32 %v3552_v51, %v1207_v27 }
 0x1c7   : > { %v994_v5 = vpop.permute.xlu1 %993  ;;  %v1013_v3 = vpop.permute.xlu0 %1012  ;;  %v1753_v59 = vrot.slane %v1746_v41, 4  ;;  %v1773_v40 = vsel %vm782_vm7, %v1771_v6, %v1772_v7  ;;  %v1907_v6 = vstv %s3537_s19  ;;  %s2383_s19 = sshll.u32 %s2631_s13, 8 }
 0x1c8   : > { %v1018_v61 = vadd.f32 %v1013_v3, %v997_v37  ;;  %v998_v16 = vadd.f32 %v994_v5, %v977_v56  ;;  %v1785_v5 = vstv %s3482_s16  ;;  %v1075_v3 = vsel %vm1070_vm9, %v1072_v4, %v1074_v30  ;;  %s2370_s16 = sld [smem:[#allocation7 + $0x5d]] }
 0x1c9   : > { %1635 = vrot.lane.b32.xlu1 %v1632_v46, %s2587_s27  ;;  %1654 = vrot.lane.b32.xlu0 %v1651_v38, %s2588_s3  ;;  %v1716_v38 = vsel %vm638_vm6, %v1713_v15, %v1715_v58  ;;  %v1786_v8 = vmul.f32 %v1785_v5, %v3116_v13  ;;  %v1787_v53 = vmul.f32 %v1785_v5, %v3133_v24  ;;  %v1827_v4 = vstv %s3504_s30  ;;  %s2372_s30 = sld [smem:[#allocation7 + $0x5f]] }
 0x1ca   : > { %v1752_v37 = vsel %vm782_vm7, %v1750_v57, %v1751_v52  ;;  %v1754_v2 = vsel %vm782_vm7, %v1751_v52, %v1753_v59  ;;  %v1886_v57 = vstv %s3527_s6  ;;  %s2277_s6 = sshll.u32 %s2730_s14, 4 }
 0x1cb   : > { %v1015_v12 = vpop.permute.xlu1 %1014  ;;  %v1034_v28 = vpop.permute.xlu0 %1033  ;;  %v1792_v22 = vrot.slane %v1786_v8, 4  ;;  %v1793_v56 = vrot.slane %v1787_v53, 4 }
 0x1cc   : > { %v1039_v45 = vadd.f32 %v1034_v28, %v1018_v61  ;;  %v1019_v48 = vadd.f32 %v1015_v12, %v998_v16  ;;  %v1774_v12 = vrot.slane %v1767_v1, 4  ;;  %v1788_v28 = vmul.f32 %v1785_v5, %v3198_v47 }
 0x1cd   : > { %1656 = vrot.lane.b32.xlu1 %v1653_v11, %s2588_s3  ;;  %1675 = vrot.lane.b32.xlu0 %v1672_v44, %s2589_s5  ;;  %v1806_v11 = vstv %s3493_s26  ;;  %v1794_v62 = vsel %vm782_vm7, %v1792_v22, %v1793_v56  ;;  %s2371_s26 = sld [smem:[#allocation7 + $0x5e]] }
 0x1ce   : > { %v1807_v61 = vmul.f32 %v1806_v11, %v3116_v13  ;;  %v1808_v14 = vmul.f32 %v1806_v11, %v3133_v24  ;;  %v1775_v18 = vsel %vm782_vm7, %v1772_v7, %v1774_v12  ;;  %v1795_v21 = vrot.slane %v1788_v28, 4 }
 0x1cf   : > { %v1036_v25 = vpop.permute.xlu1 %1035  ;;  %v1055_v34 = vpop.permute.xlu0 %1054  ;;  %v1809_v16 = vmul.f32 %v1806_v11, %v3198_v47  ;;  %v1908_v12 = vmul.f32 %v3552_v51, %v1907_v6 }
 0x1d0   : > { %v1060_v50 = vadd.f32 %v1055_v34, %v1039_v45  ;;  %v1040_v0 = vadd.f32 %v1036_v25, %v1019_v48  ;;  %v1813_v25 = vrot.slane %v1807_v61, 4  ;;  %v1828_v34 = vmul.f32 %v1827_v4, %v3116_v13 }
 0x1d1   : > { %1677 = vrot.lane.b32.xlu1 %v1674_v23, %s2589_s5  ;;  %1696 = vrot.lane.b32.xlu0 %v1693_v33, %s2590_s8  ;;  %v1829_v33 = vmul.f32 %v1827_v4, %v3133_v24  ;;  %v1814_v31 = vrot.slane %v1808_v14, 4  ;;  %v1848_v48 = vstv %s3515_s28  ;;  %v1816_v9 = vrot.slane %v1809_v16, 4  ;;  %s2373_s28 = sld [smem:[#allocation7 + $0x60]] }
 0x1d2   : > { %v1078_v39 = vadd.f32 %v1073_v29, %v1060_v50  ;;  %v1796_v50 = vsel %vm782_vm7, %v1793_v56, %v1795_v21  ;;  %v1830_v29 = vmul.f32 %v1827_v4, %v3198_v47  ;;  %v1849_v58 = vmul.f32 %v1848_v48, %v3116_v13 }
 0x1d3   : > { %v1057_v42 = vpop.permute.xlu1 %1056  ;;  %v1094_v49 = vpop.permute.xlu0 %1093  ;;  %v1850_v41 = vmul.f32 %v1848_v48, %v3133_v24  ;;  %v1817_v13 = vsel %vm782_vm7, %v1814_v31, %v1816_v9  ;;  %v1851_v24 = vmul.f32 %v1848_v48, %v3198_v47  ;;  %v1910_v14 = vmul.f32 %v1907_v6, %v3198_v47 }
 0x1d4   : > { %v1061_v35 = vadd.f32 %v1057_v42, %v1040_v0  ;;  %v1099_v17 = vadd.f32 %v1094_v49, %v1078_v39  ;;  %v1834_v0 = vrot.slane %v1828_v34, 4  ;;  %v1835_v39 = vrot.slane %v1829_v33, 4 }
 0x1d5   : > { %1698 = vrot.lane.b32.xlu1 %v1695_v26, %s2590_s8  ;;  %1717 = vrot.lane.b32.xlu0 %v1714_v10, %s2591_s24  ;;  %v1815_v10 = vsel %vm782_vm7, %v1813_v25, %v1814_v31  ;;  %v1914_v21 = vrot.slane %v1908_v12, 5 }
 0x1d6   : > { %v1079_v46 = vadd.f32 %v1075_v3, %v1061_v35  ;;  %v1837_v35 = vrot.slane %v1830_v29, 4  ;;  %v1836_v5 = vsel %vm782_vm7, %v1834_v0, %v1835_v39  ;;  %v1855_v3 = vrot.slane %v1849_v58, 4 }
 0x1d7   : > { %v1096_v36 = vpop.permute.xlu1 %1095  ;;  %v1115_v63 = vpop.permute.xlu0 %1114  ;;  %v1917_v29 = vrot.slane %v1910_v14, 5  ;;  %v1970_v58 = vstv %s3574_s23 }
 0x1d8   : > { %v1100_v43 = vadd.f32 %v1096_v36, %v1079_v46  ;;  %v1120_v32 = vadd.f32 %v1115_v63, %v1099_v17  ;;  %v1856_v46 = vrot.slane %v1850_v41, 4  ;;  %v3561_v36 = vld [vmem:[#allocation2 + $0x20] sm:$0xff]  ;;  %v1838_v53 = vsel %vm782_vm7, %v1835_v39, %v1837_v35 }
 0x1d9   : > { %1719 = vrot.lane.b32.xlu1 %v1716_v38, %s2591_s24  ;;  %1755 = vrot.lane.b32.xlu0 %v1752_v37, %s2586_s17  ;;  %v1887_v38 = vmul.f32 %v3552_v51, %v1886_v57  ;;  %v1888_v63 = vmul.f32 %v3561_v36, %v1886_v57  ;;  %v1209_v7 = vmul.f32 %v3561_v36, %v1207_v27 }
 0x1da   : > { %v1909_v28 = vmul.f32 %v3561_v36, %v1907_v6  ;;  %v1857_v22 = vsel %vm782_vm7, %v1855_v3, %v1856_v46  ;;  %v1972_v35 = vmul.f32 %v3561_v36, %v1970_v58  ;;  %v1991_v3 = vstv %s3586_s29 }
 0x1db   : > { %v1117_v20 = vpop.permute.xlu1 %1116  ;;  %v1136_v60 = vpop.permute.xlu0 %1135  ;;  %v1894_v56 = vrot.slane %v1888_v63, 5 }
 0x1dc   : > { %v1121_v44 = vadd.f32 %v1117_v20, %v1100_v43  ;;  %v1141_v55 = vadd.f32 %v1136_v60, %v1120_v32  ;;  %v1858_v43 = vrot.slane %v1851_v24, 4  ;;  %v1889_v32 = vmul.f32 %v1886_v57, %v3198_v47  ;;  %v3598_v57 = vld [vmem:[#allocation2 + $0x28] sm:$0x3f] }
 0x1dd   : > { %1757 = vrot.lane.b32.xlu1 %v1754_v2, %s2586_s17  ;;  %1776 = vrot.lane.b32.xlu0 %v1773_v40, %s2587_s27  ;;  %v1893_v2 = vrot.slane %v1887_v38, 5  ;;  %v1928_v20 = vstv %s3546_s25  ;;  %v1915_v16 = vrot.slane %v1909_v28, 5  ;;  %v1994_v28 = vmul.f32 %v3598_v57, %v1991_v3  ;;  %s175_s25 = scalar_lea.vmem [#allocation8], %s2277_s6 }
 0x1de   : > { %v1930_v33 = vmul.f32 %v3561_v36, %v1928_v20 }
 0x1df   : > { %v1138_v45 = vpop.permute.xlu1 %1137  ;;  %v1157_v23 = vpop.permute.xlu0 %1156  ;;  %v1895_v34 = vsel %vm926_vm8, %v1893_v2, %v1894_v56  ;;  %v1916_v9 = vsel %vm926_vm8, %v1914_v21, %v1915_v16 }
 0x1e0   : > { %v1142_v19 = vadd.f32 %v1138_v45, %v1121_v44  ;;  %v1162_v15 = vadd.f32 %v1157_v23, %v1141_v55  ;;  %v1859_v44 = vsel %vm782_vm7, %v1856_v46, %v1858_v43  ;;  %v1896_v55 = vrot.slane %v1889_v32, 5 }
 0x1e1   : > { %1778 = vrot.lane.b32.xlu1 %v1775_v18, %s2587_s27  ;;  %1797 = vrot.lane.b32.xlu0 %v1794_v62, %s2588_s3  ;;  %v1929_v45 = vmul.f32 %v3552_v51, %v1928_v20  ;;  %v1949_v23 = vstv %s3559_s20  ;;  %v1936_v39 = vrot.slane %v1930_v33, 5  ;;  %v1992_v43 = vmul.f32 %v3552_v51, %v1991_v3  ;;  %s2182_s20 = sshll.u32 %s175_s25, 4  ;;  %s3758_s20 = int_to_ptr.vmem [resolvable:$true] %s2182_s20 }
 0x1e2   : > { %v1951_v31 = vmul.f32 %v3561_v36, %v1949_v23  ;;  %v1897_v27 = vsel %vm926_vm8, %v1894_v56, %v1896_v55  ;;  %v1993_v32 = vmul.f32 %v3561_v36, %v1991_v3  ;;  %v2092_v33 = vstv %s2372_s30  ;;  %s2510_s13 = scalar_lea.vmem %s3758_s20, 256 }
 0x1e3   : > { %v1159_v30 = vpop.permute.xlu1 %1158  ;;  %v1178_v26 = vpop.permute.xlu0 %1177  ;;  %v1998_v56 = vrot.slane %v1992_v43, 5  ;;  %p2511_p12 = scmp.ne.s32.totalorder %s3758_s20, %s2510_s13 }
 0x1e4   : > { %v1163_v42 = vadd.f32 %v1159_v30, %v1142_v19  ;;  %v1183_v49 = vadd.f32 %v1178_v26, %v1162_v15  ;;  %v1931_v19 = vmul.f32 %v1928_v20, %v3198_v47  ;;  %v1950_v15 = vmul.f32 %v3552_v51, %v1949_v23 }
 0x1e5   : > { %1799 = vrot.lane.b32.xlu1 %v1796_v50, %s2588_s3  ;;  %1818 = vrot.lane.b32.xlu0 %v1815_v10, %s2589_s5  ;;  %v1935_v30 = vrot.slane %v1929_v45, 5  ;;  %p2512_p2 = pnand %p2511_p12, %p3820_p0 }
 0x1e6   : > { %v1938_v47 = vrot.slane %v1931_v19, 5  ;;  %v1956_v41 = vrot.slane %v1950_v15, 5 }
 0x1e7   : > { %v1180_v17 = vpop.permute.xlu1 %1179  ;;  %v1199_v52 = vpop.permute.xlu0 %1198  ;;  %p2513_p7 = pneg %p2512_p2 }
 0x1e8   : > { %v1184_v59 = vadd.f32 %v1180_v17, %v1163_v42  ;;  %v1204_v1 = vadd.f32 %v1199_v52, %v1183_v49  ;;  %v1957_v42 = vrot.slane %v1951_v31, 5  ;;  %v1918_v52 = vsel %vm926_vm8, %v1915_v16, %v1917_v29 }
 0x1e9   : > { %1820 = vrot.lane.b32.xlu1 %v1817_v13, %s2589_s5  ;;  %1839 = vrot.lane.b32.xlu0 %v1836_v5, %s2590_s8  ;;  %v1971_v13 = vmul.f32 %v3552_v51, %v1970_v58  ;;  %v1937_v5 = vsel %vm926_vm8, %v1935_v30, %v1936_v39  ;;  %v1939_v46 = vsel %vm926_vm8, %v1936_v39, %v1938_v47 }
 0x1ea   : > { %v1210_v8 = vadd.f32 %v1208_v54, %v1204_v1  ;;  %v1952_v54 = vmul.f32 %v3598_v57, %v1949_v23  ;;  %v1958_v38 = vsel %vm926_vm8, %v1956_v41, %v1957_v42  ;;  %v2093_v41 = vmul.f32 %v3552_v51, %v2092_v33 }
 0x1eb   : > { %v1201_v37 = vpop.permute.xlu1 %1200  ;;  %v1219_v11 = vpop.permute.xlu0 %1218  ;;  %v1977_v6 = vrot.slane %v1971_v13, 5 }
 0x1ec   : > { %v1205_v60 = vadd.f32 %v1201_v37, %v1184_v59  ;;  %v1224_v40 = vadd.f32 %v1219_v11, %v1210_v8  ;;  %v1959_v63 = vrot.slane %v1952_v54, 5  ;;  %v1973_v8 = vmul.f32 %v3598_v57, %v1970_v58 }
 0x1ed   : > { %1841 = vrot.lane.b32.xlu1 %v1838_v53, %s2590_s8  ;;  %1860 = vrot.lane.b32.xlu0 %v1857_v22, %s2591_s24  ;;  %v2029_v37 = vstv %s3594_s7  ;;  %v2099_v3 = vrot.slane %v2093_v41, 6  ;;  %s3756_s7 = scalar_lea.hbm %s3804_s2, %s2383_s19 }
 0x1ee   : > { %v1211_v61 = vadd.f32 %v1209_v7, %v1205_v60  ;;  %v1978_v7 = vrot.slane %v1972_v35, 5  ;;  %v1960_v12 = vsel %vm926_vm8, %v1957_v42, %v1959_v63  ;;  %v2030_v20 = vmul.f32 %v3552_v51, %v2029_v37 }
 0x1ef   : > { %v1221_v4 = vpop.permute.xlu1 %1220  ;;  %v1233_v18 = vpop.permute.xlu0 %1232  ;;  %v2031_v60 = vmul.f32 %v3561_v36, %v2029_v37  ;;  %v1980_v22 = vrot.slane %v1973_v8, 5  ;;  %v2032_v16 = vmul.f32 %v3598_v57, %v2029_v37  ;;  %v2094_v42 = vmul.f32 %v3561_v36, %v2092_v33 }
 0x1f0   : > { %v1225_v62 = vadd.f32 %v1221_v4, %v1211_v61  ;;  %v1238_v25 = vadd.f32 %v1233_v18, %v1224_v40  ;;  %v1979_v40 = vsel %vm926_vm8, %v1977_v6, %v1978_v7  ;;  %v1999_v61 = vrot.slane %v1993_v32, 5 }
 0x1f1   : > { %1862 = vrot.lane.b32.xlu1 %v1859_v44, %s2591_s24  ;;  %1898 = vrot.lane.b32.xlu0 %v1895_v34, %s2586_s17  ;;  %v2050_v44 = vstv %s2370_s16  ;;  %v2001_v4 = vrot.slane %v1994_v28, 5  ;;  %v2036_v18 = vrot.slane %v2030_v20, 6  ;;  %v2037_v21 = vrot.slane %v2031_v60, 6  ;;  %s2169_s16 = scalar_lea.sflag [#allocation5], %s2730_s14 }
 0x1f2   : > { %v1981_v45 = vsel %vm926_vm8, %v1978_v7, %v1980_v22  ;;  %v2000_v23 = vsel %vm926_vm8, %v1998_v56, %v1999_v61  ;;  %v2071_v34 = vstv %s2371_s26  ;;  %v2113_v35 = vstv %s2373_s28  ;;  %s2592_s26 = smov [#allocation8]  }
 0x1f3   : > { %v1235_v48 = vpop.permute.xlu1 %1234  ;;  %v1247_v50 = vpop.permute.xlu0 %1246  ;;  %v2002_v31 = vsel %vm926_vm8, %v1999_v61, %v2001_v4  ;;  %v2072_v30 = vmul.f32 %v3552_v51, %v2071_v34  ;;  %v2074_v47 = vmul.f32 %v3598_v57, %v2071_v34  ;;  %v2114_v6 = vmul.f32 %v3552_v51, %v2113_v35  ;;  %s2514_s30 = sshll.u32 %s2592_s26, 4  ;;  %s2515_s30 = int_to_ptr.vmem [resolvable:$false] %s2514_s30 }
 0x1f4   : > { %v1239_v26 = vadd.f32 %v1235_v48, %v1225_v62  ;;  %v1252_v0 = vadd.f32 %v1247_v50, %v1238_v25  ;;  %v2051_v62 = vmul.f32 %v3552_v51, %v2050_v44  ;;  %v2052_v25 = vmul.f32 %v3561_v36, %v2050_v44  ;;  %s2516_s28 = scalar_lea.vmem %s2515_s30, 512  ;;  %p2517_p8 = scmp.lt.s32.totalorder %s3758_s20, %s2515_s30 }
 0x1f5   : > { %1900 = vrot.lane.b32.xlu1 %v1897_v27, %s2586_s17  ;;  %1919 = vrot.lane.b32.xlu0 %v1916_v9, %s2587_s27  ;;  %v2038_v48 = vsel %vm1070_vm9, %v2036_v18, %v2037_v21  ;;  %v2039_v50 = vrot.slane %v2032_v16, 6  ;;  %v2053_v27 = vmul.f32 %v3598_v57, %v2050_v44  ;;  %v2078_v54 = vrot.slane %v2072_v30, 6  ;;  %p2518_p9 = scmp.lt.s32.totalorder %s2516_s28, %s2510_s13 }
 0x1f6   : > { %v2057_v9 = vrot.slane %v2051_v62, 6  ;;  %v2058_v29 = vrot.slane %v2052_v25, 6  ;;  %v2115_v7 = vmul.f32 %v3561_v36, %v2113_v35  ;;  %v2134_v8 = vstv %s2374_s4 }
 0x1f7   : > { %v1249_v49 = vpop.permute.xlu1 %1248  ;;  %v1261_v10 = vpop.permute.xlu0 %1260  ;;  %v2040_v58 = vsel %vm1070_vm9, %v2037_v21, %v2039_v50  ;;  %v2116_v20 = vmul.f32 %v3598_v57, %v2113_v35  ;;  %v2120_v60 = vrot.slane %v2114_v6, 6  ;;  %v2135_v22 = vmul.f32 %v3552_v51, %v2134_v8  ;;  %p2519_p10 = por %p2518_p9, %p2517_p8 }
 0x1f8   : > { %v1253_v24 = vadd.f32 %v1249_v49, %v1239_v26  ;;  %v3603_v17 = vadd.f32 %v1261_v10, %v1252_v0  ;;  %v2073_v26 = vmul.f32 %v3561_v36, %v2071_v34  ;;  %v2059_v49 = vsel %vm1070_vm9, %v2057_v9, %v2058_v29 }
 0x1f9   : > { %1921 = vrot.lane.b32.xlu1 %v1918_v52, %s2587_s27  ;;  %1940 = vrot.lane.b32.xlu0 %v1937_v5, %s2588_s3  ;;  %v2060_v10 = vrot.slane %v2053_v27, 6  ;;  %v2081_v5 = vrot.slane %v2074_v47, 6  ;;  %v2136_v56 = vmul.f32 %v3561_v36, %v2134_v8  ;;  %v2123_v18 = vrot.slane %v2116_v20, 6  ;;  %p2520_p1 = pnand %p2519_p10, %p2513_p7 }
 0x1fa   : > { %v2079_v13 = vrot.slane %v2073_v26, 6  ;;  %v2141_v16 = vrot.slane %v2135_v22, 6 }
 0x1fb   : > { %v1263_v59 = vpop.permute.xlu1 %1262  ;;  %v3612_v1 = vpop.permute.xlu0 %1274 }
 0x1fc   : > { %v3615_v53 = vadd.f32 %v1263_v59, %v1253_v24  ;;  %v2061_v59 = vsel %vm1070_vm9, %v2058_v29, %v2060_v10  ;;  %v2080_v63 = vsel %vm1070_vm9, %v2078_v54, %v2079_v13  ;;  %v2082_v37 = vsel %vm1070_vm9, %v2079_v13, %v2081_v5 }
 0x1fd   : > { %1942 = vrot.lane.b32.xlu1 %v1939_v46, %s2588_s3  ;;  %1961 = vrot.lane.b32.xlu0 %v1958_v38, %s2589_s5  ;;  %v2100_v46 = vrot.slane %v2094_v42, 6  ;;  %v2095_v38 = vmul.f32 %v3598_v57, %v2092_v33  ;;  %v1280_v26 = vadd.f32 %v3612_v1, %v3603_v17 }
 0x1ff   : > { %v3622_v11 = vpop.permute.xlu1 %1276  ;;  %v3624_v2 = vpop.permute.xlu0 %1288  ;;  %v2102_v28 = vrot.slane %v2095_v38, 6 }
 0x200   : > { %v1294_v10 = vadd.f32 %v3624_v2, %v1280_v26  ;;  %v1281_v54 = vadd.f32 %v3622_v11, %v3615_v53 }
 0x201   : > { %1963 = vrot.lane.b32.xlu1 %v1960_v12, %s2589_s5  ;;  %1982 = vrot.lane.b32.xlu0 %v1979_v40, %s2590_s8  ;;  %v2101_v12 = vsel %vm1070_vm9, %v2099_v3, %v2100_v46  ;;  %v2121_v40 = vrot.slane %v2115_v7, 6  ;;  %v2103_v4 = vsel %vm1070_vm9, %v2100_v46, %v2102_v28 }
 0x203   : > { %v3633_v55 = vpop.permute.xlu1 %1290  ;;  %v3635_v14 = vpop.permute.xlu0 %1326  ;;  %v2122_v21 = vsel %vm1070_vm9, %v2120_v60, %v2121_v40  ;;  %v2124_v33 = vsel %vm1070_vm9, %v2121_v40, %v2123_v18 }
 0x204   : > { %v1295_v17 = vadd.f32 %v3633_v55, %v1281_v54 }
 0x205   : > { %1984 = vrot.lane.b32.xlu1 %v1981_v45, %s2590_s8  ;;  %2003 = vrot.lane.b32.xlu0 %v2000_v23, %s2591_s24  ;;  %v2142_v45 = vrot.slane %v2136_v56, 6  ;;  %v2137_v23 = vmul.f32 %v3598_v57, %v2134_v8 }
 0x207   : > { %v3644_v19 = vpop.permute.xlu1 %1328  ;;  %v3646_v15 = vpop.permute.xlu0 %1347 }
 0x209   : > { %2005 = vrot.lane.b32.xlu1 %v2002_v31, %s2591_s24  ;;  %2041 = vrot.lane.b32.xlu0 %v2038_v48, %s2586_s17  ;;  %v2143_v31 = vsel %vm1070_vm9, %v2141_v16, %v2142_v45  ;;  %v2144_v48 = vrot.slane %v2137_v23, 6 }
 0x20b   : > { %v3655_v0 = vpop.permute.xlu1 %1349  ;;  %v3657_v39 = vpop.permute.xlu0 %1368  ;;  %v2145_v30 = vsel %vm1070_vm9, %v2142_v45, %v2144_v48 }
 0x20d   : > { %2043 = vrot.lane.b32.xlu1 %v2040_v58, %s2586_s17  ;;  %2062 = vrot.lane.b32.xlu0 %v2059_v49, %s2587_s27  ;;  %s2333_s17 = sld [smem:[#allocation7 + $0x38]] }
 0x20f   : > { %v3666_v24 = vpop.permute.xlu1 %1370  ;;  %v3668_v52 = vpop.permute.xlu0 %1389 }
 0x211   : > { %2064 = vrot.lane.b32.xlu1 %v2061_v59, %s2587_s27  ;;  %2083 = vrot.lane.b32.xlu0 %v2080_v63, %s2588_s3  ;;  %s2340_s27 = sld [smem:[#allocation7 + $0x3f]] }
 0x213   : > { %v3677_v43 = vpop.permute.xlu1 %1391  ;;  %v3679_v32 = vpop.permute.xlu0 %1410  ;;  %v1297_v34 = vstv %s2333_s17 }
 0x214   : > { %v1298_v50 = vmul.f32 %v3552_v51, %v1297_v34  ;;  %v1299_v27 = vmul.f32 %v3561_v36, %v1297_v34  ;;  %v1300_v41 = vmul.f32 %v3598_v57, %v1297_v34 }
 0x215   : > { %2085 = vrot.lane.b32.xlu1 %v2082_v37, %s2588_s3  ;;  %2104 = vrot.lane.b32.xlu0 %v2101_v12, %s2589_s5  ;;  %s2347_s3 = sld [smem:[#allocation7 + $0x46]] }
 0x216   : > { %v1304_v58 = vrot.slane %v1298_v50, 1  ;;  %v1305_v47 = vrot.slane %v1299_v27, 1  ;;  %v1307_v35 = vrot.slane %v1300_v41, 1 }
 0x217   : > { %v3688_v61 = vpop.permute.xlu1 %1412  ;;  %v1432_v44 = vpop.permute.xlu0 %1431  ;;  %v1440_v7 = vstv %s2340_s27 }
 0x218   : > { %v1306_v13 = vsel %vm350_vm4, %v1304_v58, %v1305_v47  ;;  %v1308_v1 = vsel %vm350_vm4, %v1305_v47, %v1307_v35  ;;  %v1441_v12 = vmul.f32 %v3552_v51, %v1440_v7  ;;  %v1442_v55 = vmul.f32 %v3561_v36, %v1440_v7 }
 0x219   : > { %2106 = vrot.lane.b32.xlu1 %v2103_v4, %s2589_s5  ;;  %2125 = vrot.lane.b32.xlu0 %v2122_v21, %s2590_s8  ;;  %v1311_v46 = vadd.f32 %v1306_v13, %v1294_v10  ;;  %v1312_v63 = vadd.f32 %v1308_v1, %v1295_v17  ;;  %s2354_s5 = sld [smem:[#allocation7 + $0x4d]] }
 0x21a   : > { %v1447_v22 = vrot.slane %v1441_v12, 2  ;;  %v1448_v56 = vrot.slane %v1442_v55, 2 }
 0x21b   : > { %v1434_v62 = vpop.permute.xlu1 %1433  ;;  %v3695_v25 = vpop.permute.xlu0 %1469  ;;  %v1332_v6 = vadd.f32 %v3635_v14, %v1311_v46  ;;  %v1333_v8 = vadd.f32 %v3644_v19, %v1312_v63  ;;  %v1443_v19 = vmul.f32 %v3598_v57, %v1440_v7  ;;  %v1583_v50 = vstv %s2347_s3 }
 0x21c   : > { %v1585_v26 = vmul.f32 %v3561_v36, %v1583_v50 }
 0x21d   : > { %2127 = vrot.lane.b32.xlu1 %v2124_v33, %s2590_s8  ;;  %2146 = vrot.lane.b32.xlu0 %v2143_v31, %s2591_s24  ;;  %v1353_v2 = vadd.f32 %v3646_v15, %v1332_v6  ;;  %v1354_v28 = vadd.f32 %v3655_v0, %v1333_v8  ;;  %v1449_v0 = vsel %vm494_vm5, %v1447_v22, %v1448_v56  ;;  %s2361_s8 = sld [smem:[#allocation7 + $0x54]] }
 0x21e   : > { %v1591_v35 = vrot.slane %v1585_v26, 3 }
 0x21f   : > { %v1472_v9 = vpop.permute.xlu1 %1471  ;;  %v1491_v29 = vpop.permute.xlu0 %1490  ;;  %v1374_v37 = vadd.f32 %v3657_v39, %v1353_v2  ;;  %v1375_v14 = vadd.f32 %v3666_v24, %v1354_v28  ;;  %v1726_v55 = vstv %s2354_s5 }
 0x221   : > { %2148 = vrot.lane.b32.xlu1 %v2145_v30, %s2591_s24  ;;  %v1395_v20 = vadd.f32 %v3668_v52, %v1374_v37  ;;  %v1396_v39 = vadd.f32 %v3677_v43, %v1375_v14  ;;  %v1450_v52 = vrot.slane %v1443_v19, 2  ;;  %v1728_v14 = vmul.f32 %v3561_v36, %v1726_v55  ;;  %s2368_s24 = sld [smem:[#allocation7 + $0x5b]] }
 0x223   : > { %v1493_v42 = vpop.permute.xlu1 %1492  ;;  %v1512_v49 = vpop.permute.xlu0 %1511  ;;  %v1416_v15 = vadd.f32 %v3679_v32, %v1395_v20  ;;  %v1417_v16 = vadd.f32 %v3688_v61, %v1396_v39  ;;  %v1451_v32 = vsel %vm494_vm5, %v1448_v56, %v1450_v52  ;;  %v1584_v61 = vmul.f32 %v3552_v51, %v1583_v50 }
 0x224   : > { %v1727_v20 = vmul.f32 %v3552_v51, %v1726_v55 }
 0x225   : > { %v1437_v4 = vadd.f32 %v1432_v44, %v1416_v15  ;;  %v1438_v23 = vadd.f32 %v1434_v62, %v1417_v16  ;;  %v1590_v13 = vrot.slane %v1584_v61, 3  ;;  %v1734_v16 = vrot.slane %v1728_v14, 4 }
 0x226   : > { %v1869_v61 = vstv %s2361_s8 }
 0x227   : > { %v1514_v5 = vpop.permute.xlu1 %1513  ;;  %v1533_v3 = vpop.permute.xlu0 %1532  ;;  %v1454_v45 = vadd.f32 %v1449_v0, %v1437_v4  ;;  %v1455_v33 = vadd.f32 %v1451_v32, %v1438_v23  ;;  %v1733_v4 = vrot.slane %v1727_v20, 4 }
 0x229   : > { %v1475_v31 = vadd.f32 %v3695_v25, %v1454_v45  ;;  %v1476_v27 = vadd.f32 %v1472_v9, %v1455_v33  ;;  %v1586_v25 = vmul.f32 %v3598_v57, %v1583_v50  ;;  %v1735_v23 = vsel %vm782_vm7, %v1733_v4, %v1734_v16 }
 0x22b   : > { %v1535_v38 = vpop.permute.xlu1 %1534  ;;  %v1554_v59 = vpop.permute.xlu0 %1553  ;;  %v1496_v44 = vadd.f32 %v1491_v29, %v1475_v31  ;;  %v1497_v62 = vadd.f32 %v1493_v42, %v1476_v27  ;;  %v1593_v63 = vrot.slane %v1586_v25, 3 }
 0x22d   : > { %v1517_v30 = vadd.f32 %v1512_v49, %v1496_v44  ;;  %v1518_v10 = vadd.f32 %v1514_v5, %v1497_v62  ;;  %v1592_v49 = vsel %vm638_vm6, %v1590_v13, %v1591_v35  ;;  %v1594_v5 = vsel %vm638_vm6, %v1591_v35, %v1593_v63 }
 0x22e   : > { %v1871_v62 = vmul.f32 %v3561_v36, %v1869_v61 }
 0x22f   : > { %v1556_v53 = vpop.permute.xlu1 %1555  ;;  %v1575_v11 = vpop.permute.xlu0 %1574  ;;  %v1538_v41 = vadd.f32 %v1533_v3, %v1517_v30  ;;  %v1539_v29 = vadd.f32 %v1535_v38, %v1518_v10 }
 0x231   : > { %v1559_v54 = vadd.f32 %v1554_v59, %v1538_v41  ;;  %v1560_v9 = vadd.f32 %v1556_v53, %v1539_v29  ;;  %v1872_v29 = vmul.f32 %v3598_v57, %v1869_v61 }
 0x233   : > { %v1577_v60 = vpop.permute.xlu1 %1576  ;;  %v1613_v40 = vpop.permute.xlu0 %1612  ;;  %v1580_v1 = vadd.f32 %v1575_v11, %v1559_v54 }
 0x234   : > { %v1581_v7 = vadd.f32 %v1577_v60, %v1560_v9 }
 0x235   : > { %v1597_v42 = vadd.f32 %v1592_v49, %v1580_v1 }
 0x236   : > { %v1598_v37 = vadd.f32 %v1594_v5, %v1581_v7  ;;  %v1879_v7 = vrot.slane %v1872_v29, 5 }
 0x237   : > { %v1615_v18 = vpop.permute.xlu1 %1614  ;;  %v1634_v21 = vpop.permute.xlu0 %1633  ;;  %v1618_v8 = vadd.f32 %v1613_v40, %v1597_v42  ;;  %v1729_v40 = vmul.f32 %v3598_v57, %v1726_v55 }
 0x238   : > { %v1619_v11 = vadd.f32 %v1615_v18, %v1598_v37 }
 0x239   : > { %v1639_v12 = vadd.f32 %v1634_v21, %v1618_v8 }
 0x23b   : > { %v1636_v24 = vpop.permute.xlu1 %1635  ;;  %v1655_v34 = vpop.permute.xlu0 %1654 }
 0x23c   : > { %v1660_v53 = vadd.f32 %v1655_v34, %v1639_v12  ;;  %v1640_v15 = vadd.f32 %v1636_v24, %v1619_v11  ;;  %v1736_v34 = vrot.slane %v1729_v40, 4  ;;  %v2012_v11 = vstv %s2368_s24 }
 0x23f   : > { %v1657_v48 = vpop.permute.xlu1 %1656  ;;  %v1676_v43 = vpop.permute.xlu0 %1675 }
 0x240   : > { %v1681_v22 = vadd.f32 %v1676_v43, %v1660_v53  ;;  %v1661_v19 = vadd.f32 %v1657_v48, %v1640_v15  ;;  %v1737_v48 = vsel %vm782_vm7, %v1734_v16, %v1736_v34 }
 0x243   : > { %v1678_v58 = vpop.permute.xlu1 %1677  ;;  %v1697_v47 = vpop.permute.xlu0 %1696 }
 0x244   : > { %v1702_v39 = vadd.f32 %v1697_v47, %v1681_v22  ;;  %v1682_v21 = vadd.f32 %v1678_v58, %v1661_v19  ;;  %v1870_v47 = vmul.f32 %v3552_v51, %v1869_v61  ;;  %v2013_v22 = vmul.f32 %v3552_v51, %v2012_v11 }
 0x247   : > { %v1699_v46 = vpop.permute.xlu1 %1698  ;;  %v1718_v17 = vpop.permute.xlu0 %1717 }
 0x248   : > { %v1723_v0 = vadd.f32 %v1718_v17, %v1702_v39  ;;  %v1703_v18 = vadd.f32 %v1699_v46, %v1682_v21  ;;  %v1876_v46 = vrot.slane %v1870_v47, 5  ;;  %v1877_v17 = vrot.slane %v1871_v62, 5 }
 0x249   : > { %v2019_v21 = vrot.slane %v2013_v22, 6 }
 0x24a   : > { %v1740_v24 = vadd.f32 %v1735_v23, %v1723_v0  ;;  %v1880_v8 = vsel %vm926_vm8, %v1877_v17, %v1879_v7 }
 0x24b   : > { %v1720_v6 = vpop.permute.xlu1 %1719  ;;  %v1756_v2 = vpop.permute.xlu0 %1755 }
 0x24c   : > { %v1724_v32 = vadd.f32 %v1720_v6, %v1703_v18  ;;  %v1761_v43 = vadd.f32 %v1756_v2, %v1740_v24  ;;  %v1878_v2 = vsel %vm926_vm8, %v1876_v46, %v1877_v17 }
 0x24e   : > { %v1741_v44 = vadd.f32 %v1737_v48, %v1724_v32 }
 0x24f   : > { %v1758_v3 = vpop.permute.xlu1 %1757  ;;  %v1777_v59 = vpop.permute.xlu0 %1776 }
 0x250   : > { %v1782_v30 = vadd.f32 %v1777_v59, %v1761_v43  ;;  %v1762_v26 = vadd.f32 %v1758_v3, %v1741_v44 }
 0x253   : > { %v1779_v28 = vpop.permute.xlu1 %1778  ;;  %v1798_v38 = vpop.permute.xlu0 %1797 }
 0x254   : > { %v1803_v58 = vadd.f32 %v1798_v38, %v1782_v30  ;;  %v1783_v54 = vadd.f32 %v1779_v28, %v1762_v26 }
 0x257   : > { %v1800_v60 = vpop.permute.xlu1 %1799  ;;  %v1819_v56 = vpop.permute.xlu0 %1818 }
 0x258   : > { %v1824_v13 = vadd.f32 %v1819_v56, %v1803_v58  ;;  %v1804_v35 = vadd.f32 %v1800_v60, %v1783_v54  ;;  %v2014_v60 = vmul.f32 %v3561_v36, %v2012_v11 }
 0x25a   : > { %v2020_v0 = vrot.slane %v2014_v60, 6 }
 0x25b   : > { %v1821_v52 = vpop.permute.xlu1 %1820  ;;  %v1840_v45 = vpop.permute.xlu0 %1839 }
 0x25c   : > { %v1845_v25 = vadd.f32 %v1840_v45, %v1824_v13  ;;  %v1825_v49 = vadd.f32 %v1821_v52, %v1804_v35  ;;  %v2015_v52 = vmul.f32 %v3598_v57, %v2012_v11  ;;  %v2021_v24 = vsel %vm1070_vm9, %v2019_v21, %v2020_v0 }
 0x25e   : > { %v2022_v51 = vrot.slane %v2015_v52, 6 }
 0x25f   : > { %v1842_v33 = vpop.permute.xlu1 %1841  ;;  %v1861_v31 = vpop.permute.xlu0 %1860 }
 0x260   : > { %v1866_v63 = vadd.f32 %v1861_v31, %v1845_v25  ;;  %v1846_v6 = vadd.f32 %v1842_v33, %v1825_v49  ;;  %v2023_v43 = vsel %vm1070_vm9, %v2020_v0, %v2022_v51 }
 0x262   : > { %v1883_v59 = vadd.f32 %v1878_v2, %v1866_v63 }
 0x263   : > { %v1863_v50 = vpop.permute.xlu1 %1862  ;;  %v1899_v27 = vpop.permute.xlu0 %1898 }
 0x264   : > { %v1867_v3 = vadd.f32 %v1863_v50, %v1846_v6  ;;  %v1904_v55 = vadd.f32 %v1899_v27, %v1883_v59 }
 0x266   : > { %v1884_v28 = vadd.f32 %v1880_v8, %v1867_v3 }
 0x267   : > { %v1901_v41 = vpop.permute.xlu1 %1900  ;;  %v1920_v10 = vpop.permute.xlu0 %1919 }
 0x268   : > { %v1925_v38 = vadd.f32 %v1920_v10, %v1904_v55  ;;  %v1905_v14 = vadd.f32 %v1901_v41, %v1884_v28 }
 0x26b   : > { %v1922_v1 = vpop.permute.xlu1 %1921  ;;  %v1941_v9 = vpop.permute.xlu0 %1940 }
 0x26c   : > { %v1946_v15 = vadd.f32 %v1941_v9, %v1925_v38  ;;  %v1926_v56 = vadd.f32 %v1922_v1, %v1905_v14 }
 0x26f   : > { %v1943_v42 = vpop.permute.xlu1 %1942  ;;  %v1962_v5 = vpop.permute.xlu0 %1961 }
 0x270   : > { %v1967_v19 = vadd.f32 %v1962_v5, %v1946_v15  ;;  %v1947_v16 = vadd.f32 %v1943_v42, %v1926_v56 }
 0x273   : > { %v1964_v37 = vpop.permute.xlu1 %1963  ;;  %v1983_v12 = vpop.permute.xlu0 %1982 }
 0x274   : > { %v1988_v40 = vadd.f32 %v1983_v12, %v1967_v19  ;;  %v1968_v45 = vadd.f32 %v1964_v37, %v1947_v16 }
 0x277   : > { %v1985_v53 = vpop.permute.xlu1 %1984  ;;  %v2004_v20 = vpop.permute.xlu0 %2003 }
 0x278   : > { %v2009_v18 = vadd.f32 %v2004_v20, %v1988_v40  ;;  %v1989_v32 = vadd.f32 %v1985_v53, %v1968_v45 }
 0x27a   : > { %v2026_v36 = vadd.f32 %v2021_v24, %v2009_v18 }
 0x27b   : > { %v2006_v39 = vpop.permute.xlu1 %2005  ;;  %v2042_v4 = vpop.permute.xlu0 %2041 }
 0x27c   : > { %v2010_v33 = vadd.f32 %v2006_v39, %v1989_v32  ;;  %v2047_v44 = vadd.f32 %v2042_v4, %v2026_v36 }
 0x27e   : > { %v2027_v50 = vadd.f32 %v2023_v43, %v2010_v33 }
 0x27f   : > { %v2044_v23 = vpop.permute.xlu1 %2043  ;;  %v2063_v34 = vpop.permute.xlu0 %2062 }
 0x280   : > { %v2068_v61 = vadd.f32 %v2063_v34, %v2047_v44  ;;  %v2048_v57 = vadd.f32 %v2044_v23, %v2027_v50 }
 0x283   : > { %v2065_v31 = vpop.permute.xlu1 %2064  ;;  %v2084_v48 = vpop.permute.xlu0 %2083 }
 0x284   : > { %v2089_v26 = vadd.f32 %v2084_v48, %v2068_v61  ;;  %v2069_v62 = vadd.f32 %v2065_v31, %v2048_v57 }
 0x287   : > { %v2086_v27 = vpop.permute.xlu1 %2085  ;;  %v2105_v30 = vpop.permute.xlu0 %2104 }
 0x288   : > { %v2110_v41 = vadd.f32 %v2105_v30, %v2089_v26  ;;  %v2090_v10 = vadd.f32 %v2086_v27, %v2069_v62 }
 0x28b   : > { %v2107_v58 = vpop.permute.xlu1 %2106  ;;  %v2126_v47 = vpop.permute.xlu0 %2125 }
 0x28c   : > { %v2131_v54 = vadd.f32 %v2126_v47, %v2110_v41  ;;  %v2111_v25 = vadd.f32 %v2107_v58, %v2090_v10 }
 0x28f   : > { %v2128_v13 = vpop.permute.xlu1 %2127  ;;  %v2147_v35 = vpop.permute.xlu0 %2146 }
 0x290   : > { %v2152_v46 = vadd.f32 %v2147_v35, %v2131_v54  ;;  %v2132_v17 = vadd.f32 %v2128_v13, %v2111_v25 }
 0x292   : > { %v2375_v29 = vmul.f32 -1.442695, %v2152_v46 }
 0x293   : > { %v2149_v1 = vpop.permute.xlu1 %2148 }
 0x294   : > { %2453 = vpow2.f32 %v2375_v29  ;;  %v2153_v9 = vadd.f32 %v2149_v1, %v2132_v17 }
 0x296   : > { %v2376_v49 = vmul.f32 -1.442695, %v2153_v9 }
 0x298   : > { %2455 = vpow2.f32 %v2376_v49 }
 0x2a1   : > { %v2454_v63 = vpop.eup %2453 }
 0x2a2   : > { %v2160_v6 = vadd.f32 1.0, %v2454_v63 }
 0x2a4   : > { %2457 = vrcp.f32 %v2160_v6 }
 0x2a5   : > { %v2456_v2 = vpop.eup %2455 }
 0x2a6   : > { %v2161_v7 = vadd.f32 1.0, %v2456_v2 }
 0x2a8   : > { %2459 = vrcp.f32 %v2161_v7 }
 0x2b1   : > { %v2458_v42 = vpop.eup %2457 }
 0x2b2   : > { %2166 = vst.msk [vmem:[%s175_s25] sm:$0xff] %vm184_vm0, %v2458_v42 }
 0x2b5   : > { %v2460_v5 = vpop.eup %2459 }
 0x2b6   : > { %2167 = vst.msk [vmem:[%s175_s25 + $0x8] sm:$0xff] %vm184_vm0, %v2460_v5 }
 0x2b7   : > { %2523 = shalt.err (!%p2520_p1)
}
 0x2b8   : > { %s2524_s4 = scalar_lea.hbm %s3756_s7, 256  ;;  %s2528_s3 = scalar_lea.hbm %s3804_s2, 512 }
 0x2b9   : > { %p2525_p4 = scmp.ne.s32.totalorder %s3756_s7, %s2524_s4  ;;  %p2529_p6 = scmp.lt.s32.totalorder %s3756_s7, %s3804_s2 }
 0x2ba   : > { %p2530_p13 = scmp.lt.s32.totalorder %s2528_s3, %s2524_s4 }
 0x2bb   : > { %p2526_p11 = pnand %p2525_p4, %p3820_p0 }
 0x2bc   : > { %p2531_p3 = por %p2530_p13, %p2529_p6 }
 0x2bd   : > { %p2527_p5 = pneg %p2526_p11 }
 0x2bf   : > { %p2532_p12 = pnand %p2531_p3, %p2527_p5 }
 0x2c1   : > { %2535 = shalt.err (!%p2532_p12)
}
 0x2c2   : > { %s2593_s24 = smov 128   ;;  %s2594_s6 = smov 8  }
 0x2c3   : > { %2390 = dma.vmem_to_hbm [thread:$0]  (%p3820_p0), %s3758_s20, 256, %s3756_s7, %s2169_s16, %s2593_s24, %s2593_s24, %s2594_s6  }
 0x2c4 PF: > { %s2197_s19 = sand.u32 1, %s2566_s9   ;;  %p3821_p2 = scmp.ne.s32.totalorder %s3812_s22, 0 }
 0x2c5   : > { %p3822_p7 = scmp.ge.s32.totalorder %s2578_s12, 2  ;;  %s2198_s25 = scalar_lea.sflag [#allocation5], %s2197_s19 }
 0x2c7   : > { %p2401_p8 = pnand %p3822_p7, %p3821_p2 }
 0x2c9   : > { %p2402_p9 = pneg %p2401_p8 }
 0x2cb   : > { %2561 = dma.done.wait (%p2402_p9), %s2198_s25, 256  }
 0x2cc   : > { %2563 = vsyncadd (%p2402_p9), %s2198_s25, 4294967040  ;;  %p16_p10 = scmp.ge.s32.totalorder %s2635_s15, 4   ;;  %s3823_s9 = smov %s2570_s10 }
 0x2cd   : > { %s3824_s10 = smov %s2574_s11  ;;  %s3825_s11 = smov %s2647_s18 }
 0x2ce   : > { %s3826_s12 = smov %s2635_s15  ;;  %18 = sbr.rel (!%p16_p10) target bundleno = 6 (0x6), region = 79 }
 0x2d3   :  { %2203 = vsyncpa [#allocation4], 1 }
 0x2d4   :  { %2205 = vsyncpa [#allocation4 + $0x1], 1 }
 0x2d5   :  { %2206 = vsyncpa [#allocation5], 1 }
 0x2d6   :  { %2208 = vsyncpa [#allocation5 + $0x1], 1 }
 0x2d7   :  { %2209 = vsyncpa [#allocation6], 1 }
 0x2d8   :  { %2211 = vsyncpa [#allocation6 + $0x1], 1 }

</bundles_post_ra>
